<compile_context>
chip_gen: v6e
topology: v6e:2x2x1
jax: 0.10.0
libtpu: 0.0.40
codegen_flags: <defaults>
</compile_context>

<pallas_src>
import functools

import jax
import jax.numpy as jnp
from jax import lax
from jax.experimental import pallas as pl
from jax.experimental.pallas import tpu as pltpu


# Above the v5e/v6e scoped defaults, below v7x's 64 MiB physical VMEM.
VMEM_LIMIT_BYTES = 48 * 1024 * 1024


def _pick_q_tile(L, target=256):
    """Largest divisor of L <= target (bounds score / FFN intermediates)."""
    t = min(L, target)
    while L % t:
        t -= 1
    return t


def _conv_tap_masks(H, W):
    """(9, H*W, 1) bf16 validity masks for the 3x3 'same' conv taps."""
    y, x = jnp.meshgrid(jnp.arange(H), jnp.arange(W), indexing="ij")
    masks = []
    for ty in range(3):
        for tx in range(3):
            yv, xv = y + ty - 1, x + tx - 1
            valid = (yv >= 0) & (yv < H) & (xv >= 0) & (xv < W)
            masks.append(valid.reshape(H * W, 1))
    return jnp.stack(masks, axis=0).astype(jnp.bfloat16)


# ----------------------------------------------------------------------------
# Fused kernel: undownsampler (l == 0) + one TransformerDecoderLayer per grid
# step along the layer axis + Upscaler 3x3 conv epilogue (l == last).
# Grid = (batch, layer); activation h carried in VMEM scratch across layers.
# ----------------------------------------------------------------------------
def _decoder_kernel(x_ref, uw_ref, ub_ref,
                    wqkv_ref, bqkv_ref, wo_ref, bo_ref,
                    w1_ref, b1_ref, w2_ref, b2_ref, g_ref, beta_ref,
                    cw_ref, cb_ref, mask_ref,
                    o_ref,
                    h_ref, hp_ref,
                    *, n_heads, W, tq):
    f32, bf16 = jnp.float32, jnp.bfloat16
    l = pl.program_id(1)
    n_layers = pl.num_programs(1)
    L, d = h_ref.shape
    dh = d // n_heads
    scale = 1.0 / float(dh) ** 0.5
    c_out = cw_ref.shape[-1]

    # ---- layer 0 only: undownsampler Conv1d(c_in, d, k=1) == per-pos linear.
    @pl.when(l == 0)
    def _():
        h_ref[...] = (jnp.dot(x_ref[...], uw_ref[...],
                              preferred_element_type=f32) + ub_ref[...])

    # ------------------------- one TransformerDecoderLayer ------------------
    hb = h_ref[...].astype(bf16)                                   # (L, d)

    # Fused QKV: one lane-dense (L, d) @ (d, 3d) MXU matmul, f32 accumulate.
    qkv = (jnp.dot(hb, wqkv_ref[...], preferred_element_type=f32)
           + bqkv_ref[...])                                        # (L, 3d)
    kb = qkv[:, d:2 * d].astype(bf16)                              # (L, d)
    vb = qkv[:, 2 * d:].astype(bf16)                               # (L, d)

    # Query-tiled attention + FFN + LayerNorm.  q/k/v are materialized above,
    # so h_ref can be overwritten tile by tile with this layer's output.
    n_q = L // tq
    for t in range(n_q):
        q_t = qkv[t * tq:(t + 1) * tq, :d].astype(bf16)            # (tq, d)
        ctx_heads = []
        for head in range(n_heads):
            cols = slice(head * dh, (head + 1) * dh)
            # scores: (tq, dh) x (L, dh)^T, contract dh, f32 accumulate
            s = lax.dot_general(q_t[:, cols], kb[:, cols],
                                (((1,), (1,)), ((), ())),
                                preferred_element_type=f32) * scale
            s = s - jnp.max(s, axis=-1, keepdims=True)
            p = jnp.exp(s)
            p = p * pl.reciprocal(jnp.sum(p, axis=-1, keepdims=True),
                                  approx=True)
            ctx_heads.append(jnp.dot(p.astype(bf16), vb[:, cols],
                                     preferred_element_type=f32))  # (tq, dh)

        # Merge heads along lanes -> (tq, d); single output-projection matmul
        # (head-sum folded into the contraction -- no (H, L, d) intermediate).
        ctx = jnp.concatenate(ctx_heads, axis=-1).astype(bf16)
        attn = (jnp.dot(ctx, wo_ref[...], preferred_element_type=f32)
                + bo_ref[...])                                     # (tq, d)

        # FFN: Conv1d(d,4d,1)+ReLU -> Conv1d(4d,d,1)+ReLU (no residual, as in
        # the reference module).
        h1 = jnp.maximum(
            jnp.dot(attn.astype(bf16), w1_ref[...],
                    preferred_element_type=f32) + b1_ref[...], 0.0)
        h2 = jnp.maximum(
            jnp.dot(h1.astype(bf16), w2_ref[...],
                    preferred_element_type=f32) + b2_ref[...], 0.0)

        # LayerNorm over d_model (PyTorch defaults, eps=1e-5), f32.
        mu = jnp.mean(h2, axis=-1, keepdims=True)
        var = jnp.mean((h2 - mu) * (h2 - mu), axis=-1, keepdims=True)
        h_ref[pl.ds(t * tq, tq), :] = ((h2 - mu) * lax.rsqrt(var + 1e-5)
                                       * g_ref[...] + beta_ref[...])

    # ---- last layer only: fused Upscaler 3x3 'same' conv epilogue.
    # out[l, :] = bias + sum_{ty,tx} masked_shift(h, ty, tx)[l, :] @ W_tap
    @pl.when(l == n_layers - 1)
    def _():
        pad = W + 1
        hp_ref[...] = jnp.zeros_like(hp_ref)
        hp_ref[pl.ds(pad, L), :] = h_ref[...].astype(bf16)
        acc = jnp.zeros((L, c_out), f32)
        for ty in range(3):
            for tx in range(3):
                off = (ty - 1) * W + (tx - 1)
                tap = hp_ref[pl.ds(pad + off, L), :]               # (L, d)
                tap = tap * mask_ref[ty * 3 + tx]                  # border mask
                acc = acc + jnp.dot(tap, cw_ref[ty * 3 + tx],
                                    preferred_element_type=f32)
        o_ref[...] = (acc + cb_ref[...]).astype(o_ref.dtype)


def fused_decoder(x_blc, params, *, n_heads, H, W):
    """x_blc: (B, L, c_in) bf16 -> pre-PixelShuffle conv output (B, L, 3*u^2)."""
    B, L, c_in = x_blc.shape
    d = params["und_w"].shape[1]
    n_layers = params["wqkv"].shape[0]
    d_ff = params["w1"].shape[-1]
    c_out = params["conv_w"].shape[-1]
    assert d % n_heads == 0
    tq = _pick_q_tile(L)
    masks = _conv_tap_masks(H, W)                                  # (9, L, 1)

    def cst(*shape):                 # layer/batch-invariant blocks
        n = len(shape)
        return pl.BlockSpec(shape, lambda b, l, _n=n: (0,) * _n)

    def per_layer(*shape):           # leading layer axis indexed by grid axis 1
        return pl.BlockSpec((None,) + shape,
                            lambda b, l, _n=len(shape): (l,) + (0,) * _n)

    return pl.pallas_call(
        functools.partial(_decoder_kernel, n_heads=n_heads, W=W, tq=tq),
        out_shape=jax.ShapeDtypeStruct((B, L, c_out), jnp.float32),
        grid=(B, n_layers),
        in_specs=[
            pl.BlockSpec((None, L, c_in), lambda b, l: (b, 0, 0)),   # x
            cst(c_in, d), cst(1, d),                                 # undownsampler
            per_layer(d, 3 * d), per_layer(1, 3 * d),                # wqkv, bqkv
            per_layer(d, d), per_layer(1, d),                        # wo, bo
            per_layer(d, d_ff), per_layer(1, d_ff),                  # w1, b1
            per_layer(d_ff, d), per_layer(1, d),                     # w2, b2
            per_layer(1, d), per_layer(1, d),                        # gamma, beta
            cst(9, d, c_out), cst(1, c_out),                         # conv w, b
            cst(9, L, 1),                                            # conv tap masks
        ],
        out_specs=pl.BlockSpec((None, L, c_out), lambda b, l: (b, 0, 0)),
        scratch_shapes=[
            pltpu.VMEM((L, d), jnp.float32),                 # carried activation
            pltpu.VMEM((L + 2 * (W + 1), d), jnp.bfloat16),  # zero-padded conv taps
        ],
        compiler_params=pltpu.CompilerParams(
            dimension_semantics=("parallel", "arbitrary"),
            vmem_limit_bytes=VMEM_LIMIT_BYTES),
    )(x_blc, params["und_w"], params["und_b"],
      params["wqkv"], params["bqkv"], params["wo"], params["bo"],
      params["w1"], params["b1"], params["w2"], params["b2"],
      params["gamma"], params["beta"],
      params["conv_w"], params["conv_b"], masks)


# ----------------------------------------------------------------------------
# Glue: parameter init (kernel layout), PixelShuffle, full forward, reference.
# ----------------------------------------------------------------------------
def init_params(key, upscale, n_heads, d_model, n_layers):
    """Parameters already in kernel layout.

    PyTorch -> kernel mapping (for porting real checkpoints):
      * Conv1d(k=1)/Linear weights here are (in, out) = PyTorch weight[:, :, 0].T.
      * wqkv = concat([Wq.T, Wk.T, Wv.T], axis=-1) with head h occupying output
        columns [h*dh, (h+1)*dh) of each d-wide block; bqkv likewise.
      * wo is the attention output projection (H*dh, d) = Wo.T, same head order.
      * conv_w[ky*3+kx] = Conv2d weight[:, :, ky, kx].T  ((d, c_out) per tap).
    """
    c_in = d_model // upscale
    d_ff = d_model << 2
    c_out = 3 * upscale * upscale
    keys = iter(jax.random.split(key, 16))
    nrm = lambda *s: 0.05 * jax.random.normal(next(keys), s, jnp.float32)
    wdt = jnp.bfloat16   # matmul weights bf16 (MXU); biases / affine params f32
    return {
        "und_w": nrm(c_in, d_model).astype(wdt),
        "und_b": nrm(1, d_model),
        "wqkv": nrm(n_layers, d_model, 3 * d_model).astype(wdt),
        "bqkv": nrm(n_layers, 1, 3 * d_model),
        "wo": nrm(n_layers, d_model, d_model).astype(wdt),
        "bo": nrm(n_layers, 1, d_model),
        "w1": nrm(n_layers, d_model, d_ff).astype(wdt),
        "b1": nrm(n_layers, 1, d_ff),
        "w2": nrm(n_layers, d_ff, d_model).astype(wdt),
        "b2": nrm(n_layers, 1, d_model),
        "gamma": jnp.ones((n_layers, 1, d_model), jnp.float32),
        "beta": jnp.zeros((n_layers, 1, d_model), jnp.float32),
        "conv_w": nrm(9, d_model, c_out).astype(wdt),
        "conv_b": nrm(1, c_out),
    }


def _pixel_shuffle(conv_blc, upscale, H, W):
    """(B, H*W, C*r^2) -> (B, C, H*r, W*r), matching nn.PixelShuffle."""
    B, L, c_out = conv_blc.shape
    r = upscale
    c = c_out // (r * r)
    y = conv_blc.reshape(B, H, W, c, r, r)
    y = jnp.transpose(y, (0, 3, 1, 4, 2, 5))
    return y.reshape(B, c, H * r, W * r)


def latent_space_decoder_forward(x_nchw, params, *, upscale, n_heads):
    """x: (B, d_model//upscale, H, W) -> (B, 3, H*upscale, W*upscale)."""
    assert x_nchw.ndim == 4
    B, c_in, H, W = x_nchw.shape
    L = H * W
    # b c h w -> b (h w) c   (channel-last for the fused kernel)
    x = jnp.transpose(x_nchw.reshape(B, c_in, L), (0, 2, 1)).astype(jnp.bfloat16)
    conv = fused_decoder(x, params, n_heads=n_heads, H=H, W=W)   # (B, L, 3*u^2)
    return _pixel_shuffle(conv, upscale, H, W)


def reference_forward(x_nchw, params, *, upscale, n_heads):
    """Plain-JAX mirror (bf16-rounded matmul operands, f32 accumulate)."""
    f32, bf16 = jnp.float32, jnp.bfloat16
    r = lambda a: a.astype(bf16).astype(f32)
    B, c_in, H, W = x_nchw.shape
    L = H * W
    d = params["und_w"].shape[1]
    n_layers = params["wqkv"].shape[0]
    dh = d // n_heads

    x = jnp.transpose(x_nchw.reshape(B, c_in, L), (0, 2, 1))
    h = jnp.einsum('blc,cd->bld', r(x), r(params["und_w"])) + params["und_b"]
    for l in range(n_layers):
        qkv = jnp.einsum('bld,de->ble', r(h), r(params["wqkv"][l])) + params["bqkv"][l]
        q, k, v = qkv[..., :d], qkv[..., d:2 * d], qkv[..., 2 * d:]
        split = lambda t: t.reshape(B, L, n_heads, dh).transpose(0, 2, 1, 3)
        s = jnp.einsum('bhqd,bhkd->bhqk', r(split(q)), r(split(k))) / (dh ** 0.5)
        p = jax.nn.softmax(s, axis=-1)
        ctx = jnp.einsum('bhqk,bhkd->bhqd', r(p), r(split(v)))
        ctx = ctx.transpose(0, 2, 1, 3).reshape(B, L, d)
        attn = jnp.einsum('bld,de->ble', r(ctx), r(params["wo"][l])) + params["bo"][l]
        h1 = jax.nn.relu(jnp.einsum('bld,de->ble', r(attn),
                                    r(params["w1"][l])) + params["b1"][l])
        h2 = jax.nn.relu(jnp.einsum('bld,de->ble', r(h1),
                                    r(params["w2"][l])) + params["b2"][l])
        mu = jnp.mean(h2, axis=-1, keepdims=True)
        var = jnp.mean((h2 - mu) ** 2, axis=-1, keepdims=True)
        h = ((h2 - mu) * jax.lax.rsqrt(var + 1e-5) * params["gamma"][l]
             + params["beta"][l])

    hcl = h.reshape(B, H, W, d)
    hp = jnp.pad(hcl, ((0, 0), (1, 1), (1, 1), (0, 0)))
    conv = jnp.zeros((B, H, W, params["conv_w"].shape[-1]), f32)
    for ky in range(3):
        for kx in range(3):
            conv = conv + jnp.einsum('bhwc,co->bhwo',
                                     r(hp[:, ky:ky + H, kx:kx + W, :]),
                                     r(params["conv_w"][ky * 3 + kx]))
    conv = conv + params["conv_b"]
    return _pixel_shuffle(conv.reshape(B, L, -1), upscale, H, W)


if __name__ == "__main__":
    UPSCALE = 2
    N_HEADS = 4
    D_MODEL = 32
    N_LAYERS = 2
    B, H, W = 2, 8, 8
    C_IN = D_MODEL // UPSCALE

    key = jax.random.PRNGKey(0)
    k_x, k_p = jax.random.split(key)
    x = jax.random.normal(k_x, (B, C_IN, H, W), jnp.float32)   # NCHW, like PyTorch
    params = init_params(k_p, UPSCALE, N_HEADS, D_MODEL, N_LAYERS)

    fwd = jax.jit(functools.partial(latent_space_decoder_forward,
                                    upscale=UPSCALE, n_heads=N_HEADS))
    out = jax.block_until_ready(fwd(x, params))

    assert out.shape == (B, 3, H * UPSCALE, W * UPSCALE), out.shape
    assert bool(jnp.all(jnp.isfinite(out)))

    ref = reference_forward(x, params, upscale=UPSCALE, n_heads=N_HEADS)
    assert bool(jnp.allclose(out, ref, atol=1e-1, rtol=1e-1)), (
        float(jnp.max(jnp.abs(out - ref))))
    print("KERNEL_OK")
</pallas_src>

<mosaic_0001>
module attributes {stable_mosaic.version = 11 : i64} {
  func.func @_decoder_kernel(%arg0: i32, %arg1: i32, %arg2: memref<1x64x16xbf16, #tpu.memory_space<vmem>>, %arg3: memref<16x32xbf16, #tpu.memory_space<vmem>>, %arg4: memref<1x32xf32, #tpu.memory_space<vmem>>, %arg5: memref<1x32x96xbf16, #tpu.memory_space<vmem>>, %arg6: memref<1x1x96xf32, #tpu.memory_space<vmem>>, %arg7: memref<1x32x32xbf16, #tpu.memory_space<vmem>>, %arg8: memref<1x1x32xf32, #tpu.memory_space<vmem>>, %arg9: memref<1x32x128xbf16, #tpu.memory_space<vmem>>, %arg10: memref<1x1x128xf32, #tpu.memory_space<vmem>>, %arg11: memref<1x128x32xbf16, #tpu.memory_space<vmem>>, %arg12: memref<1x1x32xf32, #tpu.memory_space<vmem>>, %arg13: memref<1x1x32xf32, #tpu.memory_space<vmem>>, %arg14: memref<1x1x32xf32, #tpu.memory_space<vmem>>, %arg15: memref<9x32x12xbf16, #tpu.memory_space<vmem>>, %arg16: memref<1x12xf32, #tpu.memory_space<vmem>>, %arg17: memref<9x64x1xbf16, #tpu.memory_space<vmem>>, %arg18: memref<1x64x12xf32, #tpu.memory_space<vmem>>, %arg19: memref<64x32xf32, #tpu.memory_space<vmem>>, %arg20: memref<82x32xbf16, #tpu.memory_space<vmem>>) attributes {dimension_semantics = [#tpu.dimension_semantics<parallel>, #tpu.dimension_semantics<arbitrary>], iteration_bounds = array<i64: 2, 2>, scalar_prefetch = 0 : i64, scratch_operands = 2 : i64, tpu.core_type = #tpu.core_type<tc>, window_params = [{transform_indices = @transform_0, window_bounds = array<i64: 1, 64, 16>}, {pipeline_mode = #tpu.pipeline_mode<synchronous>, transform_indices = @transform_1, window_bounds = array<i64: 16, 32>}, {pipeline_mode = #tpu.pipeline_mode<synchronous>, transform_indices = @transform_2, window_bounds = array<i64: 1, 32>}, {transform_indices = @transform_3, window_bounds = array<i64: 1, 32, 96>}, {transform_indices = @transform_4, window_bounds = array<i64: 1, 1, 96>}, {transform_indices = @transform_5, window_bounds = array<i64: 1, 32, 32>}, {transform_indices = @transform_6, window_bounds = array<i64: 1, 1, 32>}, {transform_indices = @transform_7, window_bounds = array<i64: 1, 32, 128>}, {transform_indices = @transform_8, window_bounds = array<i64: 1, 1, 128>}, {transform_indices = @transform_9, window_bounds = array<i64: 1, 128, 32>}, {transform_indices = @transform_10, window_bounds = array<i64: 1, 1, 32>}, {transform_indices = @transform_11, window_bounds = array<i64: 1, 1, 32>}, {transform_indices = @transform_12, window_bounds = array<i64: 1, 1, 32>}, {pipeline_mode = #tpu.pipeline_mode<synchronous>, transform_indices = @transform_13, window_bounds = array<i64: 9, 32, 12>}, {pipeline_mode = #tpu.pipeline_mode<synchronous>, transform_indices = @transform_14, window_bounds = array<i64: 1, 12>}, {pipeline_mode = #tpu.pipeline_mode<synchronous>, transform_indices = @transform_15, window_bounds = array<i64: 9, 64, 1>}, {transform_indices = @transform_16, window_bounds = array<i64: 1, 64, 12>}]} {
    %c0_i32 = arith.constant 0 : i32
    %0 = arith.cmpi eq, %arg1, %c0_i32 : i32
    %1 = arith.extui %0 : i1 to i32
    %c0_i32_0 = arith.constant 0 : i32
    %2 = arith.cmpi ne, %1, %c0_i32_0 : i32
    scf.if %2 {
      %c0_65 = arith.constant 0 : index
      %c0_66 = arith.constant 0 : index
      %c0_67 = arith.constant 0 : index
      %151 = vector.load %arg2[%c0_65, %c0_66, %c0_67] : memref<1x64x16xbf16, #tpu.memory_space<vmem>>, vector<1x64x16xbf16>
      %152 = vector.shape_cast %151 : vector<1x64x16xbf16> to vector<64x16xbf16>
      %c0_68 = arith.constant 0 : index
      %c0_69 = arith.constant 0 : index
      %153 = vector.load %arg3[%c0_68, %c0_69] : memref<16x32xbf16, #tpu.memory_space<vmem>>, vector<16x32xbf16>
      %cst_70 = arith.constant dense<0.000000e+00> : vector<64x32xf32>
      %154 = tpu.matmul %152, %153, %cst_70 {dimension_numbers = #tpu.dot_dimension_numbers<[1], [0], [0], [1], [0, 0, 1, 1], [], []>} : vector<64x16xbf16>, vector<16x32xbf16>, vector<64x32xf32> -> vector<64x32xf32>
      %c0_71 = arith.constant 0 : index
      %c0_72 = arith.constant 0 : index
      %155 = vector.load %arg4[%c0_71, %c0_72] : memref<1x32xf32, #tpu.memory_space<vmem>>, vector<1x32xf32>
      %156 = vector.broadcast %155 : vector<1x32xf32> to vector<64x32xf32>
      %157 = arith.addf %154, %156 : vector<64x32xf32>
      %c0_73 = arith.constant 0 : index
      %c0_74 = arith.constant 0 : index
      %158 = vector.load %arg19[%c0_73, %c0_74] : memref<64x32xf32, #tpu.memory_space<vmem>>, vector<64x32xf32>
      tpu.vector_store %arg19[%c0_73, %c0_74], %157 {strides = array<i32>} : memref<64x32xf32, #tpu.memory_space<vmem>>, vector<64x32xf32>,
    } else {
    }
    %c0 = arith.constant 0 : index
    %c0_1 = arith.constant 0 : index
    %3 = vector.load %arg19[%c0, %c0_1] : memref<64x32xf32, #tpu.memory_space<vmem>>, vector<64x32xf32>
    %4 = arith.truncf %3 : vector<64x32xf32> to vector<64x32xbf16>
    %c0_2 = arith.constant 0 : index
    %c0_3 = arith.constant 0 : index
    %c0_4 = arith.constant 0 : index
    %5 = vector.load %arg5[%c0_2, %c0_3, %c0_4] : memref<1x32x96xbf16, #tpu.memory_space<vmem>>, vector<1x32x96xbf16>
    %6 = vector.shape_cast %5 : vector<1x32x96xbf16> to vector<32x96xbf16>
    %cst = arith.constant dense<0.000000e+00> : vector<64x96xf32>
    %7 = tpu.matmul %4, %6, %cst {dimension_numbers = #tpu.dot_dimension_numbers<[1], [0], [0], [1], [0, 0, 1, 1], [], []>} : vector<64x32xbf16>, vector<32x96xbf16>, vector<64x96xf32> -> vector<64x96xf32>
    %c0_5 = arith.constant 0 : index
    %c0_6 = arith.constant 0 : index
    %c0_7 = arith.constant 0 : index
    %8 = vector.load %arg6[%c0_5, %c0_6, %c0_7] : memref<1x1x96xf32, #tpu.memory_space<vmem>>, vector<1x1x96xf32>
    %9 = vector.shape_cast %8 : vector<1x1x96xf32> to vector<1x96xf32>
    %10 = vector.broadcast %9 : vector<1x96xf32> to vector<64x96xf32>
    %11 = arith.addf %7, %10 : vector<64x96xf32>
    %12 = vector.extract_strided_slice %11 {offsets = [0, 32], sizes = [64, 32], strides = [1, 1]} : vector<64x96xf32> to vector<64x32xf32>
    %13 = arith.truncf %12 : vector<64x32xf32> to vector<64x32xbf16>
    %14 = vector.extract_strided_slice %11 {offsets = [0, 64], sizes = [64, 32], strides = [1, 1]} : vector<64x96xf32> to vector<64x32xf32>
    %15 = arith.truncf %14 : vector<64x32xf32> to vector<64x32xbf16>
    %16 = vector.extract_strided_slice %11 {offsets = [0, 0], sizes = [64, 32], strides = [1, 1]} : vector<64x96xf32> to vector<64x32xf32>
    %17 = arith.truncf %16 : vector<64x32xf32> to vector<64x32xbf16>
    %18 = vector.extract_strided_slice %17 {offsets = [0, 0], sizes = [64, 8], strides = [1, 1]} : vector<64x32xbf16> to vector<64x8xbf16>
    %19 = vector.extract_strided_slice %13 {offsets = [0, 0], sizes = [64, 8], strides = [1, 1]} : vector<64x32xbf16> to vector<64x8xbf16>
    %cst_8 = arith.constant dense<0.000000e+00> : vector<64x64xf32>
    %20 = tpu.matmul %18, %19, %cst_8 {dimension_numbers = #tpu.dot_dimension_numbers<[1], [1], [0], [0], [0, 0, 1, 0], [], []>} : vector<64x8xbf16>, vector<64x8xbf16>, vector<64x64xf32> -> vector<64x64xf32>
    %cst_9 = arith.constant 0.353553385 : f32
    %21 = vector.broadcast %cst_9 : f32 to vector<64x64xf32>
    %22 = arith.mulf %20, %21 : vector<64x64xf32>
    %cst_10 = arith.constant dense<0xFF800000> : vector<64xf32>
    %23 = vector.multi_reduction <maximumf>, %22, %cst_10 [1] : vector<64x64xf32> to vector<64xf32>
    %24 = vector.shape_cast %23 : vector<64xf32> to vector<64x1xf32>
    %25 = vector.broadcast %24 : vector<64x1xf32> to vector<64x64xf32>
    %26 = arith.subf %22, %25 : vector<64x64xf32>
    %27 = math.exp %26 : vector<64x64xf32>
    %cst_11 = arith.constant dense<0.000000e+00> : vector<64xf32>
    %28 = vector.multi_reduction <add>, %27, %cst_11 [1] : vector<64x64xf32> to vector<64xf32>
    %29 = vector.shape_cast %28 : vector<64xf32> to vector<64x1xf32>
    %30 = tpu.reciprocal %29 {approx = true} : vector<64x1xf32> -> vector<64x1xf32>
    %31 = vector.broadcast %30 : vector<64x1xf32> to vector<64x64xf32>
    %32 = arith.mulf %27, %31 : vector<64x64xf32>
    %33 = arith.truncf %32 : vector<64x64xf32> to vector<64x64xbf16>
    %34 = vector.extract_strided_slice %15 {offsets = [0, 0], sizes = [64, 8], strides = [1, 1]} : vector<64x32xbf16> to vector<64x8xbf16>
    %cst_12 = arith.constant dense<0.000000e+00> : vector<64x8xf32>
    %35 = tpu.matmul %33, %34, %cst_12 {dimension_numbers = #tpu.dot_dimension_numbers<[1], [0], [0], [1], [0, 0, 1, 1], [], []>} : vector<64x64xbf16>, vector<64x8xbf16>, vector<64x8xf32> -> vector<64x8xf32>
    %36 = vector.extract_strided_slice %17 {offsets = [0, 8], sizes = [64, 8], strides = [1, 1]} : vector<64x32xbf16> to vector<64x8xbf16>
    %37 = vector.extract_strided_slice %13 {offsets = [0, 8], sizes = [64, 8], strides = [1, 1]} : vector<64x32xbf16> to vector<64x8xbf16>
    %cst_13 = arith.constant dense<0.000000e+00> : vector<64x64xf32>
    %38 = tpu.matmul %36, %37, %cst_13 {dimension_numbers = #tpu.dot_dimension_numbers<[1], [1], [0], [0], [0, 0, 1, 0], [], []>} : vector<64x8xbf16>, vector<64x8xbf16>, vector<64x64xf32> -> vector<64x64xf32>
    %cst_14 = arith.constant 0.353553385 : f32
    %39 = vector.broadcast %cst_14 : f32 to vector<64x64xf32>
    %40 = arith.mulf %38, %39 : vector<64x64xf32>
    %cst_15 = arith.constant dense<0xFF800000> : vector<64xf32>
    %41 = vector.multi_reduction <maximumf>, %40, %cst_15 [1] : vector<64x64xf32> to vector<64xf32>
    %42 = vector.shape_cast %41 : vector<64xf32> to vector<64x1xf32>
    %43 = vector.broadcast %42 : vector<64x1xf32> to vector<64x64xf32>
    %44 = arith.subf %40, %43 : vector<64x64xf32>
    %45 = math.exp %44 : vector<64x64xf32>
    %cst_16 = arith.constant dense<0.000000e+00> : vector<64xf32>
    %46 = vector.multi_reduction <add>, %45, %cst_16 [1] : vector<64x64xf32> to vector<64xf32>
    %47 = vector.shape_cast %46 : vector<64xf32> to vector<64x1xf32>
    %48 = tpu.reciprocal %47 {approx = true} : vector<64x1xf32> -> vector<64x1xf32>
    %49 = vector.broadcast %48 : vector<64x1xf32> to vector<64x64xf32>
    %50 = arith.mulf %45, %49 : vector<64x64xf32>
    %51 = arith.truncf %50 : vector<64x64xf32> to vector<64x64xbf16>
    %52 = vector.extract_strided_slice %15 {offsets = [0, 8], sizes = [64, 8], strides = [1, 1]} : vector<64x32xbf16> to vector<64x8xbf16>
    %cst_17 = arith.constant dense<0.000000e+00> : vector<64x8xf32>
    %53 = tpu.matmul %51, %52, %cst_17 {dimension_numbers = #tpu.dot_dimension_numbers<[1], [0], [0], [1], [0, 0, 1, 1], [], []>} : vector<64x64xbf16>, vector<64x8xbf16>, vector<64x8xf32> -> vector<64x8xf32>
    %54 = vector.extract_strided_slice %17 {offsets = [0, 16], sizes = [64, 8], strides = [1, 1]} : vector<64x32xbf16> to vector<64x8xbf16>
    %55 = vector.extract_strided_slice %13 {offsets = [0, 16], sizes = [64, 8], strides = [1, 1]} : vector<64x32xbf16> to vector<64x8xbf16>
    %cst_18 = arith.constant dense<0.000000e+00> : vector<64x64xf32>
    %56 = tpu.matmul %54, %55, %cst_18 {dimension_numbers = #tpu.dot_dimension_numbers<[1], [1], [0], [0], [0, 0, 1, 0], [], []>} : vector<64x8xbf16>, vector<64x8xbf16>, vector<64x64xf32> -> vector<64x64xf32>
    %cst_19 = arith.constant 0.353553385 : f32
    %57 = vector.broadcast %cst_19 : f32 to vector<64x64xf32>
    %58 = arith.mulf %56, %57 : vector<64x64xf32>
    %cst_20 = arith.constant dense<0xFF800000> : vector<64xf32>
    %59 = vector.multi_reduction <maximumf>, %58, %cst_20 [1] : vector<64x64xf32> to vector<64xf32>
    %60 = vector.shape_cast %59 : vector<64xf32> to vector<64x1xf32>
    %61 = vector.broadcast %60 : vector<64x1xf32> to vector<64x64xf32>
    %62 = arith.subf %58, %61 : vector<64x64xf32>
    %63 = math.exp %62 : vector<64x64xf32>
    %cst_21 = arith.constant dense<0.000000e+00> : vector<64xf32>
    %64 = vector.multi_reduction <add>, %63, %cst_21 [1] : vector<64x64xf32> to vector<64xf32>
    %65 = vector.shape_cast %64 : vector<64xf32> to vector<64x1xf32>
    %66 = tpu.reciprocal %65 {approx = true} : vector<64x1xf32> -> vector<64x1xf32>
    %67 = vector.broadcast %66 : vector<64x1xf32> to vector<64x64xf32>
    %68 = arith.mulf %63, %67 : vector<64x64xf32>
    %69 = arith.truncf %68 : vector<64x64xf32> to vector<64x64xbf16>
    %70 = vector.extract_strided_slice %15 {offsets = [0, 16], sizes = [64, 8], strides = [1, 1]} : vector<64x32xbf16> to vector<64x8xbf16>
    %cst_22 = arith.constant dense<0.000000e+00> : vector<64x8xf32>
    %71 = tpu.matmul %69, %70, %cst_22 {dimension_numbers = #tpu.dot_dimension_numbers<[1], [0], [0], [1], [0, 0, 1, 1], [], []>} : vector<64x64xbf16>, vector<64x8xbf16>, vector<64x8xf32> -> vector<64x8xf32>
    %72 = vector.extract_strided_slice %17 {offsets = [0, 24], sizes = [64, 8], strides = [1, 1]} : vector<64x32xbf16> to vector<64x8xbf16>
    %73 = vector.extract_strided_slice %13 {offsets = [0, 24], sizes = [64, 8], strides = [1, 1]} : vector<64x32xbf16> to vector<64x8xbf16>
    %cst_23 = arith.constant dense<0.000000e+00> : vector<64x64xf32>
    %74 = tpu.matmul %72, %73, %cst_23 {dimension_numbers = #tpu.dot_dimension_numbers<[1], [1], [0], [0], [0, 0, 1, 0], [], []>} : vector<64x8xbf16>, vector<64x8xbf16>, vector<64x64xf32> -> vector<64x64xf32>
    %cst_24 = arith.constant 0.353553385 : f32
    %75 = vector.broadcast %cst_24 : f32 to vector<64x64xf32>
    %76 = arith.mulf %74, %75 : vector<64x64xf32>
    %cst_25 = arith.constant dense<0xFF800000> : vector<64xf32>
    %77 = vector.multi_reduction <maximumf>, %76, %cst_25 [1] : vector<64x64xf32> to vector<64xf32>
    %78 = vector.shape_cast %77 : vector<64xf32> to vector<64x1xf32>
    %79 = vector.broadcast %78 : vector<64x1xf32> to vector<64x64xf32>
    %80 = arith.subf %76, %79 : vector<64x64xf32>
    %81 = math.exp %80 : vector<64x64xf32>
    %cst_26 = arith.constant dense<0.000000e+00> : vector<64xf32>
    %82 = vector.multi_reduction <add>, %81, %cst_26 [1] : vector<64x64xf32> to vector<64xf32>
    %83 = vector.shape_cast %82 : vector<64xf32> to vector<64x1xf32>
    %84 = tpu.reciprocal %83 {approx = true} : vector<64x1xf32> -> vector<64x1xf32>
    %85 = vector.broadcast %84 : vector<64x1xf32> to vector<64x64xf32>
    %86 = arith.mulf %81, %85 : vector<64x64xf32>
    %87 = arith.truncf %86 : vector<64x64xf32> to vector<64x64xbf16>
    %88 = vector.extract_strided_slice %15 {offsets = [0, 24], sizes = [64, 8], strides = [1, 1]} : vector<64x32xbf16> to vector<64x8xbf16>
    %cst_27 = arith.constant dense<0.000000e+00> : vector<64x8xf32>
    %89 = tpu.matmul %87, %88, %cst_27 {dimension_numbers = #tpu.dot_dimension_numbers<[1], [0], [0], [1], [0, 0, 1, 1], [], []>} : vector<64x64xbf16>, vector<64x8xbf16>, vector<64x8xf32> -> vector<64x8xf32>
    %90 = tpu.concatenate %35, %53, %71, %89 in 1 : vector<64x8xf32>, vector<64x8xf32>, vector<64x8xf32>, vector<64x8xf32> -> vector<64x32xf32>
    %91 = arith.truncf %90 : vector<64x32xf32> to vector<64x32xbf16>
    %c0_28 = arith.constant 0 : index
    %c0_29 = arith.constant 0 : index
    %c0_30 = arith.constant 0 : index
    %92 = vector.load %arg7[%c0_28, %c0_29, %c0_30] : memref<1x32x32xbf16, #tpu.memory_space<vmem>>, vector<1x32x32xbf16>
    %93 = vector.shape_cast %92 : vector<1x32x32xbf16> to vector<32x32xbf16>
    %cst_31 = arith.constant dense<0.000000e+00> : vector<64x32xf32>
    %94 = tpu.matmul %91, %93, %cst_31 {dimension_numbers = #tpu.dot_dimension_numbers<[1], [0], [0], [1], [0, 0, 1, 1], [], []>} : vector<64x32xbf16>, vector<32x32xbf16>, vector<64x32xf32> -> vector<64x32xf32>
    %c0_32 = arith.constant 0 : index
    %c0_33 = arith.constant 0 : index
    %c0_34 = arith.constant 0 : index
    %95 = vector.load %arg8[%c0_32, %c0_33, %c0_34] : memref<1x1x32xf32, #tpu.memory_space<vmem>>, vector<1x1x32xf32>
    %96 = vector.shape_cast %95 : vector<1x1x32xf32> to vector<1x32xf32>
    %97 = vector.broadcast %96 : vector<1x32xf32> to vector<64x32xf32>
    %98 = arith.addf %94, %97 : vector<64x32xf32>
    %99 = arith.truncf %98 : vector<64x32xf32> to vector<64x32xbf16>
    %c0_35 = arith.constant 0 : index
    %c0_36 = arith.constant 0 : index
    %c0_37 = arith.constant 0 : index
    %100 = vector.load %arg9[%c0_35, %c0_36, %c0_37] : memref<1x32x128xbf16, #tpu.memory_space<vmem>>, vector<1x32x128xbf16>
    %101 = vector.shape_cast %100 : vector<1x32x128xbf16> to vector<32x128xbf16>
    %cst_38 = arith.constant dense<0.000000e+00> : vector<64x128xf32>
    %102 = tpu.matmul %99, %101, %cst_38 {dimension_numbers = #tpu.dot_dimension_numbers<[1], [0], [0], [1], [0, 0, 1, 1], [], []>} : vector<64x32xbf16>, vector<32x128xbf16>, vector<64x128xf32> -> vector<64x128xf32>
    %c0_39 = arith.constant 0 : index
    %c0_40 = arith.constant 0 : index
    %c0_41 = arith.constant 0 : index
    %103 = vector.load %arg10[%c0_39, %c0_40, %c0_41] : memref<1x1x128xf32, #tpu.memory_space<vmem>>, vector<1x1x128xf32>
    %104 = vector.shape_cast %103 : vector<1x1x128xf32> to vector<1x128xf32>
    %105 = vector.broadcast %104 : vector<1x128xf32> to vector<64x128xf32>
    %106 = arith.addf %102, %105 : vector<64x128xf32>
    %cst_42 = arith.constant 0.000000e+00 : f32
    %107 = vector.broadcast %cst_42 : f32 to vector<64x128xf32>
    %108 = arith.maximumf %106, %107 : vector<64x128xf32>
    %109 = arith.truncf %108 : vector<64x128xf32> to vector<64x128xbf16>
    %c0_43 = arith.constant 0 : index
    %c0_44 = arith.constant 0 : index
    %c0_45 = arith.constant 0 : index
    %110 = vector.load %arg11[%c0_43, %c0_44, %c0_45] : memref<1x128x32xbf16, #tpu.memory_space<vmem>>, vector<1x128x32xbf16>
    %111 = vector.shape_cast %110 : vector<1x128x32xbf16> to vector<128x32xbf16>
    %cst_46 = arith.constant dense<0.000000e+00> : vector<64x32xf32>
    %112 = tpu.matmul %109, %111, %cst_46 {dimension_numbers = #tpu.dot_dimension_numbers<[1], [0], [0], [1], [0, 0, 1, 1], [], []>} : vector<64x128xbf16>, vector<128x32xbf16>, vector<64x32xf32> -> vector<64x32xf32>
    %c0_47 = arith.constant 0 : index
    %c0_48 = arith.constant 0 : index
    %c0_49 = arith.constant 0 : index
    %113 = vector.load %arg12[%c0_47, %c0_48, %c0_49] : memref<1x1x32xf32, #tpu.memory_space<vmem>>, vector<1x1x32xf32>
    %114 = vector.shape_cast %113 : vector<1x1x32xf32> to vector<1x32xf32>
    %115 = vector.broadcast %114 : vector<1x32xf32> to vector<64x32xf32>
    %116 = arith.addf %112, %115 : vector<64x32xf32>
    %cst_50 = arith.constant 0.000000e+00 : f32
    %117 = vector.broadcast %cst_50 : f32 to vector<64x32xf32>
    %118 = arith.maximumf %116, %117 : vector<64x32xf32>
    %cst_51 = arith.constant dense<0.000000e+00> : vector<64xf32>
    %119 = vector.multi_reduction <add>, %118, %cst_51 [1] : vector<64x32xf32> to vector<64xf32>
    %120 = vector.shape_cast %119 : vector<64xf32> to vector<64x1xf32>
    %cst_52 = arith.constant 3.200000e+01 : f32
    %121 = vector.broadcast %cst_52 : f32 to vector<64x1xf32>
    %122 = arith.divf %120, %121 : vector<64x1xf32>
    %123 = vector.broadcast %122 : vector<64x1xf32> to vector<64x32xf32>
    %124 = arith.subf %118, %123 : vector<64x32xf32>
    %125 = vector.broadcast %122 : vector<64x1xf32> to vector<64x32xf32>
    %126 = arith.subf %118, %125 : vector<64x32xf32>
    %127 = arith.mulf %124, %126 : vector<64x32xf32>
    %cst_53 = arith.constant dense<0.000000e+00> : vector<64xf32>
    %128 = vector.multi_reduction <add>, %127, %cst_53 [1] : vector<64x32xf32> to vector<64xf32>
    %129 = vector.shape_cast %128 : vector<64xf32> to vector<64x1xf32>
    %cst_54 = arith.constant 3.200000e+01 : f32
    %130 = vector.broadcast %cst_54 : f32 to vector<64x1xf32>
    %131 = arith.divf %129, %130 : vector<64x1xf32>
    %132 = vector.broadcast %122 : vector<64x1xf32> to vector<64x32xf32>
    %133 = arith.subf %118, %132 : vector<64x32xf32>
    %cst_55 = arith.constant 9.99999974E-6 : f32
    %134 = vector.broadcast %cst_55 : f32 to vector<64x1xf32>
    %135 = arith.addf %131, %134 : vector<64x1xf32>
    %136 = math.rsqrt %135 : vector<64x1xf32>
    %137 = vector.broadcast %136 : vector<64x1xf32> to vector<64x32xf32>
    %138 = arith.mulf %133, %137 : vector<64x32xf32>
    %c0_56 = arith.constant 0 : index
    %c0_57 = arith.constant 0 : index
    %c0_58 = arith.constant 0 : index
    %139 = vector.load %arg13[%c0_56, %c0_57, %c0_58] : memref<1x1x32xf32, #tpu.memory_space<vmem>>, vector<1x1x32xf32>
    %140 = vector.shape_cast %139 : vector<1x1x32xf32> to vector<1x32xf32>
    %141 = vector.broadcast %140 : vector<1x32xf32> to vector<64x32xf32>
    %142 = arith.mulf %138, %141 : vector<64x32xf32>
    %c0_59 = arith.constant 0 : index
    %c0_60 = arith.constant 0 : index
    %c0_61 = arith.constant 0 : index
    %143 = vector.load %arg14[%c0_59, %c0_60, %c0_61] : memref<1x1x32xf32, #tpu.memory_space<vmem>>, vector<1x1x32xf32>
    %144 = vector.shape_cast %143 : vector<1x1x32xf32> to vector<1x32xf32>
    %145 = vector.broadcast %144 : vector<1x32xf32> to vector<64x32xf32>
    %146 = arith.addf %142, %145 : vector<64x32xf32>
    %c0_62 = arith.constant 0 : index
    %c0_63 = arith.constant 0 : index
    %147 = vector.load %arg19[%c0_62, %c0_63] : memref<64x32xf32, #tpu.memory_space<vmem>>, vector<64x32xf32>
    tpu.vector_store %arg19[%c0_62, %c0_63], %146 {strides = array<i32>} : memref<64x32xf32, #tpu.memory_space<vmem>>, vector<64x32xf32>,
    %c1_i32 = arith.constant 1 : i32
    %148 = arith.cmpi eq, %arg1, %c1_i32 : i32
    %149 = arith.extui %148 : i1 to i32
    %c0_i32_64 = arith.constant 0 : i32
    %150 = arith.cmpi ne, %149, %c0_i32_64 : i32
    scf.if %150 {
      %cst_65 = arith.constant 0.000000e+00 : bf16
      %151 = vector.broadcast %cst_65 : bf16 to vector<82x32xbf16>
      %c0_66 = arith.constant 0 : index
      %c0_67 = arith.constant 0 : index
      %152 = vector.load %arg20[%c0_66, %c0_67] : memref<82x32xbf16, #tpu.memory_space<vmem>>, vector<82x32xbf16>
      tpu.vector_store %arg20[%c0_66, %c0_67], %151 {strides = array<i32>} : memref<82x32xbf16, #tpu.memory_space<vmem>>, vector<82x32xbf16>,
      %c0_68 = arith.constant 0 : index
      %c0_69 = arith.constant 0 : index
      %153 = vector.load %arg19[%c0_68, %c0_69] : memref<64x32xf32, #tpu.memory_space<vmem>>, vector<64x32xf32>
      %154 = arith.truncf %153 : vector<64x32xf32> to vector<64x32xbf16>
      %c9 = arith.constant 9 : index
      %c0_70 = arith.constant 0 : index
      %155 = vector.load %arg20[%c9, %c0_70] : memref<82x32xbf16, #tpu.memory_space<vmem>>, vector<64x32xbf16>
      tpu.vector_store %arg20[%c9, %c0_70], %154 {strides = array<i32>} : memref<82x32xbf16, #tpu.memory_space<vmem>>, vector<64x32xbf16>,
      %cst_71 = arith.constant 0.000000e+00 : f32
      %156 = vector.broadcast %cst_71 : f32 to vector<64x12xf32>
      %c0_72 = arith.constant 0 : index
      %c0_73 = arith.constant 0 : index
      %157 = vector.load %arg20[%c0_72, %c0_73] : memref<82x32xbf16, #tpu.memory_space<vmem>>, vector<64x32xbf16>
      %c0_74 = arith.constant 0 : index
      %c0_75 = arith.constant 0 : index
      %c0_76 = arith.constant 0 : index
      %158 = vector.load %arg17[%c0_74, %c0_75, %c0_76] : memref<9x64x1xbf16, #tpu.memory_space<vmem>>, vector<1x64x1xbf16>
      %159 = vector.shape_cast %158 : vector<1x64x1xbf16> to vector<64x1xbf16>
      %160 = vector.broadcast %159 : vector<64x1xbf16> to vector<64x32xbf16>
      %161 = arith.mulf %157, %160 : vector<64x32xbf16>
      %c0_77 = arith.constant 0 : index
      %c0_78 = arith.constant 0 : index
      %c0_79 = arith.constant 0 : index
      %162 = vector.load %arg15[%c0_77, %c0_78, %c0_79] : memref<9x32x12xbf16, #tpu.memory_space<vmem>>, vector<1x32x12xbf16>
      %163 = vector.shape_cast %162 : vector<1x32x12xbf16> to vector<32x12xbf16>
      %cst_80 = arith.constant dense<0.000000e+00> : vector<64x12xf32>
      %164 = tpu.matmul %161, %163, %cst_80 {dimension_numbers = #tpu.dot_dimension_numbers<[1], [0], [0], [1], [0, 0, 1, 1], [], []>} : vector<64x32xbf16>, vector<32x12xbf16>, vector<64x12xf32> -> vector<64x12xf32>
      %165 = arith.addf %156, %164 : vector<64x12xf32>
      %c1 = arith.constant 1 : index
      %c0_81 = arith.constant 0 : index
      %166 = vector.load %arg20[%c1, %c0_81] : memref<82x32xbf16, #tpu.memory_space<vmem>>, vector<64x32xbf16>
      %c1_82 = arith.constant 1 : index
      %c0_83 = arith.constant 0 : index
      %c0_84 = arith.constant 0 : index
      %167 = vector.load %arg17[%c1_82, %c0_83, %c0_84] : memref<9x64x1xbf16, #tpu.memory_space<vmem>>, vector<1x64x1xbf16>
      %168 = vector.shape_cast %167 : vector<1x64x1xbf16> to vector<64x1xbf16>
      %169 = vector.broadcast %168 : vector<64x1xbf16> to vector<64x32xbf16>
      %170 = arith.mulf %166, %169 : vector<64x32xbf16>
      %c1_85 = arith.constant 1 : index
      %c0_86 = arith.constant 0 : index
      %c0_87 = arith.constant 0 : index
      %171 = vector.load %arg15[%c1_85, %c0_86, %c0_87] : memref<9x32x12xbf16, #tpu.memory_space<vmem>>, vector<1x32x12xbf16>
      %172 = vector.shape_cast %171 : vector<1x32x12xbf16> to vector<32x12xbf16>
      %cst_88 = arith.constant dense<0.000000e+00> : vector<64x12xf32>
      %173 = tpu.matmul %170, %172, %cst_88 {dimension_numbers = #tpu.dot_dimension_numbers<[1], [0], [0], [1], [0, 0, 1, 1], [], []>} : vector<64x32xbf16>, vector<32x12xbf16>, vector<64x12xf32> -> vector<64x12xf32>
      %174 = arith.addf %165, %173 : vector<64x12xf32>
      %c2 = arith.constant 2 : index
      %c0_89 = arith.constant 0 : index
      %175 = vector.load %arg20[%c2, %c0_89] : memref<82x32xbf16, #tpu.memory_space<vmem>>, vector<64x32xbf16>
      %c2_90 = arith.constant 2 : index
      %c0_91 = arith.constant 0 : index
      %c0_92 = arith.constant 0 : index
      %176 = vector.load %arg17[%c2_90, %c0_91, %c0_92] : memref<9x64x1xbf16, #tpu.memory_space<vmem>>, vector<1x64x1xbf16>
      %177 = vector.shape_cast %176 : vector<1x64x1xbf16> to vector<64x1xbf16>
      %178 = vector.broadcast %177 : vector<64x1xbf16> to vector<64x32xbf16>
      %179 = arith.mulf %175, %178 : vector<64x32xbf16>
      %c2_93 = arith.constant 2 : index
      %c0_94 = arith.constant 0 : index
      %c0_95 = arith.constant 0 : index
      %180 = vector.load %arg15[%c2_93, %c0_94, %c0_95] : memref<9x32x12xbf16, #tpu.memory_space<vmem>>, vector<1x32x12xbf16>
      %181 = vector.shape_cast %180 : vector<1x32x12xbf16> to vector<32x12xbf16>
      %cst_96 = arith.constant dense<0.000000e+00> : vector<64x12xf32>
      %182 = tpu.matmul %179, %181, %cst_96 {dimension_numbers = #tpu.dot_dimension_numbers<[1], [0], [0], [1], [0, 0, 1, 1], [], []>} : vector<64x32xbf16>, vector<32x12xbf16>, vector<64x12xf32> -> vector<64x12xf32>
      %183 = arith.addf %174, %182 : vector<64x12xf32>
      %c8 = arith.constant 8 : index
      %c0_97 = arith.constant 0 : index
      %184 = vector.load %arg20[%c8, %c0_97] : memref<82x32xbf16, #tpu.memory_space<vmem>>, vector<64x32xbf16>
      %c3 = arith.constant 3 : index
      %c0_98 = arith.constant 0 : index
      %c0_99 = arith.constant 0 : index
      %185 = vector.load %arg17[%c3, %c0_98, %c0_99] : memref<9x64x1xbf16, #tpu.memory_space<vmem>>, vector<1x64x1xbf16>
      %186 = vector.shape_cast %185 : vector<1x64x1xbf16> to vector<64x1xbf16>
      %187 = vector.broadcast %186 : vector<64x1xbf16> to vector<64x32xbf16>
      %188 = arith.mulf %184, %187 : vector<64x32xbf16>
      %c3_100 = arith.constant 3 : index
      %c0_101 = arith.constant 0 : index
      %c0_102 = arith.constant 0 : index
      %189 = vector.load %arg15[%c3_100, %c0_101, %c0_102] : memref<9x32x12xbf16, #tpu.memory_space<vmem>>, vector<1x32x12xbf16>
      %190 = vector.shape_cast %189 : vector<1x32x12xbf16> to vector<32x12xbf16>
      %cst_103 = arith.constant dense<0.000000e+00> : vector<64x12xf32>
      %191 = tpu.matmul %188, %190, %cst_103 {dimension_numbers = #tpu.dot_dimension_numbers<[1], [0], [0], [1], [0, 0, 1, 1], [], []>} : vector<64x32xbf16>, vector<32x12xbf16>, vector<64x12xf32> -> vector<64x12xf32>
      %192 = arith.addf %183, %191 : vector<64x12xf32>
      %c9_104 = arith.constant 9 : index
      %c0_105 = arith.constant 0 : index
      %193 = vector.load %arg20[%c9_104, %c0_105] : memref<82x32xbf16, #tpu.memory_space<vmem>>, vector<64x32xbf16>
      %c4 = arith.constant 4 : index
      %c0_106 = arith.constant 0 : index
      %c0_107 = arith.constant 0 : index
      %194 = vector.load %arg17[%c4, %c0_106, %c0_107] : memref<9x64x1xbf16, #tpu.memory_space<vmem>>, vector<1x64x1xbf16>
      %195 = vector.shape_cast %194 : vector<1x64x1xbf16> to vector<64x1xbf16>
      %196 = vector.broadcast %195 : vector<64x1xbf16> to vector<64x32xbf16>
      %197 = arith.mulf %193, %196 : vector<64x32xbf16>
      %c4_108 = arith.constant 4 : index
      %c0_109 = arith.constant 0 : index
      %c0_110 = arith.constant 0 : index
      %198 = vector.load %arg15[%c4_108, %c0_109, %c0_110] : memref<9x32x12xbf16, #tpu.memory_space<vmem>>, vector<1x32x12xbf16>
      %199 = vector.shape_cast %198 : vector<1x32x12xbf16> to vector<32x12xbf16>
      %cst_111 = arith.constant dense<0.000000e+00> : vector<64x12xf32>
      %200 = tpu.matmul %197, %199, %cst_111 {dimension_numbers = #tpu.dot_dimension_numbers<[1], [0], [0], [1], [0, 0, 1, 1], [], []>} : vector<64x32xbf16>, vector<32x12xbf16>, vector<64x12xf32> -> vector<64x12xf32>
      %201 = arith.addf %192, %200 : vector<64x12xf32>
      %c10 = arith.constant 10 : index
      %c0_112 = arith.constant 0 : index
      %202 = vector.load %arg20[%c10, %c0_112] : memref<82x32xbf16, #tpu.memory_space<vmem>>, vector<64x32xbf16>
      %c5 = arith.constant 5 : index
      %c0_113 = arith.constant 0 : index
      %c0_114 = arith.constant 0 : index
      %203 = vector.load %arg17[%c5, %c0_113, %c0_114] : memref<9x64x1xbf16, #tpu.memory_space<vmem>>, vector<1x64x1xbf16>
      %204 = vector.shape_cast %203 : vector<1x64x1xbf16> to vector<64x1xbf16>
      %205 = vector.broadcast %204 : vector<64x1xbf16> to vector<64x32xbf16>
      %206 = arith.mulf %202, %205 : vector<64x32xbf16>
      %c5_115 = arith.constant 5 : index
      %c0_116 = arith.constant 0 : index
      %c0_117 = arith.constant 0 : index
      %207 = vector.load %arg15[%c5_115, %c0_116, %c0_117] : memref<9x32x12xbf16, #tpu.memory_space<vmem>>, vector<1x32x12xbf16>
      %208 = vector.shape_cast %207 : vector<1x32x12xbf16> to vector<32x12xbf16>
      %cst_118 = arith.constant dense<0.000000e+00> : vector<64x12xf32>
      %209 = tpu.matmul %206, %208, %cst_118 {dimension_numbers = #tpu.dot_dimension_numbers<[1], [0], [0], [1], [0, 0, 1, 1], [], []>} : vector<64x32xbf16>, vector<32x12xbf16>, vector<64x12xf32> -> vector<64x12xf32>
      %210 = arith.addf %201, %209 : vector<64x12xf32>
      %c16 = arith.constant 16 : index
      %c0_119 = arith.constant 0 : index
      %211 = vector.load %arg20[%c16, %c0_119] : memref<82x32xbf16, #tpu.memory_space<vmem>>, vector<64x32xbf16>
      %c6 = arith.constant 6 : index
      %c0_120 = arith.constant 0 : index
      %c0_121 = arith.constant 0 : index
      %212 = vector.load %arg17[%c6, %c0_120, %c0_121] : memref<9x64x1xbf16, #tpu.memory_space<vmem>>, vector<1x64x1xbf16>
      %213 = vector.shape_cast %212 : vector<1x64x1xbf16> to vector<64x1xbf16>
      %214 = vector.broadcast %213 : vector<64x1xbf16> to vector<64x32xbf16>
      %215 = arith.mulf %211, %214 : vector<64x32xbf16>
      %c6_122 = arith.constant 6 : index
      %c0_123 = arith.constant 0 : index
      %c0_124 = arith.constant 0 : index
      %216 = vector.load %arg15[%c6_122, %c0_123, %c0_124] : memref<9x32x12xbf16, #tpu.memory_space<vmem>>, vector<1x32x12xbf16>
      %217 = vector.shape_cast %216 : vector<1x32x12xbf16> to vector<32x12xbf16>
      %cst_125 = arith.constant dense<0.000000e+00> : vector<64x12xf32>
      %218 = tpu.matmul %215, %217, %cst_125 {dimension_numbers = #tpu.dot_dimension_numbers<[1], [0], [0], [1], [0, 0, 1, 1], [], []>} : vector<64x32xbf16>, vector<32x12xbf16>, vector<64x12xf32> -> vector<64x12xf32>
      %219 = arith.addf %210, %218 : vector<64x12xf32>
      %c17 = arith.constant 17 : index
      %c0_126 = arith.constant 0 : index
      %220 = vector.load %arg20[%c17, %c0_126] : memref<82x32xbf16, #tpu.memory_space<vmem>>, vector<64x32xbf16>
      %c7 = arith.constant 7 : index
      %c0_127 = arith.constant 0 : index
      %c0_128 = arith.constant 0 : index
      %221 = vector.load %arg17[%c7, %c0_127, %c0_128] : memref<9x64x1xbf16, #tpu.memory_space<vmem>>, vector<1x64x1xbf16>
      %222 = vector.shape_cast %221 : vector<1x64x1xbf16> to vector<64x1xbf16>
      %223 = vector.broadcast %222 : vector<64x1xbf16> to vector<64x32xbf16>
      %224 = arith.mulf %220, %223 : vector<64x32xbf16>
      %c7_129 = arith.constant 7 : index
      %c0_130 = arith.constant 0 : index
      %c0_131 = arith.constant 0 : index
      %225 = vector.load %arg15[%c7_129, %c0_130, %c0_131] : memref<9x32x12xbf16, #tpu.memory_space<vmem>>, vector<1x32x12xbf16>
      %226 = vector.shape_cast %225 : vector<1x32x12xbf16> to vector<32x12xbf16>
      %cst_132 = arith.constant dense<0.000000e+00> : vector<64x12xf32>
      %227 = tpu.matmul %224, %226, %cst_132 {dimension_numbers = #tpu.dot_dimension_numbers<[1], [0], [0], [1], [0, 0, 1, 1], [], []>} : vector<64x32xbf16>, vector<32x12xbf16>, vector<64x12xf32> -> vector<64x12xf32>
      %228 = arith.addf %219, %227 : vector<64x12xf32>
      %c18 = arith.constant 18 : index
      %c0_133 = arith.constant 0 : index
      %229 = vector.load %arg20[%c18, %c0_133] : memref<82x32xbf16, #tpu.memory_space<vmem>>, vector<64x32xbf16>
      %c8_134 = arith.constant 8 : index
      %c0_135 = arith.constant 0 : index
      %c0_136 = arith.constant 0 : index
      %230 = vector.load %arg17[%c8_134, %c0_135, %c0_136] : memref<9x64x1xbf16, #tpu.memory_space<vmem>>, vector<1x64x1xbf16>
      %231 = vector.shape_cast %230 : vector<1x64x1xbf16> to vector<64x1xbf16>
      %232 = vector.broadcast %231 : vector<64x1xbf16> to vector<64x32xbf16>
      %233 = arith.mulf %229, %232 : vector<64x32xbf16>
      %c8_137 = arith.constant 8 : index
      %c0_138 = arith.constant 0 : index
      %c0_139 = arith.constant 0 : index
      %234 = vector.load %arg15[%c8_137, %c0_138, %c0_139] : memref<9x32x12xbf16, #tpu.memory_space<vmem>>, vector<1x32x12xbf16>
      %235 = vector.shape_cast %234 : vector<1x32x12xbf16> to vector<32x12xbf16>
      %cst_140 = arith.constant dense<0.000000e+00> : vector<64x12xf32>
      %236 = tpu.matmul %233, %235, %cst_140 {dimension_numbers = #tpu.dot_dimension_numbers<[1], [0], [0], [1], [0, 0, 1, 1], [], []>} : vector<64x32xbf16>, vector<32x12xbf16>, vector<64x12xf32> -> vector<64x12xf32>
      %237 = arith.addf %228, %236 : vector<64x12xf32>
      %c0_141 = arith.constant 0 : index
      %c0_142 = arith.constant 0 : index
      %238 = vector.load %arg16[%c0_141, %c0_142] : memref<1x12xf32, #tpu.memory_space<vmem>>, vector<1x12xf32>
      %239 = vector.broadcast %238 : vector<1x12xf32> to vector<64x12xf32>
      %240 = arith.addf %237, %239 : vector<64x12xf32>
      %c0_143 = arith.constant 0 : index
      %c0_144 = arith.constant 0 : index
      %c0_145 = arith.constant 0 : index
      %241 = vector.load %arg18[%c0_143, %c0_144, %c0_145] : memref<1x64x12xf32, #tpu.memory_space<vmem>>, vector<1x64x12xf32>
      %242 = vector.shape_cast %241 : vector<1x64x12xf32> to vector<64x12xf32>
      %243 = vector.shape_cast %240 : vector<64x12xf32> to vector<1x64x12xf32>
      tpu.vector_store %arg18[%c0_143, %c0_144, %c0_145], %243 {strides = array<i32>} : memref<1x64x12xf32, #tpu.memory_space<vmem>>, vector<1x64x12xf32>,
    } else {
    }
    return
  }
  func.func @transform_0(%arg0: i32, %arg1: i32) -> (i32, i32, i32) {
    %c0_i32 = arith.constant 0 : i32
    %c0_i32_0 = arith.constant 0 : i32
    %c0_i32_1 = arith.constant 0 : i32
    return %arg0, %c0_i32, %c0_i32_0 : i32, i32, i32
  }
  func.func @transform_1(%arg0: i32, %arg1: i32) -> (i32, i32) {
    %c0_i32 = arith.constant 0 : i32
    %c0_i32_0 = arith.constant 0 : i32
    %c0_i32_1 = arith.constant 0 : i32
    return %c0_i32, %c0_i32_0 : i32, i32
  }
  func.func @transform_2(%arg0: i32, %arg1: i32) -> (i32, i32) {
    %c0_i32 = arith.constant 0 : i32
    %c0_i32_0 = arith.constant 0 : i32
    %c0_i32_1 = arith.constant 0 : i32
    return %c0_i32, %c0_i32_0 : i32, i32
  }
  func.func @transform_3(%arg0: i32, %arg1: i32) -> (i32, i32, i32) {
    %c0_i32 = arith.constant 0 : i32
    %c0_i32_0 = arith.constant 0 : i32
    %c0_i32_1 = arith.constant 0 : i32
    return %arg1, %c0_i32, %c0_i32_0 : i32, i32, i32
  }
  func.func @transform_4(%arg0: i32, %arg1: i32) -> (i32, i32, i32) {
    %c0_i32 = arith.constant 0 : i32
    %c0_i32_0 = arith.constant 0 : i32
    %c0_i32_1 = arith.constant 0 : i32
    return %arg1, %c0_i32, %c0_i32_0 : i32, i32, i32
  }
  func.func @transform_5(%arg0: i32, %arg1: i32) -> (i32, i32, i32) {
    %c0_i32 = arith.constant 0 : i32
    %c0_i32_0 = arith.constant 0 : i32
    %c0_i32_1 = arith.constant 0 : i32
    return %arg1, %c0_i32, %c0_i32_0 : i32, i32, i32
  }
  func.func @transform_6(%arg0: i32, %arg1: i32) -> (i32, i32, i32) {
    %c0_i32 = arith.constant 0 : i32
    %c0_i32_0 = arith.constant 0 : i32
    %c0_i32_1 = arith.constant 0 : i32
    return %arg1, %c0_i32, %c0_i32_0 : i32, i32, i32
  }
  func.func @transform_7(%arg0: i32, %arg1: i32) -> (i32, i32, i32) {
    %c0_i32 = arith.constant 0 : i32
    %c0_i32_0 = arith.constant 0 : i32
    %c0_i32_1 = arith.constant 0 : i32
    return %arg1, %c0_i32, %c0_i32_0 : i32, i32, i32
  }
  func.func @transform_8(%arg0: i32, %arg1: i32) -> (i32, i32, i32) {
    %c0_i32 = arith.constant 0 : i32
    %c0_i32_0 = arith.constant 0 : i32
    %c0_i32_1 = arith.constant 0 : i32
    return %arg1, %c0_i32, %c0_i32_0 : i32, i32, i32
  }
  func.func @transform_9(%arg0: i32, %arg1: i32) -> (i32, i32, i32) {
    %c0_i32 = arith.constant 0 : i32
    %c0_i32_0 = arith.constant 0 : i32
    %c0_i32_1 = arith.constant 0 : i32
    return %arg1, %c0_i32, %c0_i32_0 : i32, i32, i32
  }
  func.func @transform_10(%arg0: i32, %arg1: i32) -> (i32, i32, i32) {
    %c0_i32 = arith.constant 0 : i32
    %c0_i32_0 = arith.constant 0 : i32
    %c0_i32_1 = arith.constant 0 : i32
    return %arg1, %c0_i32, %c0_i32_0 : i32, i32, i32
  }
  func.func @transform_11(%arg0: i32, %arg1: i32) -> (i32, i32, i32) {
    %c0_i32 = arith.constant 0 : i32
    %c0_i32_0 = arith.constant 0 : i32
    %c0_i32_1 = arith.constant 0 : i32
    return %arg1, %c0_i32, %c0_i32_0 : i32, i32, i32
  }
  func.func @transform_12(%arg0: i32, %arg1: i32) -> (i32, i32, i32) {
    %c0_i32 = arith.constant 0 : i32
    %c0_i32_0 = arith.constant 0 : i32
    %c0_i32_1 = arith.constant 0 : i32
    return %arg1, %c0_i32, %c0_i32_0 : i32, i32, i32
  }
  func.func @transform_13(%arg0: i32, %arg1: i32) -> (i32, i32, i32) {
    %c0_i32 = arith.constant 0 : i32
    %c0_i32_0 = arith.constant 0 : i32
    %c0_i32_1 = arith.constant 0 : i32
    %c0_i32_2 = arith.constant 0 : i32
    return %c0_i32, %c0_i32_0, %c0_i32_1 : i32, i32, i32
  }
  func.func @transform_14(%arg0: i32, %arg1: i32) -> (i32, i32) {
    %c0_i32 = arith.constant 0 : i32
    %c0_i32_0 = arith.constant 0 : i32
    %c0_i32_1 = arith.constant 0 : i32
    return %c0_i32, %c0_i32_0 : i32, i32
  }
  func.func @transform_15(%arg0: i32, %arg1: i32) -> (i32, i32, i32) {
    %c0_i32 = arith.constant 0 : i32
    %c0_i32_0 = arith.constant 0 : i32
    %c0_i32_1 = arith.constant 0 : i32
    %c0_i32_2 = arith.constant 0 : i32
    return %c0_i32, %c0_i32_0, %c0_i32_1 : i32, i32, i32
  }
  func.func @transform_16(%arg0: i32, %arg1: i32) -> (i32, i32, i32) {
    %c0_i32 = arith.constant 0 : i32
    %c0_i32_0 = arith.constant 0 : i32
    %c0_i32_1 = arith.constant 0 : i32
    return %arg0, %c0_i32, %c0_i32_0 : i32, i32, i32
  }
}

</mosaic_0001>

<bundles_post_ra>
// kernel: latent_space_decoder_forward.1
= control target key start
LH: loop header
LB: loop body
LE: loop exit
PB: predicated region body
PF: predicated region fallthrough
CT: control target
= control target key end

     0   :  { %s6987_s21 = smov 0   ;;  %s6989_s22 = smov 0   ;;  %s8568_s0 = inlined_call_operand.vmem [shape: bf16[2,64,16], index: 0, kind: input, shape index: {}]   ;;  %s8569_s1 = inlined_call_operand.vmem [shape: bf16[16,32], index: 1, kind: input, shape index: {}]   ;;  %s8570_s2 = inlined_call_operand.vmem [shape: f32[1,32], index: 2, kind: input, shape index: {}]   ;;  %s8571_s3 = inlined_call_operand.vmem [shape: bf16[2,32,96], index: 3, kind: input, shape index: {}]   ;;  %s8572_s4 = inlined_call_operand.vmem [shape: f32[2,1,96], index: 4, kind: input, shape index: {}]   ;;  %s8573_s5 = inlined_call_operand.vmem [shape: bf16[2,32,32], index: 5, kind: input, shape index: {}]   ;;  %s8574_s6 = inlined_call_operand.vmem [shape: f32[2,1,32], index: 6, kind: input, shape index: {}]   ;;  %s8575_s7 = inlined_call_operand.vmem [shape: bf16[2,32,128], index: 7, kind: input, shape index: {}]   ;;  %s8576_s8 = inlined_call_operand.vmem [shape: f32[2,1,128], index: 8, kind: input, shape index: {}]   ;;  %s8577_s9 = inlined_call_operand.vmem [shape: bf16[2,128,32], index: 9, kind: input, shape index: {}]   ;;  %s8578_s10 = inlined_call_operand.vmem [shape: f32[2,1,32], index: 10, kind: input, shape index: {}]   ;;  %s8579_s11 = inlined_call_operand.vmem [shape: f32[2,1,32], index: 11, kind: input, shape index: {}]   ;;  %s8580_s12 = inlined_call_operand.vmem [shape: f32[2,1,32], index: 12, kind: input, shape index: {}]   ;;  %s8581_s13 = inlined_call_operand.vmem [shape: bf16[9,32,12], index: 13, kind: input, shape index: {}]   ;;  %s8582_s14 = inlined_call_operand.vmem [shape: f32[1,12], index: 14, kind: input, shape index: {}]   ;;  %s8583_s15 = inlined_call_operand.vmem [shape: bf16[9,64,1], index: 15, kind: input, shape index: {}]   ;;  %s8584_s16 = inlined_call_operand.vmem [shape: f32[2,64,12], index: 16, kind: output, shape index: {}]  }
   0x1   :  { %8591 = sst [smem:[#allocation15_spill]] %s8568_s0  ;;  %s6991_s23 = smov 0  }
   0x2   :  { %8592 = sst [smem:[#allocation16_spill]] %s8569_s1  ;;  %s6993_s24 = smov 0  }
   0x3   :  { %8593 = sst [smem:[#allocation17_spill]] %s8570_s2  ;;  %s6995_s25 = smov 0  }
   0x4   :  { %8594 = sst [smem:[#allocation18_spill]] %s8571_s3 }
   0x5   :  { %8595 = sst [smem:[#allocation19_spill]] %s8573_s5 }
   0x6   :  { %8596 = sst [smem:[#allocation20_spill]] %s8581_s13 }
   0x7   :  { %8597 = sst [smem:[#allocation21_spill]] %s8582_s14 }
   0x8   :  { %8598 = sst [smem:[#allocation22_spill]] %s8583_s15 }
   0x9 LB: > { %8599 = sst [smem:[#allocation4_spill]] %s6876_s23  ;;  %s35_s26 = sadd.s32 1, %s6876_s23  ;;  %s6884_s25 = sphi %s6995_s25, %s26_s25   ;;  %s6880_s24 = sphi %s6993_s24, %s8637_s24   ;;  %s6876_s23 = sphi %s6991_s23, %s8636_s23   ;;  %s6872_s22 = sphi %s6989_s22, %s8635_s22   ;;  %s6868_s21 = sphi %s6987_s21, %s8634_s21  }
   0xa   : > { %8600 = sst [smem:[#allocation5_spill]] %s6880_s24  ;;  %s38_s27 = sadd.s32 1, %s6880_s24 }
   0xb   : > { %8601 = sst [smem:[#allocation6_spill]] %s6884_s25  ;;  %p36_p0 = scmp.ge.s32.totalorder %s35_s26, 2 }
   0xc   : > { %p5760_p1 = scmp.ge.s32.totalorder %s6884_s25, 1  ;;  %p562_p2 = scmp.lt.s32.totalorder %s6884_s25, 5 }
   0xd   : > { %s8639_s26 = smov (%p36_p0, %s35_s26), 0  ;;  %s8641_s27 = smov (!%p36_p0, %s38_s27), %s6880_s24 }
   0xe   : > { %8602 = sst [smem:[#allocation7_spill]] %s8639_s26  ;;  %p563_p3 = pnand %p5760_p1, %p562_p2 }
   0xf   : > { %p40_p4 = scmp.ge.s32.totalorder %s8641_s27, 2 }
  0x10   : > { %566 = sbr.rel (%p563_p3) target bundleno = 4115 (0x1013), region = 84 }
  0x11   : > { %s8643_s27 = smov (%p40_p4, %s8641_s27), 0 }
  0x12   : > { %8603 = sst [smem:[#allocation8_spill]] %s8643_s27 }
  0x15   : > { %p650_p5 = scmp.lt.s32.totalorder %s6872_s22, 1  ;;  %p655_p6 = scmp.lt.s32.totalorder %s6868_s21, 1 }
  0x16   : > { %s8604_s18 = sld [smem:[#allocation15_spill]]  ;;  %p5773_p7 = scmp.ne.s32.totalorder %s6868_s21, 0 }
  0x17   : > { %s8645_s22 = smov (!%p650_p5, %s6872_s22), 1  ;;  %s8605_s3 = sld [smem:[#allocation18_spill]] }
  0x18   : > { %s7021_s28 = scalar_select %p655_p6, %s6868_s21, 1 }
  0x19   : > { %s6052_s29 = sshll.u32 %s8645_s22, 5  ;;  %s6057_s30 = sshll.u32 %s8645_s22, 6 }
  0x1a   : > { %s6053_s20 = sshll.u32 %s7021_s28, 4  ;;  %s8606_s5 = sld [smem:[#allocation19_spill]] }
  0x1b   : > { %s6056_s23 = sshll.u32 %s7021_s28, 6  ;;  %s686_s13 = scalar_lea.vmem %s8578_s10, %s7021_s28 }
  0x1c   : > { %s654_s19 = scalar_lea.vmem %s8604_s18, %s6052_s29  ;;  %s7048_s18 = scalar_lea.vmem %s8575_s7, %s6053_s20 }
  0x1d   : > { %s7030_s24 = scalar_lea.vmem %s8605_s3, %s6053_s20  ;;  %s689_s29 = scalar_lea.vmem %s8579_s11, %s7021_s28 }
  0x1e   : > { %s692_s0 = scalar_lea.vmem %s8580_s12, %s7021_s28  ;;  %s7075_s3 = scalar_lea.vmem %s8584_s16, %s6057_s30 }
  0x1f   : > { %702 = sbr.rel (%p5773_p7) target bundleno = 247 (0xf7), region = 88  ;;  %s8609_s15 = sld [smem:[#allocation17_spill]] (!%p5773_p7) }
  0x20   : > { %s7039_s2 = scalar_lea.vmem %s8606_s5, %s6053_s20 }
  0x21   : > { %8607 = sst [smem:[#allocation9_spill]] %s7039_s2  ;;  %s7062_s2 = scalar_lea.vmem %s8577_s9, %s6056_s23 }
  0x22   : > { %s8608_s23 = sld [smem:[#allocation16_spill]] (!%p5773_p7) }
  0x24   : > { %v6604_v1 = vld [vmem:[%s654_s19] sm:$0xff]   ;;  %vm746_vm0 = vcmask 130048   ;;  %v6605_v2 = vld [vmem:[%s654_s19 + $0x10] sm:$0xff]   ;;  %v6606_v3 = vld [vmem:[%s654_s19 + $0x8] sm:$0xff]   ;;  %vm824_vm1 = vcmask 261120  }
  0x25   : > { %6221 = vmatprep.mubr.msk.bf16.mxu0 %vm746_vm0, %v6604_v1  ;;  %6225 = vmatprep.mubr.msk.bf16.mxu1 %vm746_vm0, %v6605_v2  ;;  %v6607_v4 = vld [vmem:[%s654_s19 + $0x18] sm:$0xff]   ;;  %v5774_v5 = vld [vmem:[%s8609_s15] ss:$0 sm:$0xff] }
  0x28   : > { %v6603_v0 = vld [vmem:[%s8608_s23] sm:$0xff]  }
  0x29   : > { %6219 = vmatprep.subr.bf16.mxu0 %v6603_v0  ;;  %6525 = vmatprep.subr.bf16.mxu1 %v6603_v0 }
  0x2a   : > { %6220 = vmatpush3.bf16.msra.mxu0 %v6603_v0  ;;  %6526 = vmatpush3.bf16.msra.mxu1 %v6603_v0 }
  0x2d   : > { %6222 = vmatmul.mubr.msk.bf16.vlgmr.msra.gmra.mxu0 %vm746_vm0, %v6606_v3  ;;  %6226 = vmatmul.mubr.msk.bf16.vlgmr.msra.gmra.mxu1 %vm746_vm0, %v6607_v4 }
  0xed   : > { %v6223_v6 = vpop.f32.mrf.mxu0  ;;  %v6227_v7 = vpop.f32.mrf.mxu1 }
  0xee   : > { %v802_v8 = vadd.f32 %v6223_v6, %v5774_v5  ;;  %v818_v9 = vadd.f32 %v6227_v7, %v5774_v5 }
  0xef   : > { %v793_v10 = vpop.f32.mrf.mxu0  ;;  %v809_v11 = vpop.f32.mrf.mxu1 }
  0xf0   : > { %827 = vst.msk [vmem:[#allocation2 + $0x10] sm:$0xff] %vm824_vm1, %v802_v8  ;;  %831 = vst.msk [vmem:[#allocation2 + $0x30] sm:$0xff] %vm824_vm1, %v818_v9  ;;  %v794_v12 = vadd.f32 %v5774_v5, %v793_v10  ;;  %v810_v13 = vadd.f32 %v5774_v5, %v809_v11 }
  0xf1   : > { %v6224_v14 = vpop.f32.mrf.mxu0  ;;  %v6228_v15 = vpop.f32.mrf.mxu1 }
  0xf2   : > { %825 = vst.msk [vmem:[#allocation2] sm:$0xff] %vm824_vm1, %v794_v12  ;;  %829 = vst.msk [vmem:[#allocation2 + $0x20] sm:$0xff] %vm824_vm1, %v810_v13  ;;  %v805_v16 = vadd.f32 %v6224_v14, %v5774_v5  ;;  %v821_v17 = vadd.f32 %v6228_v15, %v5774_v5 }
  0xf3   : > { %v796_v18 = vpop.f32.mrf.mxu0  ;;  %v812_v19 = vpop.f32.mrf.mxu1 }
  0xf4   : > { %828 = vst.msk [vmem:[#allocation2 + $0x18] sm:$0xff] %vm824_vm1, %v805_v16  ;;  %832 = vst.msk [vmem:[#allocation2 + $0x38] sm:$0xff] %vm824_vm1, %v821_v17  ;;  %v797_v20 = vadd.f32 %v5774_v5, %v796_v18  ;;  %v813_v21 = vadd.f32 %v5774_v5, %v812_v19 }
  0xf6   : > { %826 = vst.msk [vmem:[#allocation2 + $0x8] sm:$0xff] %vm824_vm1, %v797_v20  ;;  %830 = vst.msk [vmem:[#allocation2 + $0x28] sm:$0xff] %vm824_vm1, %v813_v21 }
  0xf7 PF: > { %v6668_v22 = vld [vmem:[%s7030_s24 + $0x8] sm:$0xff]   ;;  %v6669_v23 = vld [vmem:[%s7030_s24] sm:$0xff]   ;;  %vm868_vm2 = vcmask 261120   ;;  %v835_v27 = vld [vmem:[#allocation2 + $0x10] sm:$0xff]  ;;  %s8610_s1 = scalar_lea.vmem %s8572_s4, %s7021_s28  ;;  %vm962_vm3 = vcmask 64512   ;;  %s6886_s22 = smov 96  }
  0xf8   : > { %6229 = vmatprep.subr.bf16.mxu0 %v6668_v22  ;;  %v839_v33 = vld [vmem:[#allocation2 + $0x30] sm:$0xff]  ;;  %v5784_v37 = vld [vmem:[%s8610_s1] ss:$0 sm:$0xff]  ;;  %s6887_s20 = smov 64   ;;  %vm1060_vm4 = vcmask 523264   ;;  %s6888_s17 = smov 88  }
  0xf9   : > { %v833_v24 = vld [vmem:[#allocation2] sm:$0xff]  ;;  %6230 = vmatpush3.bf16.msra.mxu0 %v6668_v22  ;;  %s6889_s26 = smov 80   ;;  %s6890_s27 = smov 120   ;;  %vm2228_vm5 = vcmask 130048   ;;  %vm2237_vm6 = vcmask 195584  }
  0xfa   : > { %6231 = vmatprep.subr.bf16.mxu0 %v6669_v23  ;;  %v837_v29 = vld [vmem:[#allocation2 + $0x20] sm:$0xff]  ;;  %s6891_s14 = smov 112   ;;  %s6892_s5 = smov 56  }
  0xfb   : > { %v836_v28 = vld [vmem:[#allocation2 + $0x18] sm:$0xff]  ;;  %s6893_s23 = smov 48   ;;  %s6894_s30 = smov 72  }
  0xfc   : > { %v842_v31 = vpack.c.bf16 %v836_v28, %v835_v27  ;;  %v840_v34 = vld [vmem:[#allocation2 + $0x38] sm:$0xff]  ;;  %s6895_s25 = smov 104   ;;  %s6896_s15 = smov 40  }
  0xfd   : > { %v834_v25 = vld [vmem:[#allocation2 + $0x8] sm:$0xff]  ;;  %6232 = vmatpush3.bf16.msra.mxu0 %v6669_v23  ;;  %v844_v35 = vpack.c.bf16 %v840_v34, %v839_v33  ;;  %s6897_s24 = smov 8   ;;  %s6898_s19 = smov 16  }
  0xfe   : > { %v841_v26 = vpack.c.bf16 %v834_v25, %v833_v24  ;;  %v838_v30 = vld [vmem:[#allocation2 + $0x28] sm:$0xff]  ;;  %s8611_s1 = sld [smem:[#allocation9_spill]]  ;;  %p5848_p8 = scmp.ne.s32.totalorder %s6868_s21, 1 }
  0xff   : > { %v843_v32 = vpack.c.bf16 %v838_v30, %v837_v29 }
 0x100   : > { %6233 = vmatprep.mubr.msk.bf16.mxu0 %vm868_vm2, %v841_v26 }
 0x101   : > { %6234 = vmatmul.mubr.msk.bf16.vlgmr.msra.gmra.mxu0 %vm868_vm2, %v842_v31 }
 0x102   : > { %6237 = vmatprep.mubr.msk.bf16.mxu0 %vm868_vm2, %v843_v32 }
 0x109   : > { %6238 = vmatmul.mubr.msk.bf16.gmra.mxu0 %vm868_vm2, %v844_v35 }
 0x1c1   : > { %v6235_v36 = vpop.f32.mrf.mxu0 }
 0x1c2   : > { %v924_v40 = vadd.f32 %v6235_v36, %v5784_v37 }
 0x1c3   : > { %v915_v38 = vpop.f32.mrf.mxu0 }
 0x1c4   : > { %v916_v43 = vadd.f32 %v5784_v37, %v915_v38 }
 0x1c5   : > { %v6236_v39 = vpop.f32.mrf.mxu0 }
 0x1c6   : > { %v927_v41 = vadd.f32 %v6236_v39, %v5784_v37 }
 0x1c7   : > { %v918_v42 = vpop.f32.mrf.mxu0 }
 0x1c8   : > { %v7103_v44 = vpack.c.bf16 %v927_v41, %v924_v40  ;;  %v919_v45 = vadd.f32 %v5784_v37, %v918_v42 }
 0x1c9   : > { %v6239_v46 = vpop.f32.mrf.mxu0 }
 0x1ca   : > { %v7105_v47 = vpack.c.bf16 %v919_v45, %v916_v43  ;;  %956 = vrot.lane.b32.xlu1 %v7103_v44, %s6886_s22  ;;  %v940_v50 = vadd.f32 %v6239_v46, %v5784_v37 }
 0x1cb   : > { %v931_v48 = vpop.f32.mrf.mxu0 }
 0x1cc   : > { %6249 = vmatprep.mubr.msk.bf16.mxu1 %vm962_vm3, %v7105_v47  ;;  %v932_v55 = vadd.f32 %v5784_v37, %v931_v48 }
 0x1cd   : > { %v6240_v49 = vpop.f32.mrf.mxu0 }
 0x1ce   : > { %v943_v51 = vadd.f32 %v6240_v49, %v5784_v37  ;;  %954 = vrot.lane.b32.xlu1 %v7105_v47, %s6886_s22 }
 0x1cf   : > { %v934_v52 = vpop.f32.mrf.mxu0 }
 0x1d0   : > { %v7111_v53 = vpack.c.bf16 %v943_v51, %v940_v50  ;;  %v935_v54 = vadd.f32 %v5784_v37, %v934_v52 }
 0x1d2   : > { %960 = vrot.lane.b32.xlu0 %v7111_v53, %s6886_s22  ;;  %1159 = vrot.lane.b32.xlu1 %v7111_v53, %s6887_s20  ;;  %v7116_v56 = vpack.c.bf16 %v935_v54, %v932_v55 }
 0x1d6   : > { %958 = vrot.lane.b32.xlu0 %v7116_v56, %s6886_s22  ;;  %1155 = vrot.lane.b32.xlu1 %v7103_v44, %s6887_s20  ;;  %s6899_s22 = smov 24  }
 0x1da   : > { %1157 = vrot.lane.b32.xlu0 %v7116_v56, %s6887_s20 }
 0x23c   : > { %v957_v57 = vpop.permute.xlu1 %956 }
 0x23d   : > { %v979_v2 = vsel %vm962_vm3, %v957_v57, 0 }
 0x240   : > { %v955_v58 = vpop.permute.xlu1 %954 }
 0x241   : > { %v976_v3 = vsel %vm962_vm3, %v955_v58, 0 }
 0x244   : > { %v961_v59 = vpop.permute.xlu0 %960  ;;  %v1160_v60 = vpop.permute.xlu1 %1159 }
 0x245   : > { %6531 = vmatprep.subr.msk.bf16.mxu1 %vm962_vm3, %v961_v59  ;;  %6257 = vmatprep.subr.bf16.mxu0 %v1160_v60  ;;  %v985_v61 = vsel %vm962_vm3, %v961_v59, 0 }
 0x246   : > { %6242 = vmatpush3.bf16.xpose.msra.mxu1 %v985_v61  ;;  %6258 = vmatpush3.bf16.msra.mxu0 %v1160_v60 }
 0x248   : > { %v959_v62 = vpop.permute.xlu0 %958  ;;  %v1156_v1 = vpop.permute.xlu1 %1155 }
 0x249   : > { %6532 = vmatprep.subr.msk.bf16.mxu1 %vm962_vm3, %v959_v62  ;;  %v982_v0 = vsel %vm962_vm3, %v959_v62, 0 }
 0x24c   : > { %v1158_v63 = vpop.permute.xlu0 %1157 }
 0x24d   : > { %6259 = vmatprep.subr.bf16.mxu0 %v1158_v63 }
 0x24e   : > { %6244 = vmatpush3.bf16.xpose.msra.mxu1 %v982_v0  ;;  %6260 = vmatpush3.bf16.msra.mxu0 %v1158_v63 }
 0x24f   : > { %6533 = vmatprep.subr.msk.bf16.mxu1 %vm962_vm3, %v957_v57  ;;  %6261 = vmatprep.subr.bf16.mxu0 %v1156_v1 }
 0x252   : > { %6262 = vmatpush3.bf16.msra.mxu0 %v1156_v1 }
 0x256   : > { %6246 = vmatpush3.bf16.xpose.msra.mxu1 %v979_v2 }
 0x257   : > { %6534 = vmatprep.subr.msk.bf16.mxu1 %vm962_vm3, %v955_v58 }
 0x25e   : > { %6248 = vmatpush3.bf16.xpose.msra.mxu1 %v976_v3 }
 0x265   : > { %6250 = vmatmul.mubr.msk.bf16.vlgmr.msra.gmra.mxu1 %vm962_vm3, %v7103_v44 }
 0x266   : > { %6253 = vmatprep.mubr.msk.bf16.mxu1 %vm962_vm3, %v7116_v56 }
 0x26d   : > { %6254 = vmatmul.mubr.msk.bf16.gmra.mxu1 %vm962_vm3, %v7111_v53 }
 0x325   : > { %v6251_v4 = vpop.f32.mrf.mxu1 }
 0x326   : > { %v1054_v5 = vmul.f32 0.35355338, %v6251_v4 }
 0x327   : > { %v1021_v6 = vpop.f32.mrf.mxu1 }
 0x328   : > { %v1052_v7 = vmul.f32 0.35355338, %v1021_v6  ;;  %v1067_v8 = vsel %vm1060_vm4, %v1054_v5, -inf }
 0x329   : > { %1068 = vmax.xlane.f32.xlu0 %v1067_v8  ;;  %v6252_v9 = vpop.f32.mrf.mxu1 }
 0x32a   : > { %v1055_v11 = vmul.f32 0.35355338, %v6252_v9  ;;  %v1061_v13 = vsel %vm1060_vm4, %v1052_v7, -inf }
 0x32b   : > { %v1024_v10 = vpop.f32.mrf.mxu1 }
 0x32c   : > { %v1053_v12 = vmul.f32 0.35355338, %v1024_v10  ;;  %v1070_v18 = vsel %vm1060_vm4, %v1055_v11, -inf }
 0x32d   : > { %1062 = vmax.xlane.f32.xlu0 %v1061_v13  ;;  %v6255_v14 = vpop.f32.mrf.mxu1 }
 0x32e   : > { %v7139_v15 = vmul.f32 0.35355338, %v6255_v14  ;;  %v1064_v16 = vsel %vm1060_vm4, %v1053_v12, -inf }
 0x32f   : > { %1065 = vmax.xlane.f32.xlu1 %v1064_v16  ;;  %v1037_v17 = vpop.f32.mrf.mxu1 }
 0x330   : > { %v1056_v20 = vmul.f32 0.35355338, %v1037_v17  ;;  %v1079_v22 = vsel %vm1060_vm4, %v7139_v15, -inf }
 0x331   : > { %1071 = vmax.xlane.f32.xlu0 %v1070_v18  ;;  %v6256_v19 = vpop.f32.mrf.mxu1 }
 0x332   : > { %v1059_v21 = vmul.f32 0.35355338, %v6256_v19  ;;  %v1073_v26 = vsel %vm1060_vm4, %v1056_v20, -inf }
 0x333   : > { %1080 = vmax.xlane.f32.xlu1 %v1079_v22  ;;  %v1040_v23 = vpop.f32.mrf.mxu1 }
 0x334   : > { %v1057_v24 = vmul.f32 0.35355338, %v1040_v23  ;;  %v1082_v25 = vsel %vm1060_vm4, %v1059_v21, -inf }
 0x335   : > { %1083 = vmax.xlane.f32.xlu0 %v1082_v25 }
 0x336   : > { %v1076_v27 = vsel %vm1060_vm4, %v1057_v24, -inf }
 0x337   : > { %1074 = vmax.xlane.f32.xlu1 %v1073_v26 }
 0x339   : > { %1077 = vmax.xlane.f32.xlu0 %v1076_v27 }
 0x348   : > { %1256 = vrot.lane.b32.xlu1 %v7111_v53, %s6888_s17 }
 0x34c   : > { %1254 = vrot.lane.b32.xlu1 %v7116_v56, %s6888_s17 }
 0x34f   : > { %1153 = vrot.lane.b32.xlu0 %v7105_v47, %s6887_s20 }
 0x3b2   : > { %v1069_v28 = vpop.xlane.xlu0 %1068 }
 0x3b3   : > { %v1087_v29 = vsub.f32 %v1054_v5, %v1069_v28 }
 0x3b5   : > { %v1097_v30 = vmul.f32 1.442695, %v1087_v29 }
 0x3b6   : > { %v1063_v31 = vpop.xlane.xlu0 %1062 }
 0x3b7   : > { %6682 = vpow2.f32 %v1097_v30  ;;  %v1085_v32 = vsub.f32 %v1052_v7, %v1063_v31 }
 0x3b8   : > { %v1066_v33 = vpop.xlane.xlu1 %1065 }
 0x3b9   : > { %v1093_v34 = vmul.f32 1.442695, %v1085_v32  ;;  %v1086_v35 = vsub.f32 %v1053_v12, %v1066_v33 }
 0x3ba   : > { %v1072_v36 = vpop.xlane.xlu0 %1071 }
 0x3bb   : > { %6684 = vpow2.f32 %v1093_v34  ;;  %v1088_v37 = vsub.f32 %v1055_v11, %v1072_v36  ;;  %v1095_v39 = vmul.f32 1.442695, %v1086_v35 }
 0x3bc   : > { %v1081_v38 = vpop.xlane.xlu1 %1080 }
 0x3bd   : > { %v1099_v40 = vmul.f32 1.442695, %v1088_v37  ;;  %v1091_v61 = vsub.f32 %v7139_v15, %v1081_v38 }
 0x3be   : > { %v1084_v41 = vpop.xlane.xlu0 %1083 }
 0x3bf   : > { %6686 = vpow2.f32 %v1099_v40  ;;  %v1092_v59 = vsub.f32 %v1059_v21, %v1084_v41  ;;  %v1105_v63 = vmul.f32 1.442695, %v1091_v61 }
 0x3c0   : > { %6688 = vpow2.f32 %v1095_v39  ;;  %v1075_v42 = vpop.xlane.xlu1 %1074 }
 0x3c1   : > { %v1089_v58 = vsub.f32 %v1056_v20, %v1075_v42  ;;  %v1107_v62 = vmul.f32 1.442695, %v1092_v59 }
 0x3c2   : > { %v1078_v43 = vpop.xlane.xlu0 %1077 }
 0x3c3   : > { %v1101_v60 = vmul.f32 1.442695, %v1089_v58  ;;  %v1090_v0 = vsub.f32 %v1057_v24, %v1078_v43 }
 0x3c4   : > { %v7154_v45 = vpop.eup %6682  ;;  %v7160_v50 = vpop.permute.xlu1 %1256 }
 0x3c5   : > { %v1115_v46 = vsel %vm1060_vm4, %v7154_v45, 0.0  ;;  %6690 = vpow2.f32 %v1101_v60  ;;  %v1103_v1 = vmul.f32 1.442695, %v1090_v0  ;;  %v1280_v27 = vsel %vm962_vm3, %v7160_v50, 0 }
 0x3c6   : > { %1116 = vadd.xlane.f32.xlu1 %v1115_v46  ;;  %v1154_v48 = vpop.permute.xlu0 %1153  ;;  %6692 = vpow2.f32 %v1107_v62 }
 0x3c7   : > { %6263 = vmatprep.subr.bf16.mxu0 %v1154_v48  ;;  %6694 = vpow2.f32 %v1105_v63 }
 0x3c8   : > { %v7158_v49 = vpop.eup %6684  ;;  %6264 = vmatpush3.bf16.msra.mxu0 %v1154_v48  ;;  %6696 = vpow2.f32 %v1103_v1  ;;  %v1255_v10 = vpop.permute.xlu1 %1254 }
 0x3c9   : > { %6535 = vmatprep.subr.msk.bf16.mxu0 %vm962_vm3, %v7160_v50  ;;  %v1109_v51 = vsel %vm1060_vm4, %v7158_v49, 0.0  ;;  %v1277_v28 = vsel %vm962_vm3, %v1255_v10, 0 }
 0x3ca   : > { %1110 = vadd.xlane.f32.xlu1 %v1109_v51 }
 0x3cc   : > { %v7166_v52 = vpop.eup %6686 }
 0x3cd   : > { %v1118_v54 = vsel %vm1060_vm4, %v7166_v52, 0.0  ;;  %v7170_v55 = vpop.eup %6688 }
 0x3ce   : > { %1119 = vadd.xlane.f32.xlu0 %v1118_v54  ;;  %v1112_v57 = vsel %vm1060_vm4, %v7170_v55, 0.0 }
 0x3d2   : > { %1113 = vadd.xlane.f32.xlu0 %v1112_v57  ;;  %v7179_v2 = vpop.eup %6690 }
 0x3d3   : > { %v1121_v3 = vsel %vm1060_vm4, %v7179_v2, 0.0  ;;  %v7183_v4 = vpop.eup %6692 }
 0x3d4   : > { %v1130_v5 = vsel %vm1060_vm4, %v7183_v4, 0.0  ;;  %v7187_v6 = vpop.eup %6694 }
 0x3d5   : > { %v1127_v7 = vsel %vm1060_vm4, %v7187_v6, 0.0  ;;  %v7191_v8 = vpop.eup %6696 }
 0x3d6   : > { %v1124_v9 = vsel %vm1060_vm4, %v7191_v8, 0.0 }
 0x3db   : > { %1550 = vrot.lane.b32.xlu1 %v7111_v53, %s6889_s26 }
 0x3e8   : > { %1252 = vrot.lane.b32.xlu0 %v7103_v44, %s6888_s17 }
 0x3ff   : > { %1122 = vadd.xlane.f32.xlu1 %v1121_v3 }
 0x403   : > { %1131 = vadd.xlane.f32.xlu1 %v1130_v5 }
 0x407   : > { %1128 = vadd.xlane.f32.xlu0 %v1127_v7 }
 0x40b   : > { %1125 = vadd.xlane.f32.xlu0 %v1124_v9 }
 0x414   : > { %1548 = vrot.lane.b32.xlu1 %v7116_v56, %s6889_s26 }
 0x418   : > { %1244 = vrot.lane.b32.xlu1 %v7103_v44, %s6890_s27 }
 0x41c   : > { %1246 = vrot.lane.b32.xlu1 %v7116_v56, %s6890_s27 }
 0x420   : > { %1544 = vrot.lane.b32.xlu1 %v7105_v47, %s6889_s26 }
 0x421   : > { %1250 = vrot.lane.b32.xlu0 %v7105_v47, %s6888_s17  ;;  %s8612_s17 = scalar_lea.vmem %s8574_s6, %s7021_s28 }
 0x424   : > { %1538 = vrot.lane.b32.xlu1 %v7103_v44, %s6891_s14 }
 0x425   : > { %1242 = vrot.lane.b32.xlu0 %v7105_v47, %s6890_s27 }
 0x428   : > { %1542 = vrot.lane.b32.xlu1 %v7111_v53, %s6891_s14 }
 0x429   : > { %1546 = vrot.lane.b32.xlu0 %v7103_v44, %s6889_s26 }
 0x42d   : > { %1248 = vrot.lane.b32.xlu0 %v7111_v53, %s6890_s27 }
 0x431   : > { %1536 = vrot.lane.b32.xlu0 %v7105_v47, %s6891_s14 }
 0x435   : > { %1540 = vrot.lane.b32.xlu0 %v7116_v56, %s6891_s14  ;;  %s8613_s14 = scalar_lea.vmem %s8576_s8, %s7021_s28 }
 0x44f   : > { %v1117_v11 = vpop.xlane.xlu1 %1116 }
 0x453   : > { %v1111_v12 = vpop.xlane.xlu1 %1110 }
 0x457   : > { %v1551_v13 = vpop.permute.xlu1 %1550  ;;  %v1120_v14 = vpop.xlane.xlu0 %1119 }
 0x458   : > { %6539 = vmatprep.subr.msk.bf16.mxu1 %vm962_vm3, %v1551_v13  ;;  %v1574_v15 = vsel %vm962_vm3, %v1551_v13, 0  ;;  %6698 = vrcp.f32 %v1120_v14 }
 0x459   : > { %6306 = vmatpush3.bf16.xpose.msra.mxu1 %v1574_v15  ;;  %6700 = vrcp.f32 %v1111_v12 }
 0x45a   : > { %6702 = vrcp.f32 %v1117_v11 }
 0x45b   : > { %v1114_v16 = vpop.xlane.xlu0 %1113 }
 0x45c   : > { %6704 = vrcp.f32 %v1114_v16 }
 0x45f   : > { %v1253_v29 = vpop.permute.xlu0 %1252 }
 0x460   : > { %v1274_v30 = vsel %vm962_vm3, %v1253_v29, 0 }
 0x465   : > { %v6699_v17 = vpop.eup %6698 }
 0x466   : > { %v6701_v18 = vpop.eup %6700  ;;  %v1144_v21 = vmul.f32 %v6699_v17, %v7166_v52 }
 0x467   : > { %v6703_v19 = vpop.eup %6702  ;;  %v1141_v22 = vmul.f32 %v6701_v18, %v7158_v49 }
 0x468   : > { %v1143_v24 = vmul.f32 %v6703_v19, %v7154_v45 }
 0x469   : > { %v6705_v20 = vpop.eup %6704 }
 0x46a   : > { %v1142_v23 = vmul.f32 %v6705_v20, %v7170_v55  ;;  %v1150_v26 = vpack.c.bf16 %v1144_v21, %v1143_v24 }
 0x46c   : > { %v1149_v25 = vpack.c.bf16 %v1142_v23, %v1141_v22 }
 0x46e   : > { %6265 = vmatprep.mubr.msk.bf16.mxu0 %vm1060_vm4, %v1149_v25 }
 0x46f   : > { %6266 = vmatmul.mubr.msk.bf16.vlgmr.msra.gmra.mxu0 %vm1060_vm4, %v1150_v26 }
 0x470   : > { %6274 = vmatpush3.bf16.xpose.msra.mxu0 %v1280_v27 }
 0x471   : > { %6536 = vmatprep.subr.msk.bf16.mxu0 %vm962_vm3, %v1255_v10 }
 0x478   : > { %6276 = vmatpush3.bf16.xpose.msra.mxu0 %v1277_v28 }
 0x479   : > { %6537 = vmatprep.subr.msk.bf16.mxu0 %vm962_vm3, %v1253_v29 }
 0x480   : > { %6278 = vmatpush3.bf16.xpose.msra.mxu0 %v1274_v30 }
 0x488   : > { %v1123_v31 = vpop.xlane.xlu1 %1122 }
 0x48c   : > { %v1132_v32 = vpop.xlane.xlu1 %1131 }
 0x490   : > { %v1549_v33 = vpop.permute.xlu1 %1548  ;;  %v1129_v34 = vpop.xlane.xlu0 %1128 }
 0x491   : > { %6540 = vmatprep.subr.msk.bf16.mxu1 %vm962_vm3, %v1549_v33  ;;  %v1571_v35 = vsel %vm962_vm3, %v1549_v33, 0  ;;  %6706 = vrcp.f32 %v1129_v34 }
 0x492   : > { %6308 = vmatpush3.bf16.xpose.msra.mxu1 %v1571_v35  ;;  %6708 = vrcp.f32 %v1123_v31 }
 0x493   : > { %6710 = vrcp.f32 %v1132_v32 }
 0x494   : > { %v1126_v36 = vpop.xlane.xlu0 %1125  ;;  %v1245_v37 = vpop.permute.xlu1 %1244 }
 0x495   : > { %6712 = vrcp.f32 %v1126_v36 }
 0x498   : > { %v1251_v38 = vpop.permute.xlu0 %1250  ;;  %v1247_v40 = vpop.permute.xlu1 %1246 }
 0x499   : > { %6538 = vmatprep.subr.msk.bf16.mxu0 %vm962_vm3, %v1251_v38  ;;  %v1271_v39 = vsel %vm962_vm3, %v1251_v38, 0 }
 0x49a   : > { %6280 = vmatpush3.bf16.xpose.msra.mxu0 %v1271_v39 }
 0x49c   : > { %v1243_v41 = vpop.permute.xlu0 %1242  ;;  %v1545_v50 = vpop.permute.xlu1 %1544 }
 0x49d   : > { %v1565_v61 = vsel %vm962_vm3, %v1545_v50, 0 }
 0x49e   : > { %v6707_v42 = vpop.eup %6706 }
 0x49f   : > { %v6709_v43 = vpop.eup %6708  ;;  %v1147_v51 = vmul.f32 %v6707_v42, %v7187_v6 }
 0x4a0   : > { %v1547_v45 = vpop.permute.xlu0 %1546  ;;  %v6711_v46 = vpop.eup %6710  ;;  %v1145_v52 = vmul.f32 %v6709_v43, %v7179_v2 }
 0x4a1   : > { %6541 = vmatprep.subr.msk.bf16.mxu1 %vm962_vm3, %v1547_v45  ;;  %v1568_v48 = vsel %vm962_vm3, %v1547_v45, 0  ;;  %v1148_v57 = vmul.f32 %v6711_v46, %v7183_v4  ;;  %v1539_v62 = vpop.permute.xlu1 %1538 }
 0x4a2   : > { %v6713_v49 = vpop.eup %6712  ;;  %6310 = vmatpush3.bf16.xpose.msra.mxu1 %v1568_v48 }
 0x4a3   : > { %6542 = vmatprep.subr.msk.bf16.mxu1 %vm962_vm3, %v1545_v50  ;;  %v1146_v54 = vmul.f32 %v6713_v49, %v7191_v8  ;;  %v1152_v59 = vpack.c.bf16 %v1148_v57, %v1147_v51 }
 0x4a4   : > { %v1249_v55 = vpop.permute.xlu0 %1248 }
 0x4a5   : > { %v1151_v58 = vpack.c.bf16 %v1146_v54, %v1145_v52  ;;  %v1543_v0 = vpop.permute.xlu1 %1542 }
 0x4a7   : > { %6269 = vmatprep.mubr.msk.bf16.mxu0 %vm1060_vm4, %v1151_v58 }
 0x4a8   : > { %6270 = vmatmul.mubr.msk.bf16.gmra.mxu0 %vm1060_vm4, %v1152_v59  ;;  %v1537_v60 = vpop.permute.xlu0 %1536 }
 0x4a9   : > { %6281 = vmatprep.mubr.msk.bf16.mxu0 %vm962_vm3, %v1243_v41  ;;  %6313 = vmatprep.mubr.msk.bf16.mxu1 %vm962_vm3, %v1537_v60 }
 0x4aa   : > { %6312 = vmatpush3.bf16.xpose.msra.mxu1 %v1565_v61 }
 0x4ac   : > { %v1541_v63 = vpop.permute.xlu0 %1540 }
 0x4b0   : > { %6282 = vmatmul.mubr.msk.bf16.vlgmr.msra.gmra.mxu0 %vm962_vm3, %v1245_v37 }
 0x4b1   : > { %6285 = vmatprep.mubr.msk.bf16.mxu0 %vm962_vm3, %v1247_v40  ;;  %6314 = vmatmul.mubr.msk.bf16.vlgmr.msra.gmra.mxu1 %vm962_vm3, %v1539_v62 }
 0x4b2   : > { %6317 = vmatprep.mubr.msk.bf16.mxu1 %vm962_vm3, %v1541_v63 }
 0x4b8   : > { %6286 = vmatmul.mubr.msk.bf16.gmra.mxu0 %vm962_vm3, %v1249_v55 }
 0x4b9   : > { %6318 = vmatmul.mubr.msk.bf16.gmra.mxu1 %vm962_vm3, %v1543_v0 }
 0x52f   : > { %v7247_v1 = vpop.f32.mrf.mxu0 }
 0x531   : > { %v7249_v2 = vpop.f32.mrf.mxu0 }
 0x533   : > { %v7251_v3 = vpop.f32.mrf.mxu0 }
 0x535   : > { %v7253_v4 = vpop.f32.mrf.mxu0 }
 0x568   : > { %v7255_v5 = vpop.f32.mrf.mxu0 }
 0x56a   : > { %v7257_v6 = vpop.f32.mrf.mxu0 }
 0x56c   : > { %v7259_v7 = vpop.f32.mrf.mxu0 }
 0x56e   : > { %v7261_v8 = vpop.f32.mrf.mxu0 }
 0x570   : > { %v6283_v10 = vpop.f32.mrf.mxu0 }
 0x571   : > { %v6315_v9 = vpop.f32.mrf.mxu1  ;;  %v7287_v33 = vmul.f32 0.35355338, %v6283_v10 }
 0x572   : > { %v7265_v14 = vmul.f32 0.35355338, %v6315_v9  ;;  %v1316_v16 = vpop.f32.mrf.mxu0 }
 0x573   : > { %v1610_v11 = vpop.f32.mrf.mxu1  ;;  %v7295_v38 = vmul.f32 0.35355338, %v1316_v16  ;;  %v1361_v41 = vsel %vm1060_vm4, %v7287_v33, -inf }
 0x574   : > { %v7263_v12 = vmul.f32 0.35355338, %v1610_v11  ;;  %v1655_v21 = vsel %vm1060_vm4, %v7265_v14, -inf  ;;  %v6284_v23 = vpop.f32.mrf.mxu0 }
 0x575   : > { %v6316_v13 = vpop.f32.mrf.mxu1  ;;  %v7303_v43 = vmul.f32 0.35355338, %v6284_v23  ;;  %v1355_v48 = vsel %vm1060_vm4, %v7295_v38, -inf }
 0x576   : > { %v1649_v15 = vsel %vm1060_vm4, %v7263_v12, -inf  ;;  %v7271_v20 = vmul.f32 0.35355338, %v6316_v13  ;;  %v1319_v30 = vpop.f32.mrf.mxu0 }
 0x577   : > { %1650 = vmax.xlane.f32.xlu1 %v1649_v15  ;;  %v1613_v17 = vpop.f32.mrf.mxu1  ;;  %v7289_v34 = vmul.f32 0.35355338, %v1319_v30  ;;  %v1364_v52 = vsel %vm1060_vm4, %v7303_v43, -inf }
 0x578   : > { %v7269_v18 = vmul.f32 0.35355338, %v1613_v17  ;;  %v1658_v28 = vsel %vm1060_vm4, %v7271_v20, -inf  ;;  %v6287_v37 = vpop.f32.mrf.mxu0 }
 0x579   : > { %v6319_v19 = vpop.f32.mrf.mxu1  ;;  %v7297_v39 = vmul.f32 0.35355338, %v6287_v37  ;;  %v1358_v40 = vsel %vm1060_vm4, %v7289_v34, -inf }
 0x57a   : > { %v1652_v22 = vsel %vm1060_vm4, %v7269_v18, -inf  ;;  %v7279_v27 = vmul.f32 0.35355338, %v6319_v19  ;;  %v1332_v42 = vpop.f32.mrf.mxu0 }
 0x57b   : > { %1656 = vmax.xlane.f32.xlu1 %v1655_v21  ;;  %1653 = vmax.xlane.f32.xlu0 %v1652_v22  ;;  %v1626_v24 = vpop.f32.mrf.mxu1  ;;  %v7305_v45 = vmul.f32 0.35355338, %v1332_v42  ;;  %v1373_v46 = vsel %vm1060_vm4, %v7297_v39, -inf }
 0x57c   : > { %v7277_v25 = vmul.f32 0.35355338, %v1626_v24  ;;  %v1667_v35 = vsel %vm1060_vm4, %v7279_v27, -inf  ;;  %v6288_v49 = vpop.f32.mrf.mxu0 }
 0x57d   : > { %v6320_v26 = vpop.f32.mrf.mxu1  ;;  %v7311_v50 = vmul.f32 0.35355338, %v6288_v49  ;;  %v1367_v51 = vsel %vm1060_vm4, %v7305_v45, -inf }
 0x57e   : > { %v1661_v29 = vsel %vm1060_vm4, %v7277_v25, -inf  ;;  %v1335_v54 = vpop.f32.mrf.mxu0  ;;  %v7321_v58 = vmul.f32 0.35355338, %v6320_v26 }
 0x57f   : > { %1659 = vmax.xlane.f32.xlu0 %v1658_v28  ;;  %1662 = vmax.xlane.f32.xlu1 %v1661_v29  ;;  %v1629_v31 = vpop.f32.mrf.mxu1  ;;  %v7317_v55 = vmul.f32 0.35355338, %v1335_v54  ;;  %v1376_v57 = vsel %vm1060_vm4, %v7311_v50, -inf }
 0x580   : > { %v7285_v32 = vmul.f32 0.35355338, %v1629_v31  ;;  %v1670_v60 = vsel %vm1060_vm4, %v7321_v58, -inf }
 0x581   : > { %v1370_v59 = vsel %vm1060_vm4, %v7317_v55, -inf }
 0x582   : > { %v1664_v36 = vsel %vm1060_vm4, %v7285_v32, -inf }
 0x583   : > { %1668 = vmax.xlane.f32.xlu1 %v1667_v35  ;;  %1665 = vmax.xlane.f32.xlu0 %v1664_v36 }
 0x587   : > { %1359 = vmax.xlane.f32.xlu1 %v1358_v40  ;;  %1362 = vmax.xlane.f32.xlu0 %v1361_v41 }
 0x58b   : > { %1374 = vmax.xlane.f32.xlu1 %v1373_v46  ;;  %1356 = vmax.xlane.f32.xlu0 %v1355_v48 }
 0x58f   : > { %1368 = vmax.xlane.f32.xlu1 %v1367_v51  ;;  %1365 = vmax.xlane.f32.xlu0 %v1364_v52 }
 0x593   : > { %1377 = vmax.xlane.f32.xlu0 %v1376_v57 }
 0x597   : > { %1371 = vmax.xlane.f32.xlu0 %v1370_v59 }
 0x59b   : > { %1671 = vmax.xlane.f32.xlu0 %v1670_v60 }
 0x5a0   : > { %1453 = vrot.lane.b32.xlu1 %v7111_v53, %s6892_s5 }
 0x5a4   : > { %1451 = vrot.lane.b32.xlu1 %v7116_v56, %s6892_s5 }
 0x5a8   : > { %1447 = vrot.lane.b32.xlu1 %v7105_v47, %s6892_s5 }
 0x5ac   : > { %1747 = vrot.lane.b32.xlu1 %v7111_v53, %s6893_s23 }
 0x5b0   : > { %1745 = vrot.lane.b32.xlu1 %v7116_v56, %s6893_s23 }
 0x5b4   : > { %1743 = vrot.lane.b32.xlu1 %v7103_v44, %s6893_s23 }
 0x600   : > { %v1651_v61 = vpop.xlane.xlu1 %1650 }
 0x601   : > { %v1673_v62 = vsub.f32 %v7263_v12, %v1651_v61 }
 0x603   : > { %v1681_v63 = vmul.f32 1.442695, %v1673_v62 }
 0x604   : > { %v1657_v0 = vpop.xlane.xlu1 %1656  ;;  %v1654_v9 = vpop.xlane.xlu0 %1653 }
 0x605   : > { %6714 = vpow2.f32 %v1681_v63  ;;  %v1675_v10 = vsub.f32 %v7265_v14, %v1657_v0  ;;  %v1674_v11 = vsub.f32 %v7269_v18, %v1654_v9 }
 0x607   : > { %v1683_v13 = vmul.f32 1.442695, %v1674_v11  ;;  %v1685_v15 = vmul.f32 1.442695, %v1675_v10 }
 0x608   : > { %v1663_v16 = vpop.xlane.xlu1 %1662  ;;  %v1660_v17 = vpop.xlane.xlu0 %1659 }
 0x609   : > { %v1677_v19 = vsub.f32 %v7277_v25, %v1663_v16  ;;  %v1676_v21 = vsub.f32 %v7271_v20, %v1660_v17  ;;  %6716 = vpow2.f32 %v1683_v13 }
 0x60a   : > { %6718 = vpow2.f32 %v1685_v15 }
 0x60b   : > { %v1689_v22 = vmul.f32 1.442695, %v1677_v19  ;;  %v1687_v12 = vmul.f32 1.442695, %v1676_v21 }
 0x60c   : > { %v7344_v23 = vpop.xlane.xlu1 %1668  ;;  %v7346_v24 = vpop.xlane.xlu0 %1665 }
 0x60d   : > { %6720 = vpow2.f32 %v1689_v22  ;;  %v1678_v21 = vsub.f32 %v7285_v32, %v7346_v24 }
 0x60e   : > { %6722 = vpow2.f32 %v1687_v12 }
 0x60f   : > { %v1691_v22 = vmul.f32 1.442695, %v1678_v21 }
 0x610   : > { %v7348_v14 = vpop.xlane.xlu1 %1359  ;;  %v1363_v18 = vpop.xlane.xlu0 %1362 }
 0x611   : > { %v1381_v26 = vsub.f32 %v7287_v33, %v1363_v18  ;;  %v1380_v18 = vsub.f32 %v7289_v34, %v7348_v14 }
 0x612   : > { %v7351_v28 = vpop.eup %6714 }
 0x613   : > { %v1391_v25 = vmul.f32 1.442695, %v1381_v26  ;;  %v1697_v20 = vsel %vm1060_vm4, %v7351_v28, 0.0 }
 0x614   : > { %v1375_v29 = vpop.xlane.xlu1 %1374  ;;  %1698 = vadd.xlane.f32.xlu0 %v1697_v20  ;;  %v1357_v30 = vpop.xlane.xlu0 %1356 }
 0x615   : > { %v1385_v31 = vsub.f32 %v7297_v39, %v1375_v29  ;;  %v1379_v35 = vsub.f32 %v7295_v38, %v1357_v30  ;;  %6724 = vpow2.f32 %v1391_v25  ;;  %v1389_v25 = vmul.f32 1.442695, %v1380_v18 }
 0x616   : > { %v7357_v36 = vpop.eup %6716 }
 0x617   : > { %v1387_v37 = vmul.f32 1.442695, %v1379_v35  ;;  %v1399_v40 = vmul.f32 1.442695, %v1385_v31  ;;  %v1700_v33 = vsel %vm1060_vm4, %v7357_v36, 0.0  ;;  %v7361_v46 = vpop.eup %6718 }
 0x618   : > { %v1369_v41 = vpop.xlane.xlu1 %1368  ;;  %v1366_v42 = vpop.xlane.xlu0 %1365  ;;  %1701 = vadd.xlane.f32.xlu0 %v1700_v33  ;;  %v1703_v52 = vsel %vm1060_vm4, %v7361_v46, 0.0 }
 0x619   : > { %v1383_v48 = vsub.f32 %v7305_v45, %v1369_v41  ;;  %6726 = vpow2.f32 %v1387_v37  ;;  %v1382_v12 = vsub.f32 %v7303_v43, %v1366_v42  ;;  %v1679_v43 = vsub.f32 %v7279_v27, %v7344_v23 }
 0x61a   : > { %v7364_v49 = vpop.eup %6720  ;;  %6728 = vpow2.f32 %v1399_v40 }
 0x61b   : > { %v1709_v38 = vsel %vm1060_vm4, %v7364_v49, 0.0  ;;  %v1395_v39 = vmul.f32 1.442695, %v1383_v48  ;;  %v7370_v57 = vpop.eup %6722  ;;  %v1393_v26 = vmul.f32 1.442695, %v1382_v12 }
 0x61c   : > { %1710 = vadd.xlane.f32.xlu1 %v1709_v38  ;;  %v1454_v51 = vpop.permute.xlu1 %1453  ;;  %v1378_v54 = vpop.xlane.xlu0 %1377  ;;  %1704 = vadd.xlane.f32.xlu0 %v1703_v52  ;;  %v1706_v59 = vsel %vm1060_vm4, %v7370_v57, 0.0  ;;  %v1693_v24 = vmul.f32 1.442695, %v1679_v43 }
 0x61d   : > { %6289 = vmatprep.subr.bf16.mxu0 %v1454_v51  ;;  %6730 = vpow2.f32 %v1395_v39  ;;  %v1386_v20 = vsub.f32 %v7311_v50, %v1378_v54 }
 0x61e   : > { %6290 = vmatpush3.bf16.msra.mxu0 %v1454_v51 }
 0x61f   : > { %v1401_v29 = vmul.f32 1.442695, %v1386_v20 }
 0x620   : > { %v1452_v45 = vpop.permute.xlu1 %1451  ;;  %v1372_v60 = vpop.xlane.xlu0 %1371  ;;  %1707 = vadd.xlane.f32.xlu0 %v1706_v59 }
 0x621   : > { %6291 = vmatprep.subr.bf16.mxu0 %v1452_v45  ;;  %v1384_v32 = vsub.f32 %v7317_v55, %v1372_v60 }
 0x622   : > { %6292 = vmatpush3.bf16.msra.mxu0 %v1452_v45  ;;  %v7374_v61 = vpop.eup %6724 }
 0x623   : > { %v1409_v62 = vsel %vm1060_vm4, %v7374_v61, 0.0  ;;  %v1397_v34 = vmul.f32 1.442695, %v1384_v32 }
 0x624   : > { %v1672_v63 = vpop.xlane.xlu0 %1671  ;;  %1410 = vadd.xlane.f32.xlu1 %v1409_v62  ;;  %v1448_v52 = vpop.permute.xlu1 %1447 }
 0x625   : > { %v1680_v0 = vsub.f32 %v7321_v58, %v1672_v63 }
 0x626   : > { %v7379_v9 = vpop.eup %6726 }
 0x627   : > { %v1695_v10 = vmul.f32 1.442695, %v1680_v0  ;;  %v1403_v11 = vsel %vm1060_vm4, %v7379_v9, 0.0  ;;  %v7383_v13 = vpop.eup %6728 }
 0x628   : > { %1404 = vadd.xlane.f32.xlu1 %v1403_v11  ;;  %v1421_v15 = vsel %vm1060_vm4, %v7383_v13, 0.0  ;;  %v1748_v63 = vpop.permute.xlu1 %1747 }
 0x629   : > { %6732 = vpow2.f32 %v1695_v10 }
 0x62a   : > { %v7387_v16 = vpop.eup %6730  ;;  %6734 = vpow2.f32 %v1691_v22 }
 0x62b   : > { %v1415_v17 = vsel %vm1060_vm4, %v7387_v16, 0.0  ;;  %6736 = vpow2.f32 %v1393_v26 }
 0x62c   : > { %1422 = vadd.xlane.f32.xlu1 %v1421_v15  ;;  %6738 = vpow2.f32 %v1389_v25 }
 0x62d   : > { %6740 = vpow2.f32 %v1401_v29 }
 0x62e   : > { %6742 = vpow2.f32 %v1397_v34 }
 0x62f   : > { %6744 = vpow2.f32 %v1693_v24 }
 0x630   : > { %1416 = vadd.xlane.f32.xlu1 %v1415_v17  ;;  %v1746_v17 = vpop.permute.xlu1 %1745 }
 0x636   : > { %v7391_v58 = vpop.eup %6732  ;;  %1449 = vrot.lane.b32.xlu0 %v7103_v44, %s6892_s5 }
 0x637   : > { %v1718_v19 = vsel %vm1060_vm4, %v7391_v58, 0.0  ;;  %v7412_v50 = vpop.eup %6734 }
 0x638   : > { %1719 = vadd.xlane.f32.xlu1 %v1718_v19  ;;  %v1712_v14 = vsel %vm1060_vm4, %v7412_v50, 0.0  ;;  %v7417_v55 = vpop.eup %6736 }
 0x639   : > { %v1412_v27 = vsel %vm1060_vm4, %v7417_v55, 0.0  ;;  %v7422_v23 = vpop.eup %6738 }
 0x63a   : > { %v1406_v30 = vsel %vm1060_vm4, %v7422_v23, 0.0  ;;  %v7426_v31 = vpop.eup %6740 }
 0x63b   : > { %v1424_v35 = vsel %vm1060_vm4, %v7426_v31, 0.0  ;;  %v7430_v37 = vpop.eup %6742 }
 0x63c   : > { %v1418_v40 = vsel %vm1060_vm4, %v7430_v37, 0.0  ;;  %v7434_v41 = vpop.eup %6744 }
 0x63d   : > { %v1715_v33 = vsel %vm1060_vm4, %v7434_v41, 0.0 }
 0x649   : > { %1844 = vrot.lane.b32.xlu1 %v7111_v53, %s6894_s30 }
 0x64d   : > { %1842 = vrot.lane.b32.xlu1 %v7116_v56, %s6894_s30 }
 0x651   : > { %1838 = vrot.lane.b32.xlu1 %v7105_v47, %s6894_s30 }
 0x655   : > { %1832 = vrot.lane.b32.xlu1 %v7103_v44, %s6895_s25  ;;  %1713 = vadd.xlane.f32.xlu0 %v1712_v14 }
 0x659   : > { %1836 = vrot.lane.b32.xlu1 %v7111_v53, %s6895_s25  ;;  %1413 = vadd.xlane.f32.xlu0 %v1412_v27 }
 0x65d   : > { %1407 = vadd.xlane.f32.xlu0 %v1406_v30 }
 0x661   : > { %1425 = vadd.xlane.f32.xlu0 %v1424_v35 }
 0x665   : > { %1419 = vadd.xlane.f32.xlu0 %v1418_v40 }
 0x669   : > { %1716 = vadd.xlane.f32.xlu0 %v1715_v33 }
 0x67f   : > { %1741 = vrot.lane.b32.xlu0 %v7105_v47, %s6893_s23 }
 0x683   : > { %1840 = vrot.lane.b32.xlu0 %v7103_v44, %s6894_s30 }
 0x687   : > { %1830 = vrot.lane.b32.xlu0 %v7105_v47, %s6895_s25 }
 0x68b   : > { %1834 = vrot.lane.b32.xlu0 %v7116_v56, %s6895_s25 }
 0x69d   : > { %v1699_v42 = vpop.xlane.xlu0 %1698 }
 0x69e   : > { %6746 = vrcp.f32 %v1699_v42 }
 0x6a1   : > { %v1702_v48 = vpop.xlane.xlu0 %1701 }
 0x6a2   : > { %6748 = vrcp.f32 %v1702_v48 }
 0x6a5   : > { %v1705_v38 = vpop.xlane.xlu0 %1704 }
 0x6a6   : > { %6750 = vrcp.f32 %v1705_v38 }
 0x6a9   : > { %v1708_v39 = vpop.xlane.xlu0 %1707 }
 0x6aa   : > { %6752 = vrcp.f32 %v1708_v39 }
 0x6ab   : > { %v6747_v51 = vpop.eup %6746 }
 0x6ac   : > { %v7445_v59 = vmul.f32 %v6747_v51, %v7351_v28 }
 0x6ad   : > { %v1450_v54 = vpop.permute.xlu0 %1449 }
 0x6ae   : > { %6293 = vmatprep.subr.bf16.mxu0 %v1450_v54 }
 0x6af   : > { %v6749_v45 = vpop.eup %6748  ;;  %6294 = vmatpush3.bf16.msra.mxu0 %v1450_v54 }
 0x6b0   : > { %6295 = vmatprep.subr.bf16.mxu0 %v1448_v52  ;;  %v7448_v60 = vmul.f32 %v6749_v45, %v7357_v36  ;;  %v1744_v36 = vpop.permute.xlu1 %1743 }
 0x6b2   : > { %v1737_v62 = vpack.c.bf16 %v7448_v60, %v7445_v59 }
 0x6b3   : > { %6296 = vmatpush3.bf16.msra.mxu0 %v1448_v52  ;;  %v6751_v0 = vpop.eup %6750 }
 0x6b4   : > { %6321 = vmatprep.subr.bf16.mxu0 %v1748_v63  ;;  %v7453_v11 = vmul.f32 %v6751_v0, %v7361_v46  ;;  %v1711_v19 = vpop.xlane.xlu1 %1710 }
 0x6b7   : > { %v6753_v10 = vpop.eup %6752 }
 0x6b8   : > { %v7456_v15 = vmul.f32 %v6753_v10, %v7370_v57  ;;  %v1411_v21 = vpop.xlane.xlu1 %1410 }
 0x6ba   : > { %v1738_v28 = vpack.c.bf16 %v7456_v15, %v7453_v11 }
 0x6bc   : > { %v1405_v22 = vpop.xlane.xlu1 %1404 }
 0x6c0   : > { %v1423_v26 = vpop.xlane.xlu1 %1422 }
 0x6c4   : > { %v1417_v46 = vpop.xlane.xlu1 %1416 }
 0x6c8   : > { %v1720_v39 = vpop.xlane.xlu1 %1719 }
 0x6de   : > { %v1714_v12 = vpop.xlane.xlu0 %1713 }
 0x6e2   : > { %v1414_v18 = vpop.xlane.xlu0 %1413 }
 0x6e3   : > { %6754 = vrcp.f32 %v1414_v18 }
 0x6e4   : > { %6756 = vrcp.f32 %v1405_v22 }
 0x6e5   : > { %6758 = vrcp.f32 %v1411_v21 }
 0x6e6   : > { %v1408_v25 = vpop.xlane.xlu0 %1407 }
 0x6e7   : > { %6760 = vrcp.f32 %v1408_v25 }
 0x6ea   : > { %v1426_v20 = vpop.xlane.xlu0 %1425 }
 0x6eb   : > { %6762 = vrcp.f32 %v1426_v20 }
 0x6ec   : > { %6764 = vrcp.f32 %v1417_v46 }
 0x6ed   : > { %6766 = vrcp.f32 %v1423_v26 }
 0x6ee   : > { %v1420_v57 = vpop.xlane.xlu0 %1419 }
 0x6ef   : > { %6768 = vrcp.f32 %v1420_v57 }
 0x6f0   : > { %v6755_v29 = vpop.eup %6754  ;;  %6770 = vrcp.f32 %v1714_v12 }
 0x6f1   : > { %v6757_v32 = vpop.eup %6756  ;;  %v1438_v24 = vmul.f32 %v6755_v29, %v7417_v55  ;;  %6772 = vrcp.f32 %v1711_v19 }
 0x6f2   : > { %v6759_v43 = vpop.eup %6758  ;;  %v1435_v14 = vmul.f32 %v6757_v32, %v7379_v9  ;;  %v1717_v42 = vpop.xlane.xlu0 %1716 }
 0x6f3   : > { %v1437_v30 = vmul.f32 %v6759_v43, %v7374_v61  ;;  %6774 = vrcp.f32 %v1717_v42 }
 0x6f4   : > { %v6761_v34 = vpop.eup %6760  ;;  %6776 = vrcp.f32 %v1720_v39 }
 0x6f5   : > { %v1436_v27 = vmul.f32 %v6761_v34, %v7422_v23  ;;  %v1444_v40 = vpack.c.bf16 %v1438_v24, %v1437_v30 }
 0x6f7   : > { %v1443_v35 = vpack.c.bf16 %v1436_v27, %v1435_v14 }
 0x6f8   : > { %v6763_v33 = vpop.eup %6762 }
 0x6f9   : > { %6297 = vmatprep.mubr.msk.bf16.mxu0 %vm1060_vm4, %v1443_v35  ;;  %v6765_v48 = vpop.eup %6764  ;;  %v1442_v9 = vmul.f32 %v6763_v33, %v7426_v31  ;;  %v1845_v31 = vpop.permute.xlu1 %1844 }
 0x6fa   : > { %6298 = vmatmul.mubr.msk.bf16.vlgmr.msra.gmra.mxu0 %vm1060_vm4, %v1444_v40  ;;  %v6767_v38 = vpop.eup %6766  ;;  %v1439_v61 = vmul.f32 %v6765_v48, %v7387_v16 }
 0x6fb   : > { %6322 = vmatpush3.bf16.msra.mxu0 %v1748_v63  ;;  %v1441_v51 = vmul.f32 %v6767_v38, %v7383_v13  ;;  %v1742_v63 = vpop.permute.xlu0 %1741 }
 0x6fc   : > { %v6769_v55 = vpop.eup %6768  ;;  %6323 = vmatprep.subr.bf16.mxu0 %v1746_v17 }
 0x6fd   : > { %v1440_v23 = vmul.f32 %v6769_v55, %v7430_v37  ;;  %v1446_v54 = vpack.c.bf16 %v1442_v9, %v1441_v51  ;;  %v6771_v45 = vpop.eup %6770  ;;  %v1843_v60 = vpop.permute.xlu1 %1842 }
 0x6fe   : > { %v6773_v16 = vpop.eup %6772  ;;  %v1734_v13 = vmul.f32 %v6771_v45, %v7412_v50  ;;  %v1865_v19 = vsel %vm962_vm3, %v1843_v60, 0 }
 0x6ff   : > { %6324 = vmatpush3.bf16.msra.mxu0 %v1746_v17  ;;  %v1445_v52 = vpack.c.bf16 %v1440_v23, %v1439_v61  ;;  %v1733_v37 = vmul.f32 %v6773_v16, %v7364_v49  ;;  %v1868_v17 = vsel %vm962_vm3, %v1845_v31, 0  ;;  %v1841_v50 = vpop.permute.xlu0 %1840 }
 0x700   : > { %6325 = vmatprep.subr.bf16.mxu0 %v1744_v36  ;;  %v6775_v0 = vpop.eup %6774  ;;  %v1862_v11 = vsel %vm962_vm3, %v1841_v50, 0 }
 0x701   : > { %6301 = vmatprep.mubr.msk.bf16.mxu0 %vm1060_vm4, %v1445_v52  ;;  %v1739_v10 = vpack.c.bf16 %v1734_v13, %v1733_v37  ;;  %v6777_v59 = vpop.eup %6776  ;;  %v1735_v49 = vmul.f32 %v6775_v0, %v7434_v41  ;;  %v1839_v15 = vpop.permute.xlu1 %1838 }
 0x702   : > { %6302 = vmatmul.mubr.msk.bf16.gmra.mxu0 %vm1060_vm4, %v1446_v54  ;;  %v1859_v41 = vsel %vm962_vm3, %v1839_v15, 0 }
 0x703   : > { %6326 = vmatpush3.bf16.msra.mxu0 %v1744_v36  ;;  %6329 = vmatprep.mubr.msk.bf16.mxu0 %vm1060_vm4, %v1737_v62  ;;  %v1736_v62 = vmul.f32 %v6777_v59, %v7391_v58  ;;  %v1831_v21 = vpop.permute.xlu0 %1830 }
 0x704   : > { %6327 = vmatprep.subr.bf16.mxu0 %v1742_v63 }
 0x705   : > { %v1740_v36 = vpack.c.bf16 %v1736_v62, %v1735_v49  ;;  %v1833_v58 = vpop.permute.xlu1 %1832 }
 0x707   : > { %6328 = vmatpush3.bf16.msra.mxu0 %v1742_v63 }
 0x708   : > { %6543 = vmatprep.subr.msk.bf16.mxu0 %vm962_vm3, %v1845_v31 }
 0x709   : > { %v1837_v22 = vpop.permute.xlu1 %1836 }
 0x70a   : > { %6330 = vmatmul.mubr.msk.bf16.vlgmr.msra.gmra.mxu0 %vm1060_vm4, %v1738_v28  ;;  %v1835_v28 = vpop.permute.xlu0 %1834 }
 0x70b   : > { %6338 = vmatpush3.bf16.xpose.msra.mxu0 %v1868_v17  ;;  %6333 = vmatprep.mubr.msk.bf16.mxu0 %vm1060_vm4, %v1739_v10 }
 0x70c   : > { %6544 = vmatprep.subr.msk.bf16.mxu0 %vm962_vm3, %v1843_v60 }
 0x712   : > { %6334 = vmatmul.mubr.msk.bf16.gmra.mxu0 %vm1060_vm4, %v1740_v36 }
 0x713   : > { %6340 = vmatpush3.bf16.xpose.msra.mxu0 %v1865_v19  ;;  %6345 = vmatprep.mubr.msk.bf16.mxu0 %vm962_vm3, %v1831_v21 }
 0x714   : > { %6545 = vmatprep.subr.msk.bf16.mxu0 %vm962_vm3, %v1841_v50 }
 0x71b   : > { %6342 = vmatpush3.bf16.xpose.msra.mxu0 %v1862_v11 }
 0x71c   : > { %6546 = vmatprep.subr.msk.bf16.mxu0 %vm962_vm3, %v1839_v15 }
 0x723   : > { %6344 = vmatpush3.bf16.xpose.msra.mxu0 %v1859_v41 }
 0x72a   : > { %6346 = vmatmul.mubr.msk.bf16.vlgmr.msra.gmra.mxu0 %vm962_vm3, %v1833_v58 }
 0x72b   : > { %6349 = vmatprep.mubr.msk.bf16.mxu0 %vm962_vm3, %v1835_v28 }
 0x732   : > { %6350 = vmatmul.mubr.msk.bf16.gmra.mxu0 %vm962_vm3, %v1837_v22 }
 0x7ba   : > { %v7498_v12 = vpop.f32.mrf.mxu0 }
 0x7bc   : > { %v7500_v18 = vpop.f32.mrf.mxu0 }
 0x7be   : > { %v7502_v26 = vpop.f32.mrf.mxu0 }
 0x7bf   : > { %v6613_v25 = vpack.i.bf16 %v7502_v26, %v7498_v12 }
 0x7c0   : > { %v7506_v46 = vpop.f32.mrf.mxu0 }
 0x7c1   : > { %v6608_v20 = vpack.i.bf16 %v7506_v46, %v7500_v18 }
 0x7c2   : > { %v7510_v57 = vpop.f32.mrf.mxu0 }
 0x7c4   : > { %v7512_v29 = vpop.f32.mrf.mxu0 }
 0x7c6   : > { %v7514_v32 = vpop.f32.mrf.mxu0 }
 0x7c7   : > { %v6633_v43 = vpack.i.bf16 %v7514_v32, %v7510_v57 }
 0x7c8   : > { %v7518_v34 = vpop.f32.mrf.mxu0 }
 0x7c9   : > { %v6628_v24 = vpack.i.bf16 %v7518_v34, %v7512_v29 }
 0x7ca   : > { %v7522_v14 = vpop.f32.mrf.mxu0 }
 0x7cc   : > { %v7524_v27 = vpop.f32.mrf.mxu0 }
 0x7ce   : > { %v7526_v30 = vpop.f32.mrf.mxu0 }
 0x7cf   : > { %v6623_v35 = vpack.i.bf16 %v7526_v30, %v7522_v14 }
 0x7d0   : > { %v7530_v40 = vpop.f32.mrf.mxu0 }
 0x7d1   : > { %v6618_v33 = vpack.i.bf16 %v7530_v40, %v7524_v27 }
 0x7d2   : > { %v7534_v42 = vpop.f32.mrf.mxu0 }
 0x7d4   : > { %v7536_v48 = vpop.f32.mrf.mxu0 }
 0x7d6   : > { %v7538_v38 = vpop.f32.mrf.mxu0 }
 0x7d7   : > { %v6653_v39 = vpack.i.bf16 %v7538_v38, %v7534_v42 }
 0x7d8   : > { %v7542_v55 = vpop.f32.mrf.mxu0 }
 0x7d9   : > { %v6648_v9 = vpack.i.bf16 %v7542_v55, %v7536_v48 }
 0x7ea   : > { %v6347_v61 = vpop.f32.mrf.mxu0 }
 0x7eb   : > { %v1937_v54 = vmul.f32 0.35355338, %v6347_v61 }
 0x7ec   : > { %v1904_v23 = vpop.f32.mrf.mxu0 }
 0x7ed   : > { %v1935_v51 = vmul.f32 0.35355338, %v1904_v23  ;;  %v1949_v37 = vsel %vm1060_vm4, %v1937_v54, -inf }
 0x7ee   : > { %v6348_v52 = vpop.f32.mrf.mxu0 }
 0x7ef   : > { %v1943_v45 = vsel %vm1060_vm4, %v1935_v51, -inf  ;;  %v1938_v13 = vmul.f32 0.35355338, %v6348_v52 }
 0x7f0   : > { %1944 = vmax.xlane.f32.xlu0 %v1943_v45  ;;  %v1907_v63 = vpop.f32.mrf.mxu0 }
 0x7f1   : > { %v1936_v16 = vmul.f32 0.35355338, %v1907_v63  ;;  %v1952_v50 = vsel %vm1060_vm4, %v1938_v13, -inf }
 0x7f2   : > { %v6351_v31 = vpop.f32.mrf.mxu0 }
 0x7f3   : > { %v1946_v0 = vsel %vm1060_vm4, %v1936_v16, -inf  ;;  %v1941_v60 = vmul.f32 0.35355338, %v6351_v31 }
 0x7f4   : > { %1950 = vmax.xlane.f32.xlu0 %v1949_v37  ;;  %1947 = vmax.xlane.f32.xlu1 %v1946_v0  ;;  %v1920_v10 = vpop.f32.mrf.mxu0 }
 0x7f5   : > { %v1939_v17 = vmul.f32 0.35355338, %v1920_v10  ;;  %v1961_v21 = vsel %vm1060_vm4, %v1941_v60, -inf }
 0x7f6   : > { %v6352_v59 = vpop.f32.mrf.mxu0 }
 0x7f7   : > { %v1955_v49 = vsel %vm1060_vm4, %v1939_v17, -inf  ;;  %v1942_v19 = vmul.f32 0.35355338, %v6352_v59 }
 0x7f8   : > { %1953 = vmax.xlane.f32.xlu0 %v1952_v50  ;;  %1956 = vmax.xlane.f32.xlu1 %v1955_v49  ;;  %v1923_v62 = vpop.f32.mrf.mxu0 }
 0x7f9   : > { %v1940_v36 = vmul.f32 0.35355338, %v1923_v62  ;;  %v1964_v15 = vsel %vm1060_vm4, %v1942_v19, -inf }
 0x7fb   : > { %v1958_v11 = vsel %vm1060_vm4, %v1940_v36, -inf }
 0x7fc   : > { %1962 = vmax.xlane.f32.xlu1 %v1961_v21  ;;  %1959 = vmax.xlane.f32.xlu0 %v1958_v11 }
 0x800   : > { %1965 = vmax.xlane.f32.xlu0 %v1964_v15 }
 0x80d   : > { %2041 = vrot.lane.b32.xlu1 %v7111_v53, %s6896_s15 }
 0x879   : > { %v1945_v41 = vpop.xlane.xlu0 %1944 }
 0x87a   : > { %v1967_v58 = vsub.f32 %v1935_v51, %v1945_v41 }
 0x87c   : > { %v1975_v52 = vmul.f32 1.442695, %v1967_v58 }
 0x87d   : > { %v1948_v28 = vpop.xlane.xlu1 %1947  ;;  %v1951_v22 = vpop.xlane.xlu0 %1950 }
 0x87e   : > { %v1969_v61 = vsub.f32 %v1937_v54, %v1951_v22  ;;  %v1968_v45 = vsub.f32 %v1936_v16, %v1948_v28 }
 0x880   : > { %v1979_v23 = vmul.f32 1.442695, %v1969_v61  ;;  %v1977_v10 = vmul.f32 1.442695, %v1968_v45 }
 0x881   : > { %v1957_v63 = vpop.xlane.xlu1 %1956  ;;  %v1954_v31 = vpop.xlane.xlu0 %1953 }
 0x882   : > { %v1970_v37 = vsub.f32 %v1938_v13, %v1954_v31  ;;  %6778 = vpow2.f32 %v1979_v23  ;;  %v1971_v59 = vsub.f32 %v1939_v17, %v1957_v63 }
 0x883   : > { %6780 = vpow2.f32 %v1975_v52 }
 0x884   : > { %v1981_v0 = vmul.f32 1.442695, %v1970_v37  ;;  %v1983_v51 = vmul.f32 1.442695, %v1971_v59 }
 0x885   : > { %v1963_v50 = vpop.xlane.xlu1 %1962  ;;  %v1960_v49 = vpop.xlane.xlu0 %1959 }
 0x886   : > { %v1973_v62 = vsub.f32 %v1941_v60, %v1963_v50  ;;  %6782 = vpow2.f32 %v1981_v0  ;;  %v1972_v21 = vsub.f32 %v1940_v36, %v1960_v49 }
 0x887   : > { %6784 = vpow2.f32 %v1977_v10 }
 0x888   : > { %v1987_v53 = vmul.f32 1.442695, %v1973_v62  ;;  %v1985_v15 = vmul.f32 1.442695, %v1972_v21 }
 0x889   : > { %v2042_v54 = vpop.permute.xlu1 %2041  ;;  %v1966_v11 = vpop.xlane.xlu0 %1965 }
 0x88a   : > { %6786 = vpow2.f32 %v1987_v53  ;;  %v1974_v16 = vsub.f32 %v1942_v19, %v1966_v11  ;;  %6353 = vmatprep.subr.bf16.mxu1 %v2042_v54 }
 0x88b   : > { %6354 = vmatpush3.bf16.msra.mxu1 %v2042_v54  ;;  %6788 = vpow2.f32 %v1983_v51 }
 0x88c   : > { %v1989_v13 = vmul.f32 1.442695, %v1974_v16  ;;  %v6670_v16 = vld [vmem:[%s8611_s1 + $0x8] sm:$0xff]  }
 0x88e   : > { %6790 = vpow2.f32 %v1989_v13  ;;  %v6671_v13 = vld [vmem:[%s8611_s1] sm:$0xff]  }
 0x88f   : > { %v7556_v41 = vpop.eup %6778  ;;  %6792 = vpow2.f32 %v1985_v15 }
 0x890   : > { %v1997_v17 = vsel %vm1060_vm4, %v7556_v41, 0.0  ;;  %v6781_v60 = vpop.eup %6780 }
 0x891   : > { %1998 = vadd.xlane.f32.xlu1 %v1997_v17  ;;  %v1991_v36 = vsel %vm1060_vm4, %v6781_v60, 0.0 }
 0x893   : > { %v6783_v58 = vpop.eup %6782 }
 0x894   : > { %v2000_v28 = vsel %vm1060_vm4, %v6783_v58, 0.0  ;;  %v6785_v19 = vpop.eup %6784 }
 0x895   : > { %1992 = vadd.xlane.f32.xlu1 %v1991_v36  ;;  %2001 = vadd.xlane.f32.xlu0 %v2000_v28  ;;  %v1994_v23 = vsel %vm1060_vm4, %v6785_v19, 0.0 }
 0x897   : > { %v7562_v22 = vpop.eup %6786 }
 0x898   : > { %v2009_v61 = vsel %vm1060_vm4, %v7562_v22, 0.0  ;;  %v6789_v52 = vpop.eup %6788 }
 0x899   : > { %2010 = vadd.xlane.f32.xlu1 %v2009_v61  ;;  %1995 = vadd.xlane.f32.xlu0 %v1994_v23  ;;  %v2003_v31 = vsel %vm1060_vm4, %v6789_v52, 0.0 }
 0x89b   : > { %v7567_v45 = vpop.eup %6790 }
 0x89c   : > { %v2012_v63 = vsel %vm1060_vm4, %v7567_v45, 0.0  ;;  %v6793_v37 = vpop.eup %6792 }
 0x89d   : > { %2004 = vadd.xlane.f32.xlu1 %v2003_v31  ;;  %2013 = vadd.xlane.f32.xlu0 %v2012_v63  ;;  %v2006_v0 = vsel %vm1060_vm4, %v6793_v37, 0.0 }
 0x8a1   : > { %2007 = vadd.xlane.f32.xlu0 %v2006_v0 }
 0x8ae   : > { %2037 = vrot.lane.b32.xlu1 %v7103_v44, %s6896_s15 }
 0x8b2   : > { %2035 = vrot.lane.b32.xlu1 %v7105_v47, %s6896_s15 }
 0x8b6   : > { %6614 = vrot.lane.b32.xlu1 %v6613_v25, %s6897_s24 }
 0x8b7   : > { %2039 = vrot.lane.b32.xlu0 %v7116_v56, %s6896_s15 }
 0x8ba   : > { %6624 = vrot.lane.b32.xlu1 %v6623_v35, %s6898_s19 }
 0x8bb   : > { %6609 = vrot.lane.b32.xlu0 %v6608_v20, %s6897_s24 }
 0x8be   : > { %6634 = vrot.lane.b32.xlu1 %v6633_v43, %s6897_s24 }
 0x8bf   : > { %6619 = vrot.lane.b32.xlu0 %v6618_v33, %s6898_s19 }
 0x8c3   : > { %6629 = vrot.lane.b32.xlu0 %v6628_v24, %s6897_s24 }
 0x91a   : > { %v1999_v44 = vpop.xlane.xlu1 %1998 }
 0x91e   : > { %v1993_v47 = vpop.xlane.xlu1 %1992  ;;  %v2002_v56 = vpop.xlane.xlu0 %2001 }
 0x91f   : > { %6794 = vrcp.f32 %v1993_v47 }
 0x922   : > { %v2011_v12 = vpop.xlane.xlu1 %2010  ;;  %v1996_v18 = vpop.xlane.xlu0 %1995 }
 0x923   : > { %6796 = vrcp.f32 %v1996_v18 }
 0x924   : > { %6798 = vrcp.f32 %v2002_v56 }
 0x925   : > { %6800 = vrcp.f32 %v1999_v44 }
 0x926   : > { %v2014_v26 = vpop.xlane.xlu0 %2013  ;;  %v2005_v25 = vpop.xlane.xlu1 %2004 }
 0x927   : > { %6802 = vrcp.f32 %v2005_v25 }
 0x92a   : > { %v2008_v46 = vpop.xlane.xlu0 %2007  ;;  %v2038_v20 = vpop.permute.xlu1 %2037 }
 0x92b   : > { %6804 = vrcp.f32 %v2008_v46 }
 0x92c   : > { %6806 = vrcp.f32 %v2014_v26  ;;  %v6795_v32 = vpop.eup %6794 }
 0x92d   : > { %6808 = vrcp.f32 %v2011_v12  ;;  %v2023_v34 = vmul.f32 %v6795_v32, %v6781_v60 }
 0x92e   : > { %v2040_v57 = vpop.permute.xlu0 %2039  ;;  %v2036_v27 = vpop.permute.xlu1 %2035 }
 0x92f   : > { %6355 = vmatprep.subr.bf16.mxu1 %v2040_v57 }
 0x930   : > { %6356 = vmatpush3.bf16.msra.mxu1 %v2040_v57  ;;  %v6797_v29 = vpop.eup %6796 }
 0x931   : > { %6357 = vmatprep.subr.bf16.mxu1 %v2038_v20  ;;  %v6799_v43 = vpop.eup %6798  ;;  %v2024_v24 = vmul.f32 %v6797_v29, %v6785_v19 }
 0x932   : > { %v6801_v14 = vpop.eup %6800  ;;  %v2026_v35 = vmul.f32 %v6799_v43, %v6783_v58  ;;  %v6615_v63 = vpop.permute.xlu1 %6614 }
 0x933   : > { %v2031_v30 = vpack.c.bf16 %v2024_v24, %v2023_v34  ;;  %v2025_v33 = vmul.f32 %v6801_v14, %v7556_v41  ;;  %v6610_v31 = vpop.permute.xlu0 %6609  ;;  %v6617_v42 = vunpack.i.h.bf16 %v6615_v63  ;;  %v6616_v38 = vunpack.i.l.bf16 %v6615_v63  ;;  %v6673_v63 = vld [vmem:[%s7048_s18] sm:$0xff]  }
 0x934   : > { %6358 = vmatpush3.bf16.msra.mxu1 %v2038_v20  ;;  %v6803_v40 = vpop.eup %6802  ;;  %v6611_v47 = vunpack.i.l.bf16 %v6610_v31 }
 0x935   : > { %6359 = vmatprep.subr.bf16.mxu1 %v2036_v27  ;;  %6361 = vmatprep.mubr.msk.bf16.mxu1 %vm1060_vm4, %v2031_v30  ;;  %v2032_v59 = vpack.c.bf16 %v2026_v35, %v2025_v33  ;;  %v2027_v49 = vmul.f32 %v6803_v40, %v6789_v52  ;;  %v2223_v46 = vsel %vm962_vm3, %v7251_v3, %v6617_v42  ;;  %v6678_v42 = vld [vmem:[%s7062_s2 + $0x18] sm:$0xff]  }
 0x936   : > { %v2222_v20 = vsel %vm962_vm3, %v7247_v1, %v6616_v38  ;;  %v2220_v32 = vsel %vm962_vm3, %v7249_v2, %v6611_v47 }
 0x937   : > { %v6620_v0 = vpop.permute.xlu0 %6619 }
 0x938   : > { %v6805_v10 = vpop.eup %6804  ;;  %6360 = vmatpush3.bf16.msra.mxu1 %v2036_v27  ;;  %v6622_v48 = vunpack.i.h.bf16 %v6620_v0  ;;  %v6621_v55 = vunpack.i.l.bf16 %v6620_v0  ;;  %v6676_v0 = vld [vmem:[%s7062_s2 + $0x28] sm:$0xff]  }
 0x939   : > { %v6807_v50 = vpop.eup %6806  ;;  %v2028_v62 = vmul.f32 %v6805_v10, %v6793_v37  ;;  %6369 = vmatprep.subr.bf16.mxu1 %v6670_v16  ;;  %v6625_v37 = vpop.permute.xlu1 %6624 }
 0x93a   : > { %v6809_v53 = vpop.eup %6808  ;;  %v2030_v21 = vmul.f32 %v6807_v50, %v7567_v45  ;;  %v6627_v12 = vunpack.i.h.bf16 %v6625_v37  ;;  %v6626_v18 = vunpack.i.l.bf16 %v6625_v37  ;;  %v2229_v27 = vsel %vm2228_vm5, %v2220_v32, %v6621_v55  ;;  %v6675_v37 = vld [vmem:[%s7062_s2 + $0x30] sm:$0xff]  }
 0x93b   : > { %6362 = vmatmul.mubr.msk.bf16.vlgmr.msra.gmra.mxu1 %vm1060_vm4, %v2032_v59  ;;  %v2033_v51 = vpack.c.bf16 %v2028_v62, %v2027_v49  ;;  %v2029_v54 = vmul.f32 %v6809_v53, %v7562_v22  ;;  %v6672_v22 = vld [vmem:[%s7048_s18 + $0x8] sm:$0xff]   ;;  %v6630_v56 = vpop.permute.xlu0 %6629 }
 0x93c   : > { %6370 = vmatpush3.bf16.msra.mxu1 %v6670_v16  ;;  %6381 = vmatprep.subr.bf16.mxu0 %v6672_v22  ;;  %v2231_v43 = vsel %vm2228_vm5, %v2222_v20, %v6626_v18  ;;  %v2232_v34 = vsel %vm2228_vm5, %v2223_v46, %v6627_v12  ;;  %v6632_v10 = vunpack.i.h.bf16 %v6630_v56  ;;  %v6631_v59 = vunpack.i.l.bf16 %v6630_v56  ;;  %v5823_v56 = vld [vmem:[%s8612_s17] ss:$0 sm:$0xff] }
 0x93d   : > { %6365 = vmatprep.mubr.msk.bf16.mxu1 %vm1060_vm4, %v2033_v51  ;;  %v2034_v11 = vpack.c.bf16 %v2030_v21, %v2029_v54  ;;  %6371 = vmatprep.subr.bf16.mxu1 %v6671_v13  ;;  %v6635_v44 = vpop.permute.xlu1 %6634 }
 0x93e   : > { %6382 = vmatpush3.bf16.msra.mxu0 %v6672_v22  ;;  %v6636_v33 = vunpack.i.l.bf16 %v6635_v44 }
 0x93f   : > { %6383 = vmatprep.subr.bf16.mxu0 %v6673_v63 }
 0x940   : > { %6372 = vmatpush3.bf16.msra.mxu1 %v6671_v13 }
 0x942   : > { %6384 = vmatpush3.bf16.msra.mxu0 %v6673_v63 }
 0x943   : > { %6366 = vmatmul.mubr.msk.bf16.gmra.mxu1 %vm1060_vm4, %v2034_v11 }
 0x9fb   : > { %v6363_v15 = vpop.f32.mrf.mxu1 }
 0x9fd   : > { %v2093_v41 = vpop.f32.mrf.mxu1 }
 0x9ff   : > { %v6364_v17 = vpop.f32.mrf.mxu1 }
 0xa00   : > { %v6638_v60 = vpack.i.bf16 %v6364_v17, %v6363_v15  ;;  %v2225_v17 = vsel %vm962_vm3, %v7261_v8, %v6632_v10 }
 0xa01   : > { %v2096_v58 = vpop.f32.mrf.mxu1 }
 0xa02   : > { %v6643_v36 = vpack.i.bf16 %v2096_v58, %v2093_v41  ;;  %6639 = vrot.lane.b32.xlu1 %v6638_v60, %s6899_s22  ;;  %v2226_v41 = vsel %vm962_vm3, %v7255_v5, %v6636_v33  ;;  %v2224_v60 = vsel %vm962_vm3, %v7257_v6, %v6631_v59 }
 0xa03   : > { %v6367_v28 = vpop.f32.mrf.mxu1 }
 0xa04   : > { %6644 = vrot.lane.b32.xlu0 %v6643_v36, %s6899_s22 }
 0xa05   : > { %v2109_v19 = vpop.f32.mrf.mxu1 }
 0xa06   : > { %6654 = vrot.lane.b32.xlu1 %v6653_v39, %s6898_s19  ;;  %v6612_v39 = vunpack.i.h.bf16 %v6610_v31  ;;  %v6674_v31 = vld [vmem:[%s7062_s2 + $0x38] sm:$0xff]  }
 0xa07   : > { %v6368_v61 = vpop.f32.mrf.mxu1  ;;  %6393 = vmatprep.subr.bf16.mxu1 %v6674_v31 }
 0xa08   : > { %v6663_v23 = vpack.i.bf16 %v6368_v61, %v6367_v28  ;;  %6649 = vrot.lane.b32.xlu0 %v6648_v9, %s6898_s19  ;;  %v2221_v57 = vsel %vm962_vm3, %v7253_v4, %v6612_v39  ;;  %v6637_v4 = vunpack.i.h.bf16 %v6635_v44  ;;  %v6677_v44 = vld [vmem:[%s7062_s2 + $0x20] sm:$0xff]  }
 0xa09   : > { %v2112_v52 = vpop.f32.mrf.mxu1  ;;  %v2230_v3 = vsel %vm2228_vm5, %v2221_v57, %v6622_v48 }
 0xa0a   : > { %v6658_v45 = vpack.i.bf16 %v2112_v52, %v2109_v19  ;;  %6664 = vrot.lane.b32.xlu1 %v6663_v23, %s6899_s22  ;;  %v2227_v15 = vsel %vm962_vm3, %v7259_v7, %v6637_v4 }
 0xa0c   : > { %6659 = vrot.lane.b32.xlu0 %v6658_v45, %s6899_s22 }
 0xa74   : > { %v6640_v9 = vpop.permute.xlu1 %6639 }
 0xa75   : > { %v6642_v26 = vunpack.i.h.bf16 %v6640_v9  ;;  %v6641_v25 = vunpack.i.l.bf16 %v6640_v9 }
 0xa76   : > { %v6645_v29 = vpop.permute.xlu0 %6644 }
 0xa77   : > { %v6647_v24 = vunpack.i.h.bf16 %v6645_v29  ;;  %v6646_v14 = vunpack.i.l.bf16 %v6645_v29  ;;  %v2241_v30 = vsel %vm2237_vm6, %v2232_v34, %v6642_v26  ;;  %v2240_v1 = vsel %vm2237_vm6, %v2231_v43, %v6641_v25 }
 0xa78   : > { %v6655_v35 = vpop.permute.xlu1 %6654  ;;  %v2247_v62 = vpack.c.bf16 %v2241_v30, %v2240_v1  ;;  %v6680_v30 = vld [vmem:[%s7062_s2 + $0x8] sm:$0xff]   ;;  %v6681_v1 = vld [vmem:[%s7062_s2] sm:$0xff]  }
 0xa79   : > { %v2238_v40 = vsel %vm2237_vm6, %v2229_v27, %v6646_v14  ;;  %v2239_v2 = vsel %vm2237_vm6, %v2230_v3, %v6647_v24  ;;  %v6657_v53 = vunpack.i.h.bf16 %v6655_v35  ;;  %v6656_v51 = vunpack.i.l.bf16 %v6655_v35  ;;  %v6679_v3 = vld [vmem:[%s7062_s2 + $0x10] sm:$0xff]  }
 0xa7a   : > { %v2246_v50 = vpack.c.bf16 %v2239_v2, %v2238_v40  ;;  %v6650_v49 = vpop.permute.xlu0 %6649  ;;  %v5830_v40 = vld [vmem:[%s8613_s14] ss:$0 sm:$0xff] }
 0xa7b   : > { %v6652_v21 = vunpack.i.h.bf16 %v6650_v49  ;;  %v6651_v54 = vunpack.i.l.bf16 %v6650_v49  ;;  %v2236_v36 = vsel %vm2228_vm5, %v2227_v15, %v6657_v53  ;;  %v2235_v28 = vsel %vm2228_vm5, %v2226_v41, %v6656_v51 }
 0xa7c   : > { %v6665_v11 = vpop.permute.xlu1 %6664  ;;  %6373 = vmatprep.mubr.msk.bf16.mxu1 %vm868_vm2, %v2246_v50 }
 0xa7d   : > { %v6667_v16 = vunpack.i.h.bf16 %v6665_v11  ;;  %v6666_v13 = vunpack.i.l.bf16 %v6665_v11  ;;  %6374 = vmatmul.mubr.msk.bf16.vlgmr.msra.gmra.mxu1 %vm868_vm2, %v2247_v62  ;;  %v2233_v7 = vsel %vm2228_vm5, %v2224_v60, %v6651_v54  ;;  %v2234_v5 = vsel %vm2228_vm5, %v2225_v17, %v6652_v21 }
 0xa7e   : > { %v6660_v58 = vpop.permute.xlu0 %6659  ;;  %6394 = vmatpush3.bf16.msra.mxu1 %v6674_v31 }
 0xa7f   : > { %v6662_v19 = vunpack.i.h.bf16 %v6660_v58  ;;  %v6661_v22 = vunpack.i.l.bf16 %v6660_v58  ;;  %v2245_v61 = vsel %vm2237_vm6, %v2236_v36, %v6667_v16  ;;  %v2244_v8 = vsel %vm2237_vm6, %v2235_v28, %v6666_v13  ;;  %6395 = vmatprep.subr.bf16.mxu1 %v6675_v37 }
 0xa80   : > { %v2249_v45 = vpack.c.bf16 %v2245_v61, %v2244_v8  ;;  %v5837_v8 = vld [vmem:[%s686_s13] ss:$0 sm:$0xff] }
 0xa81   : > { %v2242_v6 = vsel %vm2237_vm6, %v2233_v7, %v6661_v22  ;;  %v2243_v23 = vsel %vm2237_vm6, %v2234_v5, %v6662_v19 }
 0xa82   : > { %v2248_v52 = vpack.c.bf16 %v2243_v23, %v2242_v6  ;;  %6396 = vmatpush3.bf16.msra.mxu1 %v6675_v37 }
 0xa83   : > { %6397 = vmatprep.subr.bf16.mxu1 %v6676_v0 }
 0xa84   : > { %6377 = vmatprep.mubr.msk.bf16.mxu1 %vm868_vm2, %v2248_v52 }
 0xa85   : > { %6378 = vmatmul.mubr.msk.bf16.gmra.mxu1 %vm868_vm2, %v2249_v45 }
 0xa86   : > { %6398 = vmatpush3.bf16.msra.mxu1 %v6676_v0 }
 0xa87   : > { %6399 = vmatprep.subr.bf16.mxu1 %v6677_v44 }
 0xa8a   : > { %6400 = vmatpush3.bf16.msra.mxu1 %v6677_v44 }
 0xa8b   : > { %6401 = vmatprep.subr.bf16.mxu1 %v6678_v42 }
 0xa8e   : > { %6402 = vmatpush3.bf16.msra.mxu1 %v6678_v42 }
 0xa8f   : > { %6403 = vmatprep.subr.bf16.mxu1 %v6679_v3 }
 0xa92   : > { %6404 = vmatpush3.bf16.msra.mxu1 %v6679_v3 }
 0xa93   : > { %6405 = vmatprep.subr.bf16.mxu1 %v6680_v30 }
 0xa96   : > { %6406 = vmatpush3.bf16.msra.mxu1 %v6680_v30 }
 0xa97   : > { %6407 = vmatprep.subr.bf16.mxu1 %v6681_v1 }
 0xa9a   : > { %6408 = vmatpush3.bf16.msra.mxu1 %v6681_v1 }
 0xb3d   : > { %v6375_v38 = vpop.f32.mrf.mxu1 }
 0xb3e   : > { %v2328_v9 = vadd.f32 %v6375_v38, %v5823_v56 }
 0xb3f   : > { %v2319_v39 = vpop.f32.mrf.mxu1 }
 0xb40   : > { %v2320_v48 = vadd.f32 %v5823_v56, %v2319_v39 }
 0xb41   : > { %v6376_v47 = vpop.f32.mrf.mxu1 }
 0xb42   : > { %v2331_v12 = vadd.f32 %v6376_v47, %v5823_v56 }
 0xb43   : > { %v2322_v18 = vpop.f32.mrf.mxu1 }
 0xb44   : > { %v2323_v55 = vadd.f32 %v5823_v56, %v2322_v18  ;;  %v2351_v46 = vpack.c.bf16 %v2331_v12, %v2328_v9 }
 0xb45   : > { %v6379_v26 = vpop.f32.mrf.mxu1 }
 0xb46   : > { %v2350_v25 = vpack.c.bf16 %v2323_v55, %v2320_v48  ;;  %v2344_v24 = vadd.f32 %v6379_v26, %v5823_v56 }
 0xb47   : > { %v2335_v20 = vpop.f32.mrf.mxu1 }
 0xb48   : > { %6385 = vmatprep.mubr.msk.bf16.mxu0 %vm868_vm2, %v2350_v25  ;;  %v2336_v43 = vadd.f32 %v5823_v56, %v2335_v20 }
 0xb49   : > { %v6380_v57 = vpop.f32.mrf.mxu1  ;;  %6386 = vmatmul.mubr.msk.bf16.vlgmr.msra.gmra.mxu0 %vm868_vm2, %v2351_v46 }
 0xb4a   : > { %v2347_v32 = vadd.f32 %v6380_v57, %v5823_v56 }
 0xb4b   : > { %v2338_v29 = vpop.f32.mrf.mxu1 }
 0xb4c   : > { %v2339_v34 = vadd.f32 %v5823_v56, %v2338_v29  ;;  %v2353_v27 = vpack.c.bf16 %v2347_v32, %v2344_v24 }
 0xb4e   : > { %v2352_v14 = vpack.c.bf16 %v2339_v34, %v2336_v43 }
 0xb50   : > { %6389 = vmatprep.mubr.msk.bf16.mxu0 %vm868_vm2, %v2352_v14 }
 0xb51   : > { %6390 = vmatmul.mubr.msk.bf16.gmra.mxu0 %vm868_vm2, %v2353_v27 }
 0xc09   : > { %v6387_v35 = vpop.f32.mrf.mxu0 }
 0xc0a   : > { %v2432_v59 = vadd.f32 %v6387_v35, %v5830_v40 }
 0xc0b   : > { %v2423_v4 = vpop.f32.mrf.mxu0 }
 0xc0c   : > { %v2424_v33 = vadd.f32 %v5830_v40, %v2423_v4  ;;  %v2456_v54 = vmax.f32 %v2432_v59, 0.0 }
 0xc0d   : > { %v6388_v2 = vpop.f32.mrf.mxu0 }
 0xc0e   : > { %v2435_v10 = vadd.f32 %v6388_v2, %v5830_v40  ;;  %v2454_v51 = vmax.f32 %v2424_v33, 0.0 }
 0xc0f   : > { %v2426_v50 = vpop.f32.mrf.mxu0 }
 0xc10   : > { %v2427_v49 = vadd.f32 %v5830_v40, %v2426_v50  ;;  %v2457_v62 = vmax.f32 %v2435_v10, 0.0 }
 0xc11   : > { %v6391_v53 = vpop.f32.mrf.mxu0 }
 0xc12   : > { %v2455_v21 = vmax.f32 %v2427_v49, 0.0  ;;  %v2463_v13 = vpack.c.bf16 %v2457_v62, %v2456_v54  ;;  %v2448_v60 = vadd.f32 %v6391_v53, %v5830_v40 }
 0xc13   : > { %v2439_v11 = vpop.f32.mrf.mxu0 }
 0xc14   : > { %v2462_v16 = vpack.c.bf16 %v2455_v21, %v2454_v51  ;;  %v2440_v41 = vadd.f32 %v5830_v40, %v2439_v11  ;;  %v2460_v7 = vmax.f32 %v2448_v60, 0.0 }
 0xc15   : > { %v6392_v15 = vpop.f32.mrf.mxu0 }
 0xc16   : > { %v2451_v17 = vadd.f32 %v6392_v15, %v5830_v40  ;;  %6409 = vmatprep.mubr.bf16.mxu1 %v2462_v16  ;;  %v2458_v19 = vmax.f32 %v2440_v41, 0.0 }
 0xc17   : > { %v2442_v58 = vpop.f32.mrf.mxu0  ;;  %6410 = vmatmul.mubr.bf16.vlgmr.msra.gmra.mxu1 %v2463_v13 }
 0xc18   : > { %v2443_v36 = vadd.f32 %v5830_v40, %v2442_v58  ;;  %v2461_v28 = vmax.f32 %v2451_v17, 0.0 }
 0xc1a   : > { %v2459_v22 = vmax.f32 %v2443_v36, 0.0  ;;  %v2465_v61 = vpack.c.bf16 %v2461_v28, %v2460_v7 }
 0xc1c   : > { %v2464_v5 = vpack.c.bf16 %v2459_v22, %v2458_v19 }
 0xc1e   : > { %6413 = vmatprep.mubr.bf16.mxu1 %v2464_v5 }
 0xc1f   : > { %6414 = vmatmul.mubr.bf16.gmra.mxu1 %v2465_v61 }
 0xcd7   : > { %v6411_v6 = vpop.f32.mrf.mxu1 }
 0xcd8   : > { %v2580_v23 = vadd.f32 %v6411_v6, %v5837_v8 }
 0xcd9   : > { %v2571_v52 = vpop.f32.mrf.mxu1 }
 0xcda   : > { %v2604_v45 = vmax.f32 %v2580_v23, 0.0  ;;  %v2572_v63 = vadd.f32 %v5837_v8, %v2571_v52 }
 0xcdb   : > { %v6412_v31 = vpop.f32.mrf.mxu1 }
 0xcdc   : > { %v2602_v37 = vmax.f32 %v2572_v63, 0.0  ;;  %v2583_v0 = vadd.f32 %v6412_v31, %v5837_v8  ;;  %v2616_v44 = vsel %vm868_vm2, %v2604_v45, 0.0 }
 0xcdd   : > { %2617 = vadd.xlane.f32.xlu0 %v2616_v44  ;;  %v2574_v42 = vpop.f32.mrf.mxu1 }
 0xcde   : > { %v2575_v38 = vadd.f32 %v5837_v8, %v2574_v42  ;;  %v2605_v47 = vmax.f32 %v2583_v0, 0.0  ;;  %v2610_v12 = vsel %vm868_vm2, %v2602_v37, 0.0 }
 0xcdf   : > { %v6415_v39 = vpop.f32.mrf.mxu1 }
 0xce0   : > { %v2603_v56 = vmax.f32 %v2575_v38, 0.0  ;;  %v2596_v48 = vadd.f32 %v6415_v39, %v5837_v8  ;;  %v2619_v46 = vsel %vm868_vm2, %v2605_v47, 0.0 }
 0xce1   : > { %v2587_v18 = vpop.f32.mrf.mxu1  ;;  %2611 = vadd.xlane.f32.xlu0 %v2610_v12 }
 0xce2   : > { %v2588_v55 = vadd.f32 %v5837_v8, %v2587_v18  ;;  %v2613_v9 = vsel %vm868_vm2, %v2603_v56, 0.0  ;;  %v2608_v57 = vmax.f32 %v2596_v48, 0.0 }
 0xce3   : > { %v6416_v26 = vpop.f32.mrf.mxu1  ;;  %2614 = vadd.xlane.f32.xlu1 %v2613_v9 }
 0xce4   : > { %v2606_v25 = vmax.f32 %v2588_v55, 0.0  ;;  %v2599_v32 = vadd.f32 %v6416_v26, %v5837_v8  ;;  %v2628_v14 = vsel %vm868_vm2, %v2608_v57, 0.0 }
 0xce5   : > { %v2590_v20 = vpop.f32.mrf.mxu1  ;;  %2620 = vadd.xlane.f32.xlu0 %v2619_v46 }
 0xce6   : > { %v2591_v29 = vadd.f32 %v5837_v8, %v2590_v20  ;;  %v2622_v43 = vsel %vm868_vm2, %v2606_v25, 0.0  ;;  %v2609_v24 = vmax.f32 %v2599_v32, 0.0 }
 0xce7   : > { %2623 = vadd.xlane.f32.xlu1 %v2622_v43 }
 0xce8   : > { %v2607_v34 = vmax.f32 %v2591_v29, 0.0  ;;  %v2631_v3 = vsel %vm868_vm2, %v2609_v24, 0.0 }
 0xcea   : > { %v2625_v27 = vsel %vm868_vm2, %v2607_v34, 0.0 }
 0xceb   : > { %2629 = vadd.xlane.f32.xlu1 %v2628_v14  ;;  %2626 = vadd.xlane.f32.xlu0 %v2625_v27  ;;  %v5846_v14 = vld [vmem:[%s689_s29] ss:$0 sm:$0xff] }
 0xcef   : > { %2632 = vadd.xlane.f32.xlu0 %v2631_v3 }
 0xd66   : > { %v2618_v30 = vpop.xlane.xlu0 %2617 }
 0xd67   : > { %v2637_v1 = vmul.f32 0.03125, %v2618_v30  ;;  %v5847_v30 = vld [vmem:[%s692_s0] ss:$0 sm:$0xff] }
 0xd69   : > { %v7689_v35 = vsub.f32 %v2604_v45, %v2637_v1 }
 0xd6a   : > { %v2612_v4 = vpop.xlane.xlu0 %2611 }
 0xd6b   : > { %v2635_v40 = vmul.f32 0.03125, %v2612_v4  ;;  %v2653_v2 = vmul.f32 %v7689_v35, %v7689_v35 }
 0xd6c   : > { %v2615_v33 = vpop.xlane.xlu1 %2614 }
 0xd6d   : > { %v7693_v10 = vsub.f32 %v2602_v37, %v2635_v40  ;;  %v2636_v59 = vmul.f32 0.03125, %v2615_v33  ;;  %v2665_v50 = vsel %vm868_vm2, %v2653_v2, 0.0 }
 0xd6e   : > { %2666 = vadd.xlane.f32.xlu1 %v2665_v50  ;;  %v2621_v49 = vpop.xlane.xlu0 %2620 }
 0xd6f   : > { %v2638_v62 = vmul.f32 0.03125, %v2621_v49  ;;  %v2651_v53 = vmul.f32 %v7693_v10, %v7693_v10  ;;  %v7698_v51 = vsub.f32 %v2603_v56, %v2636_v59 }
 0xd70   : > { %v2624_v21 = vpop.xlane.xlu1 %2623 }
 0xd71   : > { %v7700_v54 = vsub.f32 %v2605_v47, %v2638_v62  ;;  %v2639_v11 = vmul.f32 0.03125, %v2624_v21  ;;  %v2659_v16 = vsel %vm868_vm2, %v2651_v53, 0.0  ;;  %v2652_v60 = vmul.f32 %v7698_v51, %v7698_v51 }
 0xd72   : > { %2660 = vadd.xlane.f32.xlu1 %v2659_v16 }
 0xd73   : > { %v7703_v13 = vsub.f32 %v2606_v25, %v2639_v11  ;;  %v2654_v15 = vmul.f32 %v7700_v54, %v7700_v54  ;;  %v2662_v6 = vsel %vm868_vm2, %v2652_v60, 0.0 }
 0xd74   : > { %v2630_v41 = vpop.xlane.xlu1 %2629  ;;  %v2627_v17 = vpop.xlane.xlu0 %2626 }
 0xd75   : > { %v2641_v58 = vmul.f32 0.03125, %v2630_v41  ;;  %v2640_v36 = vmul.f32 0.03125, %v2627_v17  ;;  %v2668_v28 = vsel %vm868_vm2, %v2654_v15, 0.0  ;;  %v2655_v19 = vmul.f32 %v7703_v13, %v7703_v13 }
 0xd76   : > { %2669 = vadd.xlane.f32.xlu0 %v2668_v28 }
 0xd77   : > { %v7712_v22 = vsub.f32 %v2608_v57, %v2641_v58  ;;  %v7714_v7 = vsub.f32 %v2607_v34, %v2640_v36  ;;  %v2671_v5 = vsel %vm868_vm2, %v2655_v19, 0.0 }
 0xd78   : > { %2672 = vadd.xlane.f32.xlu1 %v2671_v5  ;;  %v2633_v61 = vpop.xlane.xlu0 %2632 }
 0xd79   : > { %v2642_v8 = vmul.f32 0.03125, %v2633_v61  ;;  %v2657_v23 = vmul.f32 %v7712_v22, %v7712_v22  ;;  %v2656_v52 = vmul.f32 %v7714_v7, %v7714_v7 }
 0xd7a   : > { %2663 = vadd.xlane.f32.xlu0 %v2662_v6 }
 0xd7b   : > { %v7722_v45 = vsub.f32 %v2609_v24, %v2642_v8  ;;  %v2677_v63 = vsel %vm868_vm2, %v2657_v23, 0.0  ;;  %v2674_v31 = vsel %vm868_vm2, %v2656_v52, 0.0 }
 0xd7c   : > { %2678 = vadd.xlane.f32.xlu1 %v2677_v63 }
 0xd7d   : > { %v2658_v37 = vmul.f32 %v7722_v45, %v7722_v45 }
 0xd7e   : > { %2675 = vadd.xlane.f32.xlu0 %v2674_v31 }
 0xd7f   : > { %v2680_v0 = vsel %vm868_vm2, %v2658_v37, 0.0 }
 0xd82   : > { %2681 = vadd.xlane.f32.xlu0 %v2680_v0 }
 0xdf7   : > { %v2667_v44 = vpop.xlane.xlu1 %2666 }
 0xdf8   : > { %v2685_v42 = vmul.f32 0.03125, %v2667_v44 }
 0xdfa   : > { %v2693_v38 = vadd.f32 1e-05, %v2685_v42 }
 0xdfb   : > { %v2661_v39 = vpop.xlane.xlu1 %2660 }
 0xdfc   : > { %6810 = vrsqrt.f32 %v2693_v38  ;;  %v2683_v47 = vmul.f32 0.03125, %v2661_v39 }
 0xdfe   : > { %v2691_v56 = vadd.f32 1e-05, %v2683_v47 }
 0xdff   : > { %v2670_v12 = vpop.xlane.xlu0 %2669 }
 0xe00   : > { %6812 = vrsqrt.f32 %v2691_v56  ;;  %v2686_v18 = vmul.f32 0.03125, %v2670_v12 }
 0xe01   : > { %v2673_v48 = vpop.xlane.xlu1 %2672 }
 0xe02   : > { %v2694_v55 = vadd.f32 1e-05, %v2686_v18  ;;  %v2687_v9 = vmul.f32 0.03125, %v2673_v48 }
 0xe03   : > { %v2664_v26 = vpop.xlane.xlu0 %2663 }
 0xe04   : > { %6814 = vrsqrt.f32 %v2694_v55  ;;  %v2695_v25 = vadd.f32 1e-05, %v2687_v9  ;;  %v2684_v46 = vmul.f32 0.03125, %v2664_v26 }
 0xe05   : > { %v2679_v20 = vpop.xlane.xlu1 %2678 }
 0xe06   : > { %6816 = vrsqrt.f32 %v2695_v25  ;;  %v2692_v57 = vadd.f32 1e-05, %v2684_v46  ;;  %v2689_v32 = vmul.f32 0.03125, %v2679_v20 }
 0xe07   : > { %v2676_v29 = vpop.xlane.xlu0 %2675 }
 0xe08   : > { %6818 = vrsqrt.f32 %v2692_v57  ;;  %v2697_v43 = vadd.f32 1e-05, %v2689_v32  ;;  %v2688_v34 = vmul.f32 0.03125, %v2676_v29 }
 0xe09   : > { %v6811_v24 = vpop.eup %6810 }
 0xe0a   : > { %v2709_v27 = vmul.f32 %v6811_v24, %v7689_v35  ;;  %6820 = vrsqrt.f32 %v2697_v43  ;;  %v2696_v3 = vadd.f32 1e-05, %v2688_v34 }
 0xe0b   : > { %v2682_v1 = vpop.xlane.xlu0 %2681 }
 0xe0c   : > { %v2724_v4 = vmul.f32 %v5846_v14, %v2709_v27  ;;  %6822 = vrsqrt.f32 %v2696_v3  ;;  %v2690_v40 = vmul.f32 0.03125, %v2682_v1 }
 0xe0d   : > { %v6813_v2 = vpop.eup %6812 }
 0xe0e   : > { %v2739_v33 = vadd.f32 %v5847_v30, %v2724_v4  ;;  %v2707_v59 = vmul.f32 %v6813_v2, %v7693_v10  ;;  %v2698_v50 = vadd.f32 1e-05, %v2690_v40 }
 0xe10   : > { %2747 = vst.msk [vmem:[#allocation2 + $0x10] sm:$0xff] %vm868_vm2, %v2739_v33  ;;  %v2722_v49 = vmul.f32 %v5846_v14, %v2707_v59  ;;  %6824 = vrsqrt.f32 %v2698_v50 }
 0xe11   : > { %v6815_v35 = vpop.eup %6814 }
 0xe12   : > { %v2737_v62 = vadd.f32 %v5847_v30, %v2722_v49  ;;  %v2710_v53 = vmul.f32 %v6815_v35, %v7700_v54 }
 0xe13   : > { %v6817_v21 = vpop.eup %6816 }
 0xe14   : > { %2745 = vst.msk [vmem:[#allocation2] sm:$0xff] %vm868_vm2, %v2737_v62  ;;  %v2725_v11 = vmul.f32 %v5846_v14, %v2710_v53  ;;  %v2711_v16 = vmul.f32 %v6817_v21, %v7703_v13 }
 0xe15   : > { %v6819_v15 = vpop.eup %6818 }
 0xe16   : > { %v2740_v41 = vadd.f32 %v5847_v30, %v2725_v11  ;;  %v2726_v17 = vmul.f32 %v5846_v14, %v2711_v16  ;;  %v2708_v10 = vmul.f32 %v6819_v15, %v7698_v51 }
 0xe17   : > { %v6821_v60 = vpop.eup %6820 }
 0xe18   : > { %2748 = vst.msk [vmem:[#allocation2 + $0x18] sm:$0xff] %vm868_vm2, %v2740_v41  ;;  %v2741_v58 = vadd.f32 %v5847_v30, %v2726_v17  ;;  %v2723_v36 = vmul.f32 %v5846_v14, %v2708_v10  ;;  %v2713_v28 = vmul.f32 %v6821_v60, %v7712_v22 }
 0xe19   : > { %v6823_v19 = vpop.eup %6822 }
 0xe1a   : > { %2749 = vst.msk [vmem:[#allocation2 + $0x20] sm:$0xff] %vm868_vm2, %v2741_v58  ;;  %v2738_v54 = vadd.f32 %v5847_v30, %v2723_v36  ;;  %v2728_v5 = vmul.f32 %v5846_v14, %v2713_v28  ;;  %v2712_v61 = vmul.f32 %v6823_v19, %v7714_v7 }
 0xe1c   : > { %2746 = vst.msk [vmem:[#allocation2 + $0x8] sm:$0xff] %vm868_vm2, %v2738_v54  ;;  %v2743_v13 = vadd.f32 %v5847_v30, %v2728_v5  ;;  %v2727_v8 = vmul.f32 %v5846_v14, %v2712_v61 }
 0xe1d   : > { %v6825_v6 = vpop.eup %6824 }
 0xe1e   : > { %2751 = vst.msk [vmem:[#allocation2 + $0x30] sm:$0xff] %vm868_vm2, %v2743_v13  ;;  %v2742_v51 = vadd.f32 %v5847_v30, %v2727_v8  ;;  %v2714_v23 = vmul.f32 %v6825_v6, %v7722_v45 }
 0xe20   : > { %2750 = vst.msk [vmem:[#allocation2 + $0x28] sm:$0xff] %vm868_vm2, %v2742_v51  ;;  %v2729_v22 = vmul.f32 %v5846_v14, %v2714_v23  ;;  %2756 = sbr.rel (%p5848_p8) target bundleno = 4115 (0x1013), region = 92 }
 0xe22   : > { %v2744_v52 = vadd.f32 %v5847_v30, %v2729_v22 }
 0xe24   : > { %2752 = vst.msk [vmem:[#allocation2 + $0x38] sm:$0xff] %vm868_vm2, %v2744_v52 }
 0xe25   : > { %s8614_s29 = sld [smem:[#allocation22_spill]]  ;;  %v6900_v31 = vmov 0   ;;  %v2776_v56 = vld [vmem:[#allocation2 + $0x30] sm:$0xff]  ;;  %vm2757_vm7 = vcmask 257024   ;;  %v2770_v57 = vld [vmem:[#allocation2] sm:$0xff]  ;;  %v2771_v14 = vld [vmem:[#allocation2 + $0x8] sm:$0xff] }
 0xe26   : > { %6827 = vset.pattern.permute.xlu1 %v6900_v31  ;;  %6826 = vset.pattern.permute.xlu0 %v6900_v31  ;;  %v7794_v48 = vpack.c.bf16 %v2776_v56, %v2776_v56  ;;  %2758 = vst.msk [vmem:[#allocation3] sm:$0xf] %vm2757_vm7, %v6900_v31  ;;  %2759 = vst.msk [vmem:[#allocation3 + $0x4] sm:$0xf] %vm2757_vm7, %v6900_v31  ;;  %vm2802_vm8 = vsmask.f32 256  ;;  %v6058_v43 = vpack.c.bf16 %v2770_v57, %v2770_v57 }
 0xe27   : > { %2760 = vst.msk [vmem:[#allocation3 + $0x8] sm:$0xf] %vm2757_vm7, %v6900_v31  ;;  %2761 = vst.msk [vmem:[#allocation3 + $0xc] sm:$0xf] %vm2757_vm7, %v6900_v31  ;;  %vm2886_vm9 = vsmask.f32 7938  ;;  %v6059_v1 = vpack.c.bf16 %v2771_v14, %v2771_v14 }
 0xe28   : > { %2762 = vst.msk [vmem:[#allocation3 + $0x10] sm:$0xf] %vm2757_vm7, %v6900_v31  ;;  %2763 = vst.msk [vmem:[#allocation3 + $0x14] sm:$0xf] %vm2757_vm7, %v6900_v31  ;;  %v2859_v26 = vshrl.u32 %v7794_v48, 16  ;;  %v2772_v27 = vld [vmem:[#allocation2 + $0x10] sm:$0xff] }
 0xe29   : > { %2764 = vst.msk [vmem:[#allocation3 + $0x18] sm:$0xf] %vm2757_vm7, %v6900_v31  ;;  %2765 = vst.msk [vmem:[#allocation3 + $0x1c] sm:$0xf] %vm2757_vm7, %v6900_v31  ;;  %v2806_v3 = vshrl.u32 %v6058_v43, 16  ;;  %v2809_v30 = vshll.u32 %v6058_v43, 16  ;;  %v6060_v4 = vpack.c.bf16 %v2772_v27, %v2772_v27 }
 0xe2a   : > { %2766 = vst.msk [vmem:[#allocation3 + $0x20] sm:$0xf] %vm2757_vm7, %v6900_v31  ;;  %2767 = vst.msk [vmem:[#allocation3 + $0x24] sm:$0xf] %vm2757_vm7, %v6900_v31  ;;  %v7823_v20 = vrot.slane %v2859_v26, 7  ;;  %s8615_s30 = sld [smem:[#allocation20_spill]] }
 0xe2b   : > { %v5862_v7 = vld [vmem:[%s8614_s29 + $0x34] sm:$0xf]  ;;  %v5860_v63 = vld [vmem:[%s8614_s29 + $0x2c] sm:$0xf]  ;;  %v5863_v45 = vld [vmem:[%s8614_s29 + $0x38] sm:$0xf] }
 0xe2c   : > { %3107 = vperm.xlu1 %6827, %v5862_v7   ;;  %3083 = vperm.xlu0 %6826, %v5860_v63   ;;  %v5861_v37 = vld [vmem:[%s8614_s29 + $0x30] sm:$0xf]  ;;  %v5857_v0 = vld [vmem:[%s8614_s29 + $0x20] sm:$0xf]  ;;  %v5864_v44 = vld [vmem:[%s8614_s29 + $0x3c] sm:$0xf] }
 0xe2d   : > { %v5859_v42 = vld [vmem:[%s8614_s29 + $0x28] sm:$0xf]  ;;  %v5858_v38 = vld [vmem:[%s8614_s29 + $0x24] sm:$0xf]  ;;  %v5890_v47 = vld [vmem:[%s8614_s29 + $0x40] sm:$0xf] }
 0xe2e   : > { %v5891_v39 = vld [vmem:[%s8614_s29 + $0x44] sm:$0xf]  ;;  %v5893_v12 = vld [vmem:[%s8614_s29 + $0x4c] sm:$0xf]  ;;  %v5892_v18 = vld [vmem:[%s8614_s29 + $0x48] sm:$0xf] }
 0xe2f   : > { %v5895_v55 = vld [vmem:[%s8614_s29 + $0x54] sm:$0xf]  ;;  %v5894_v9 = vld [vmem:[%s8614_s29 + $0x50] sm:$0xf]  ;;  %v2777_v25 = vld [vmem:[#allocation2 + $0x38] sm:$0xff]  ;;  %v2866_v33 = vrot.slane %v7823_v20, 4 }
 0xe30   : > { %3119 = vperm.xlu1 %6827, %v5863_v45   ;;  %3095 = vperm.xlu0 %6826, %v5861_v37   ;;  %v6065_v46 = vpack.c.bf16 %v2777_v25, %v2777_v25  ;;  %v2912_v32 = vld [vmem:[%s8614_s29 + $0x4] sm:$0xf]  ;;  %v2911_v29 = vld [vmem:[%s8614_s29] sm:$0xf]  ;;  %v2914_v40 = vld [vmem:[%s8614_s29 + $0xc] sm:$0xf] }
 0xe31   : > { %v2913_v2 = vld [vmem:[%s8614_s29 + $0x8] sm:$0xf]  ;;  %vm2803_vm10 = vsmask.f32 4368  ;;  %v6828_v50 = vld [vmem:[%s8615_s30 + $0x18] sm:$0xff]   ;;  %v2808_v49 = vrot.slane %v2806_v3, 7  ;;  %vm7845_vm11 = vmand %vm2757_vm7, %vm2886_vm9 }
 0xe32   : > { %v2868_v34 = vshrl.u32 %v6065_v46, 16  ;;  %v2871_v24 = vshll.u32 %v6065_v46, 16  ;;  %v2888_v62 = vld [vmem:[#allocation3 + $0x4] sm:$0xf]  ;;  %v2814_v53 = vshrl.u32 %v6059_v1, 16  ;;  %v2817_v21 = vshll.u32 %v6059_v1, 16  ;;  %6527 = vmatprep.subr.bf16.mxu1 %v6828_v50  ;;  %6417 = vmatprep.subr.bf16.mxu0 %v6828_v50  ;;  %vm7852_vm12 = vmor %vm2802_vm8, %vm2803_vm10 }
 0xe33   : > { %v2823_v11 = vshrl.u32 %v6060_v4, 16  ;;  %v2826_v15 = vshll.u32 %v6060_v4, 16  ;;  %v2773_v41 = vld [vmem:[#allocation2 + $0x18] sm:$0xff]  ;;  %v2774_v17 = vld [vmem:[#allocation2 + $0x20] sm:$0xff]  ;;  %v2811_v60 = vor.u32 %v2809_v30, %v2808_v49  ;;  %v2812_v58 = vrot.slane %v2808_v49, 4  ;;  %6529 = vmatpush3.bf16.msra.mxu1 %v6828_v50  ;;  %v6829_v19 = vld [vmem:[%s8615_s30 + $0x10] sm:$0xff]   ;;  %6418 = vmatpush3.bf16.msra.mxu0 %v6828_v50 }
 0xe34   : > { %3047 = vperm.xlu1 %6827, %v5857_v0   ;;  %3131 = vperm.xlu0 %6826, %v5864_v44   ;;  %v7838_v59 = vrot.slane %v2868_v34, 7  ;;  %v2816_v36 = vrot.slane %v2814_v53, 7  ;;  %v5897_v54 = vld [vmem:[%s8614_s29 + $0x5c] sm:$0xf]  ;;  %v5896_v5 = vld [vmem:[%s8614_s29 + $0x58] sm:$0xf]  ;;  %v6061_v13 = vpack.c.bf16 %v2773_v41, %v2773_v41  ;;  %v6062_v8 = vpack.c.bf16 %v2774_v17, %v2774_v17 }
 0xe35   : > { %v2825_v28 = vrot.slane %v2823_v11, 7  ;;  %v2775_v6 = vld [vmem:[#allocation2 + $0x28] sm:$0xff]  ;;  %v2862_v51 = vshll.u32 %v7794_v48, 16  ;;  %v2889_v23 = vsel %vm7845_vm11, %v2811_v60, %v2888_v62  ;;  %6528 = vmatprep.subr.bf16.mxu1 %v6829_v19  ;;  %6419 = vmatprep.subr.bf16.mxu0 %v6829_v19  ;;  %v5936_v56 = vld [vmem:[%s8614_s29 + $0x84] sm:$0xf]  ;;  %vm2768_vm13 = vcmask 253952  }
 0xe36   : > { %v2873_v16 = vor.u32 %v2871_v24, %v7838_v59  ;;  %v2819_v22 = vor.u32 %v2817_v21, %v2816_v36  ;;  %v2821_v52 = vrot.slane %v2816_v36, 4  ;;  %v7874_v63 = vld [vmem:[%s8615_s30 + $0x8] sm:$0xff]   ;;  %2890 = vst [vmem:[#allocation3 + $0x4] sm:$0xf] %v2889_v23  ;;  %v2832_v37 = vshrl.u32 %v6061_v13, 16  ;;  %vm2899_vm14 = vmand %vm2768_vm13, %vm2802_vm8  ;;  %s8627_s17 = sld [smem:[#allocation21_spill]] }
 0xe37   : > { %v2828_v7 = vor.u32 %v2826_v15, %v2825_v28  ;;  %v2830_v45 = vrot.slane %v2825_v28, 4  ;;  %v2835_v0 = vshll.u32 %v6061_v13, 16  ;;  %v2841_v44 = vshrl.u32 %v6062_v8, 16  ;;  %6530 = vmatpush3.bf16.msra.mxu1 %v6829_v19  ;;  %6420 = vmatpush3.bf16.msra.mxu0 %v6829_v19  ;;  %v7897_v24 = vld [vmem:[%s8615_s30 + $0x28] sm:$0xff]   ;;  %v5940_v4 = vld [vmem:[%s8614_s29 + $0x94] sm:$0xf] }
 0xe38   : > { %3071 = vperm.xlu1 %6827, %v5859_v42   ;;  %3059 = vperm.xlu0 %6826, %v5858_v38   ;;  %v2874_v61 = vsel %vm7852_vm12, %v2866_v33, %v2873_v16  ;;  %v2820_v42 = vsel %vm7852_vm12, %v2812_v58, %v2819_v22  ;;  %v5938_v14 = vld [vmem:[%s8614_s29 + $0x8c] sm:$0xf]  ;;  %v5937_v3 = vld [vmem:[%s8614_s29 + $0x88] sm:$0xf]  ;;  %v2915_v33 = vld [vmem:[%s8614_s29 + $0x10] sm:$0xf] }
 0xe39   : > { %2897 = vst.msk [vmem:[#allocation3 + $0x20] sm:$0xf] %vm2757_vm7, %v2874_v61  ;;  %v2829_v38 = vsel %vm7852_vm12, %v2821_v52, %v2828_v7  ;;  %2891 = vst.msk [vmem:[#allocation3 + $0x8] sm:$0xf] %vm2757_vm7, %v2820_v42  ;;  %v2843_v48 = vrot.slane %v2841_v44, 7  ;;  %6429 = vmatprep.subr.bf16.mxu1 %v7874_v63  ;;  %6441 = vmatprep.subr.bf16.mxu0 %v7897_v24  ;;  %v2875_v53 = vrot.slane %v7838_v59, 4 }
 0xe3a   : > { %2892 = vst.msk [vmem:[#allocation3 + $0xc] sm:$0xf] %vm2757_vm7, %v2829_v38  ;;  %v2918_v50 = vld [vmem:[%s8614_s29 + $0x1c] sm:$0xf]  ;;  %v2917_v49 = vld [vmem:[%s8614_s29 + $0x18] sm:$0xf] }
 0xe3b   : > { %v2848_v57 = vrot.slane %v2843_v48, 4  ;;  %v5942_v35 = vld [vmem:[%s8614_s29 + $0x9c] sm:$0xf]  ;;  %v5941_v62 = vld [vmem:[%s8614_s29 + $0x98] sm:$0xf]  ;;  %vm3607_vm15 = vcmask 1040384  }
 0xe3c   : > { %3517 = vperm.xlu1 %6827, %v5891_v39   ;;  %3505 = vperm.xlu0 %6826, %v5890_v47   ;;  %v2844_v39 = vshll.u32 %v6062_v8, 16  ;;  %v6063_v47 = vpack.c.bf16 %v2775_v6, %v2775_v6  ;;  %v2900_v21 = vld [vmem:[#allocation3 + $0x24] sm:$0x1]  ;;  %2769 = vst.msk [vmem:[#allocation3 + $0x28] sm:$0x1] %vm2768_vm13, %v6900_v31  ;;  %vm3608_vm0 = vcmask 1044484  }
 0xe3d   : > { %v2901_v11 = vsel %vm2899_vm14, %v2875_v53, %v2900_v21  ;;  %v5914_v16 = vld [vmem:[%s8614_s29 + $0x64] sm:$0xf]  ;;  %v5913_v15 = vld [vmem:[%s8614_s29 + $0x60] sm:$0xf]  ;;  %v5916_v59 = vld [vmem:[%s8614_s29 + $0x6c] sm:$0xf] }
 0xe3e   : > { %v2846_v46 = vor.u32 %v2844_v39, %v2843_v48  ;;  %2902 = vst [vmem:[#allocation3 + $0x24] sm:$0x1] %v2901_v11  ;;  %v5915_v31 = vld [vmem:[%s8614_s29 + $0x68] sm:$0xf]  ;;  %v5918_v41 = vld [vmem:[%s8614_s29 + $0x74] sm:$0xf]  ;;  %v2927_v39 = vlaneseq  ;;  %vm8109_vm3 = vmor %vm3607_vm15, %vm3608_vm0 }
 0xe3f   : > { %v5917_v17 = vld [vmem:[%s8614_s29 + $0x70] sm:$0xf]  ;;  %v5959_v60 = vld [vmem:[%s8614_s29 + $0xa4] sm:$0xf]  ;;  %v5958_v58 = vld [vmem:[%s8614_s29 + $0xa0] sm:$0xf] }
 0xe40   : > { %3541 = vperm.xlu1 %6827, %v5893_v12   ;;  %3529 = vperm.xlu0 %6826, %v5892_v18   ;;  %v5935_v12 = vld [vmem:[%s8614_s29 + $0x80] sm:$0xf]  ;;  %v2834_v18 = vrot.slane %v2832_v37, 7  ;;  %v5919_v36 = vld [vmem:[%s8614_s29 + $0x78] sm:$0xf]  ;;  %vm3679_vm4 = vcmask 1046528  }
 0xe41   : > { %v5960_v28 = vld [vmem:[%s8614_s29 + $0xa8] sm:$0xf]  ;;  %v5961_v19 = vld [vmem:[%s8614_s29 + $0xac] sm:$0xf]  ;;  %v5962_v61 = vld [vmem:[%s8614_s29 + $0xb0] sm:$0xf] }
 0xe42   : > { %v2837_v26 = vor.u32 %v2835_v0, %v2834_v18  ;;  %v2839_v25 = vrot.slane %v2834_v18, 4  ;;  %v5965_v13 = vld [vmem:[%s8614_s29 + $0xbc] sm:$0xf]  ;;  %v5964_v8 = vld [vmem:[%s8614_s29 + $0xb8] sm:$0xf]  ;;  %v2928_v18 = vshrl.u32 %v2927_v39, 7 }
 0xe43   : > { %v5982_v6 = vld [vmem:[%s8614_s29 + $0xc4] sm:$0xf]  ;;  %v6003_v22 = vld [vmem:[%s8614_s29 + $0xe0] sm:$0xf]  ;;  %v5984_v52 = vld [vmem:[%s8614_s29 + $0xcc] sm:$0xf] }
 0xe44   : > { %3565 = vperm.xlu1 %6827, %v5895_v55   ;;  %3553 = vperm.xlu0 %6826, %v5894_v9   ;;  %v2850_v55 = vshrl.u32 %v6063_v47, 16  ;;  %v2853_v9 = vshll.u32 %v6063_v47, 16  ;;  %v2838_v43 = vsel %vm7852_vm12, %v2830_v45, %v2837_v26  ;;  %v2847_v34 = vsel %vm7852_vm12, %v2839_v25, %v2846_v46  ;;  %v6004_v23 = vld [vmem:[%s8614_s29 + $0xe4] sm:$0xf]  ;;  %v5983_v7 = vld [vmem:[%s8614_s29 + $0xc8] sm:$0xf] }
 0xe45   : > { %2893 = vst.msk [vmem:[#allocation3 + $0x10] sm:$0xf] %vm2757_vm7, %v2838_v43  ;;  %2894 = vst.msk [vmem:[#allocation3 + $0x14] sm:$0xf] %vm2757_vm7, %v2847_v34  ;;  %v6006_v45 = vld [vmem:[%s8614_s29 + $0xec] sm:$0xf] }
 0xe46   : > { %v6005_v37 = vld [vmem:[%s8614_s29 + $0xe8] sm:$0xf]  ;;  %v6008_v0 = vld [vmem:[%s8614_s29 + $0xf4] sm:$0xf]  ;;  %v6007_v44 = vld [vmem:[%s8614_s29 + $0xf0] sm:$0xf] }
 0xe47   : > { %v6901_v42 = vmov 839922192   ;;  %v5986_v47 = vld [vmem:[%s8614_s29 + $0xd4] sm:$0xf]  ;;  %v6027_v48 = vld [vmem:[%s8614_s29 + $0x104] sm:$0xf] }
 0xe48   : > { %2933 = vperm.xlu1 %6827, %v2912_v32   ;;  %2921 = vperm.xlu0 %6826, %v2911_v29   ;;  %v2852_v32 = vrot.slane %v2850_v55, 7  ;;  %v2864_v29 = vor.u32 %v2862_v51, %v7823_v20  ;;  %v5981_v51 = vld [vmem:[%s8614_s29 + $0xc0] sm:$0xf]  ;;  %v2925_v38 = vunpack.c.l.s4 %v6901_v42  ;;  %v5987_v26 = vld [vmem:[%s8614_s29 + $0xd8] sm:$0xf] }
 0xe49   : > { %v6026_v55 = vld [vmem:[%s8614_s29 + $0x100] sm:$0xf]  ;;  %v6028_v25 = vld [vmem:[%s8614_s29 + $0x108] sm:$0xf]  ;;  %v6009_v43 = vld [vmem:[%s8614_s29 + $0xf8] sm:$0xf] }
 0xe4a   : > { %v2855_v20 = vor.u32 %v2853_v9, %v2852_v32  ;;  %v2857_v27 = vrot.slane %v2852_v32, 4  ;;  %v5988_v34 = vld [vmem:[%s8614_s29 + $0xdc] sm:$0xf]  ;;  %vm3258_vm1 = vsmask.f32 7424 }
 0xe4b   : > { %v6033_v42 = vld [vmem:[%s8614_s29 + $0x11c] sm:$0xf] }
 0xe4c   : > { %2957 = vperm.xlu1 %6827, %v2914_v40   ;;  %2945 = vperm.xlu0 %6826, %v2913_v2   ;;  %v2856_v30 = vsel %vm7852_vm12, %v2848_v57, %v2855_v20  ;;  %v2865_v1 = vsel %vm7852_vm12, %v2857_v27, %v2864_v29  ;;  %v5939_v40 = vld [vmem:[%s8614_s29 + $0x90] sm:$0xf]  ;;  %v2916_v2 = vld [vmem:[%s8614_s29 + $0x14] sm:$0xf] }
 0xe4d   : > { %2895 = vst.msk [vmem:[#allocation3 + $0x18] sm:$0xf] %vm2757_vm7, %v2856_v30  ;;  %2896 = vst.msk [vmem:[#allocation3 + $0x1c] sm:$0xf] %vm2757_vm7, %v2865_v1 }
 0xe50   : > { %3589 = vperm.xlu1 %6827, %v5897_v54   ;;  %3577 = vperm.xlu0 %6826, %v5896_v5   ;;  %v5920_v54 = vld [vmem:[%s8614_s29 + $0x7c] sm:$0xf]  ;;  %v5963_v5 = vld [vmem:[%s8614_s29 + $0xb4] sm:$0xf] }
 0xe54   : > { %4054 = vperm.xlu1 %6827, %v5936_v56   ;;  %4042 = vperm.xlu0 %6826, %v5935_v12   ;;  %v5985_v56 = vld [vmem:[%s8614_s29 + $0xd0] sm:$0xf]  ;;  %v2926_v12 = vunpack.c.0.s8 %v2925_v38  ;;  %v6032_v38 = vld [vmem:[%s8614_s29 + $0x118] sm:$0xf] }
 0xe56   : > { %v8031_v9 = vsub.s32 %v2926_v12, %v2928_v18 }
 0xe58   : > { %4078 = vperm.xlu1 %6827, %v5938_v14   ;;  %4066 = vperm.xlu0 %6826, %v5937_v3  }
 0xe5c   : > { %4102 = vperm.xlu1 %6827, %v5940_v4   ;;  %4090 = vperm.xlu0 %6826, %v5939_v40  }
 0xe60   : > { %2981 = vperm.xlu1 %6827, %v2916_v2   ;;  %2969 = vperm.xlu0 %6826, %v2915_v33   ;;  %v6029_v2 = vld [vmem:[%s8614_s29 + $0x10c] sm:$0xf]  ;;  %v6010_v33 = vld [vmem:[%s8614_s29 + $0xfc] sm:$0xf] }
 0xe64   : > { %3005 = vperm.xlu1 %6827, %v2918_v50   ;;  %2993 = vperm.xlu0 %6826, %v2917_v49  }
 0xe68   : > { %4126 = vperm.xlu1 %6827, %v5942_v35   ;;  %4114 = vperm.xlu0 %6826, %v5941_v62  }
 0xe6c   : > { %3810 = vperm.xlu1 %6827, %v5914_v16   ;;  %3798 = vperm.xlu0 %6826, %v5913_v15  }
 0xe70   : > { %3834 = vperm.xlu1 %6827, %v5916_v59   ;;  %3822 = vperm.xlu0 %6826, %v5915_v31   ;;  %v6031_v31 = vld [vmem:[%s8614_s29 + $0x114] sm:$0xf] }
 0xe74   : > { %3858 = vperm.xlu1 %6827, %v5918_v41   ;;  %3846 = vperm.xlu0 %6826, %v5917_v17  }
 0xe78   : > { %4410 = vperm.xlu1 %6827, %v5959_v60   ;;  %4398 = vperm.xlu0 %6826, %v5958_v58  }
 0xe7c   : > { %3870 = vperm.xlu1 %6827, %v5919_v36   ;;  %4422 = vperm.xlu0 %6826, %v5960_v28   ;;  %v6030_v36 = vld [vmem:[%s8614_s29 + $0x110] sm:$0xf] }
 0xe80   : > { %4434 = vperm.xlu1 %6827, %v5961_v19   ;;  %3882 = vperm.xlu0 %6826, %v5920_v54  }
 0xe84   : > { %4458 = vperm.xlu1 %6827, %v5963_v5   ;;  %4446 = vperm.xlu0 %6826, %v5962_v61  }
 0xe88   : > { %4482 = vperm.xlu1 %6827, %v5965_v13   ;;  %4470 = vperm.xlu0 %6826, %v5964_v8  }
 0xe8c   : > { %4699 = vperm.xlu1 %6827, %v5982_v6   ;;  %4687 = vperm.xlu0 %6826, %v5981_v51  }
 0xe90   : > { %4943 = vperm.xlu1 %6827, %v6004_v23   ;;  %4931 = vperm.xlu0 %6826, %v6003_v22  }
 0xe94   : > { %4723 = vperm.xlu1 %6827, %v5984_v52   ;;  %4711 = vperm.xlu0 %6826, %v5983_v7  }
 0xe98   : > { %4967 = vperm.xlu1 %6827, %v6006_v45   ;;  %4955 = vperm.xlu0 %6826, %v6005_v37  }
 0xe9c   : > { %4991 = vperm.xlu1 %6827, %v6008_v0   ;;  %4979 = vperm.xlu0 %6826, %v6007_v44  }
 0xea0   : > { %4747 = vperm.xlu1 %6827, %v5986_v47   ;;  %4735 = vperm.xlu0 %6826, %v5985_v56   ;;  %v8077_v56 = vld [vmem:[#allocation3] sm:$0xf] }
 0xea4   : > { %5299 = vperm.xlu1 %6827, %v6027_v48   ;;  %5287 = vperm.xlu0 %6826, %v6026_v55   ;;  %v8081_v48 = vld [vmem:[#allocation3 + $0x10] sm:$0xf]  ;;  %v8083_v55 = vld [vmem:[#allocation3 + $0x14] sm:$0xf] }
 0xea7   : > { %v3108_v46 = vpop.permute.xlu1 %3107  ;;  %v3084_v57 = vpop.permute.xlu0 %3083 }
 0xea8   : > { %v3116_v32 = vrot.slane %v3108_v46, %v8031_v9  ;;  %v3092_v29 = vrot.slane %v3084_v57, %v8031_v9  ;;  %4759 = vperm.xlu1 %6827, %v5987_v26   ;;  %5311 = vperm.xlu0 %6826, %v6028_v25  }
 0xeaa   : > { %v3186_v14 = vshrl.u32 %v3116_v32, 16  ;;  %v3168_v20 = vshrl.u32 %v3092_v29, 16  ;;  %v3189_v1 = vshll.u32 %v3116_v32, 16  ;;  %v3171_v49 = vshll.u32 %v3092_v29, 16 }
 0xeab   : > { %v3120_v27 = vpop.permute.xlu1 %3119  ;;  %v3096_v3 = vpop.permute.xlu0 %3095 }
 0xeac   : > { %v3188_v30 = vrot.slane %v3186_v14, 7  ;;  %v3128_v4 = vrot.slane %v3120_v27, %v8031_v9  ;;  %v3104_v40 = vrot.slane %v3096_v3, %v8031_v9  ;;  %5003 = vperm.xlu1 %6827, %v6009_v43   ;;  %4771 = vperm.xlu0 %6826, %v5988_v34   ;;  %v3170_v50 = vrot.slane %v3168_v20, 7  ;;  %v8085_v43 = vld [vmem:[#allocation3 + $0x1c] sm:$0xf]  ;;  %v8090_v3 = vld [vmem:[#allocation3 + $0x20] sm:$0x1] }
 0xeae   : > { %v3195_v35 = vshrl.u32 %v3128_v4, 16  ;;  %v3177_v62 = vshrl.u32 %v3104_v40, 16  ;;  %v3191_v11 = vor.u32 %v3189_v1, %v3188_v30  ;;  %v3193_v16 = vrot.slane %v3188_v30, 4 }
 0xeaf   : > { %v3048_v53 = vpop.permute.xlu1 %3047  ;;  %v3132_v21 = vpop.permute.xlu0 %3131  ;;  %v3198_v17 = vshll.u32 %v3128_v4, 16  ;;  %v3180_v58 = vshll.u32 %v3104_v40, 16  ;;  %v3175_v28 = vrot.slane %v3170_v50, 4  ;;  %v3173_v37 = vor.u32 %v3171_v49, %v3170_v50  ;;  %v8096_v50 = vld [vmem:[#allocation3 + $0x18] sm:$0xf] }
 0xeb0   : > { %v3056_v15 = vrot.slane %v3048_v53, %v8031_v9  ;;  %v3140_v59 = vrot.slane %v3132_v21, %v8031_v9  ;;  %5323 = vperm.xlu1 %6827, %v6029_v2   ;;  %5015 = vperm.xlu0 %6826, %v6010_v33   ;;  %v3197_v41 = vrot.slane %v3195_v35, 7  ;;  %v3179_v60 = vrot.slane %v3177_v62, 7 }
 0xeb2   : > { %v3142_v19 = vshrl.u32 %v3056_v15, 16  ;;  %v3145_v54 = vshll.u32 %v3056_v15, 16  ;;  %v3204_v5 = vshrl.u32 %v3140_v59, 16  ;;  %v3200_v61 = vor.u32 %v3198_v17, %v3197_v41 }
 0xeb3   : > { %v3182_v13 = vor.u32 %v3180_v58, %v3179_v60  ;;  %v3184_v8 = vrot.slane %v3179_v60, 4  ;;  %v3207_v6 = vshll.u32 %v3140_v59, 16  ;;  %v3072_v51 = vpop.permute.xlu1 %3071  ;;  %v3060_v23 = vpop.permute.xlu0 %3059  ;;  %v3202_v44 = vrot.slane %v3197_v41, 4 }
 0xeb4   : > { %v3144_v22 = vrot.slane %v3142_v19, 7  ;;  %v3206_v52 = vrot.slane %v3204_v5, 7  ;;  %v3080_v7 = vrot.slane %v3072_v51, %v8031_v9  ;;  %v3068_v45 = vrot.slane %v3060_v23, %v8031_v9  ;;  %5347 = vperm.xlu1 %6827, %v6031_v31   ;;  %5335 = vperm.xlu0 %6826, %v6030_v36   ;;  %v3493_v31 = vld [vmem:[#allocation3] sm:$0xe] }
 0xeb5   : > { %v3201_v0 = vsel %vm7852_vm12, %v3193_v16, %v3200_v61  ;;  %v3183_v39 = vsel %vm7852_vm12, %v3175_v28, %v3182_v13  ;;  %v3192_v47 = vsel %vm7852_vm12, %v3184_v8, %v3191_v11 }
 0xeb6   : > { %v8079_v12 = vor.u32 %v3145_v54, %v3144_v22  ;;  %v3209_v18 = vor.u32 %v3207_v6, %v3206_v52  ;;  %v3148_v26 = vrot.slane %v3144_v22, 4  ;;  %v3211_v25 = vrot.slane %v3206_v52, 4 }
 0xeb7   : > { %v3159_v46 = vshrl.u32 %v3080_v7, 16  ;;  %v3150_v57 = vshrl.u32 %v3068_v45, 16  ;;  %v3518_v32 = vpop.permute.xlu1 %3517  ;;  %v3506_v29 = vpop.permute.xlu0 %3505  ;;  %v3162_v14 = vshll.u32 %v3080_v7, 16  ;;  %v3153_v20 = vshll.u32 %v3068_v45, 16  ;;  %v8120_v45 = vld [vmem:[#allocation3 + $0x4] sm:$0xf] }
 0xeb8   : > { %v3210_v34 = vsel %vm7852_vm12, %v3202_v44, %v3209_v18  ;;  %v3526_v27 = vrot.slane %v3518_v32, %v8031_v9  ;;  %5371 = vperm.xlu1 %6827, %v6033_v42   ;;  %v3514_v4 = vrot.slane %v3506_v29, %v8031_v9  ;;  %5359 = vperm.xlu0 %6826, %v6032_v38  }
 0xeb9   : > { %v3161_v30 = vrot.slane %v3159_v46, 7  ;;  %v3152_v1 = vrot.slane %v3150_v57, 7  ;;  %v3225_v40 = vmul.bf16 %v3183_v39, %v8081_v48  ;;  %v3221_v2 = vmul.bf16 %v8079_v12, %v8077_v56 }
 0xeba   : > { %v3612_v33 = vrot.slane %v3526_v27, 7  ;;  %v3226_v49 = vmul.bf16 %v3192_v47, %v8083_v55  ;;  %v3228_v35 = vmul.bf16 %v3210_v34, %v8085_v43  ;;  %v3229_v59 = vmul.bf16 %v3211_v25, %v8090_v3  ;;  %v8129_v25 = vld [vmem:[#allocation3 + $0x8] sm:$0xf]  ;;  %v2904_v27 = vld [vmem:[#allocation3 + $0x4] sm:$0xf] }
 0xebb   : > { %v3164_v62 = vor.u32 %v3162_v14, %v3161_v30  ;;  %v3166_v53 = vrot.slane %v3161_v30, 4  ;;  %v3155_v21 = vor.u32 %v3153_v20, %v3152_v1  ;;  %v3157_v11 = vrot.slane %v3152_v1, 4  ;;  %v3542_v16 = vpop.permute.xlu1 %3541  ;;  %v3530_v15 = vpop.permute.xlu0 %3529  ;;  %v2903_v1 = vld [vmem:[#allocation3] sm:$0xf] }
 0xebc   : > { %v3610_v41 = vrot.slane %v3514_v4, 7  ;;  %v3550_v17 = vrot.slane %v3542_v16, %v8031_v9  ;;  %v3538_v60 = vrot.slane %v3530_v15, %v8031_v9  ;;  %v3614_v36 = vrot.slane %v3612_v33, 4 }
 0xebd   : > { %v8105_v58 = vsel %vm7852_vm12, %v3166_v53, %v3173_v37  ;;  %v3227_v19 = vmul.bf16 %v3201_v0, %v8096_v50  ;;  %v5871_v54 = vcombine.low %v3225_v40, %v3226_v49  ;;  %v3156_v5 = vsel %vm7852_vm12, %v3148_v26, %v3155_v21  ;;  %v8138_v40 = vld [vmem:[#allocation3 + $0xc] sm:$0xf] }
 0xebe   : > { %v3611_v61 = vrot.slane %v3610_v41, 4  ;;  %v3618_v13 = vrot.slane %v3550_v17, 7  ;;  %v3615_v8 = vrot.slane %v3538_v60, 7  ;;  %v8118_v6 = vsel %vm7852_vm12, %v3157_v11, %v3164_v62 }
 0xebf   : > { %v3642_v51 = vmul.bf16 %v3610_v41, %v3493_v31  ;;  %v3566_v23 = vpop.permute.xlu1 %3565  ;;  %v3554_v22 = vpop.permute.xlu0 %3553  ;;  %v5872_v52 = vcombine.low %v3227_v19, %v3228_v35  ;;  %v3275_v7 = vshll.u32 %v5871_v54, 16  ;;  %v3279_v42 = vshrl.u32 %v5871_v54, 16  ;;  %v2906_v54 = vld [vmem:[#allocation3 + $0xc] sm:$0xf] }
 0xec0   : > { %v3613_v37 = vsel %vm8109_vm3, %v3611_v61, %v3612_v33  ;;  %v3616_v0 = vsel %vm8109_vm3, %v3614_v36, %v3615_v8  ;;  %v3617_v44 = vrot.slane %v3615_v8, 4  ;;  %v3574_v39 = vrot.slane %v3566_v23, %v8031_v9 }
 0xec1   : > { %v3643_v38 = vmul.bf16 %v3613_v37, %v8120_v45  ;;  %v3562_v47 = vrot.slane %v3554_v22, %v8031_v9  ;;  %v5873_v18 = vcombine.low %v3229_v59, %v3229_v59  ;;  %v3620_v26 = vrot.slane %v3618_v13, 4 }
 0xec2   : > { %v3619_v46 = vsel %vm8109_vm3, %v3617_v44, %v3618_v13  ;;  %v8133_v57 = vrot.slane %v3275_v7, 1  ;;  %v3283_v32 = vshll.u32 %v5872_v52, 16  ;;  %v3644_v34 = vmul.bf16 %v3616_v0, %v8129_v25  ;;  %v2905_v13 = vld [vmem:[#allocation3 + $0x8] sm:$0xf] }
 0xec3   : > { %v8135_v29 = vcombine.low %v3642_v51, %v3643_v38  ;;  %v3621_v14 = vrot.slane %v3562_v47, 7  ;;  %v2934_v20 = vpop.permute.xlu1 %2933  ;;  %v2922_v30 = vpop.permute.xlu0 %2921  ;;  %v3287_v4 = vshrl.u32 %v5872_v52, 16  ;;  %v3645_v53 = vmul.bf16 %v3619_v46, %v8138_v40  ;;  %v6832_v38 = vld [vmem:[%s8615_s30] sm:$0xff]  }
 0xec4   : > { %v3281_v33 = vor.u32 %v3279_v42, %v8133_v57  ;;  %v3285_v49 = vrot.slane %v3283_v32, 1  ;;  %v2942_v35 = vrot.slane %v2934_v20, %v8031_v9  ;;  %v2930_v62 = vrot.slane %v2922_v30, %v8031_v9 }
 0xec5   : > { %v3624_v21 = vrot.slane %v3574_v39, 7  ;;  %v3622_v11 = vsel %vm8109_vm3, %v3620_v26, %v3621_v14  ;;  %v3623_v16 = vrot.slane %v3621_v14, 4  ;;  %v3291_v36 = vshll.u32 %v5873_v18, 16 }
 0xec6   : > { %v3646_v15 = vmul.bf16 %v3622_v11, %v8081_v48  ;;  %v3286_v59 = vsel %vm3258_vm1, %v3281_v33, %v3285_v49  ;;  %v3016_v31 = vmul.bf16 %v2942_v35, %v2904_v27  ;;  %v3015_v41 = vmul.bf16 %v2930_v62, %v2903_v1 }
 0xec7   : > { %v3625_v17 = vsel %vm8109_vm3, %v3623_v16, %v3624_v21  ;;  %6425 = vmatprep.mubr.msk.bf16.mxu1 %vm868_vm2, %v3286_v59  ;;  %v3289_v60 = vor.u32 %v3287_v4, %v3285_v49  ;;  %v2958_v19 = vpop.permute.xlu1 %2957  ;;  %v2946_v61 = vpop.permute.xlu0 %2945  ;;  %v3222_v8 = vmul.bf16 %v3156_v5, %v8120_v45  ;;  %v3223_v52 = vmul.bf16 %v8118_v6, %v8129_v25  ;;  %v6836_v4 = vld [vmem:[%s8615_s30 + $0x38] sm:$0xff]  }
 0xec8   : > { %v3647_v51 = vmul.bf16 %v3625_v17, %v8083_v55  ;;  %v2966_v23 = vrot.slane %v2958_v19, %v8031_v9  ;;  %v2954_v22 = vrot.slane %v2946_v61, %v8031_v9  ;;  %v3293_v7 = vrot.slane %v3291_v36, 1 }
 0xec9   : > { %v3224_v37 = vmul.bf16 %v8105_v58, %v8138_v40  ;;  %v5869_v0 = vcombine.low %v3221_v2, %v3222_v8  ;;  %v5880_v44 = vcombine.low %v3015_v41, %v3016_v31  ;;  %v8165_v39 = vcombine.low %v3644_v34, %v3645_v53 }
 0xeca   : > { %v3018_v42 = vmul.bf16 %v2966_v23, %v2906_v54  ;;  %v3017_v5 = vmul.bf16 %v2954_v22, %v2905_v13  ;;  %v3294_v47 = vsel %vm3258_vm1, %v3289_v60, %v3293_v7  ;;  %v8168_v58 = vcombine.low %v3646_v15, %v3647_v51  ;;  %v6833_v54 = vld [vmem:[%s8615_s30 + $0x20] sm:$0xff]  }
 0xecb   : > { %v5870_v6 = vcombine.low %v3223_v52, %v3224_v37  ;;  %v3262_v18 = vshll.u32 %v5869_v0, 16  ;;  %v3590_v26 = vpop.permute.xlu1 %3589  ;;  %v3578_v46 = vpop.permute.xlu0 %3577  ;;  %v3680_v56 = vrot.slane %v8135_v29, 1  ;;  %6426 = vmatmul.mubr.msk.bf16.vlgmr.msra.gmra.mxu1 %vm868_vm2, %v3294_v47  ;;  %v3260_v32 = vshrl.u32 %v5869_v0, 16  ;;  %v6837_v52 = vld [vmem:[%s8615_s30 + $0x30] sm:$0xff]   ;;  %v4022_v47 = vld [vmem:[#allocation3 + $0x4] sm:$0xf] }
 0xecc   : > { %v3598_v12 = vrot.slane %v3590_v26, %v8031_v9  ;;  %v3586_v2 = vrot.slane %v3578_v46, %v8031_v9  ;;  %6430 = vmatpush3.bf16.msra.mxu1 %v7874_v63  ;;  %6433 = vmatprep.mubr.msk.bf16.mxu1 %vm868_vm2, %v5880_v44  ;;  %v3681_v20 = vrot.slane %v8165_v39, 1  ;;  %v3626_v27 = vrot.slane %v3624_v21, 4  ;;  %v8217_v46 = vld [vmem:[#allocation3 + $0x8] sm:$0xf] }
 0xecd   : > { %v3264_v34 = vrot.slane %v3262_v18, 1  ;;  %v3267_v14 = vshll.u32 %v5870_v6, 16  ;;  %v5881_v30 = vcombine.low %v3017_v5, %v3018_v42  ;;  %6431 = vmatprep.subr.bf16.mxu1 %v6832_v38  ;;  %v3271_v35 = vshrl.u32 %v5870_v6, 16 }
 0xece   : > { %v3630_v29 = vrot.slane %v3598_v12, 7  ;;  %v3627_v1 = vrot.slane %v3586_v2, 7  ;;  %v3683_v53 = vrot.slane %v8168_v58, 1  ;;  %v3682_v41 = vsel %vm3679_vm4, %v3680_v56, %v3681_v20 }
 0xecf   : > { %v3265_v33 = vor.u32 %v3264_v34, %v3260_v32  ;;  %v3269_v49 = vrot.slane %v3267_v14, 1  ;;  %v4055_v63 = vpop.permute.xlu1 %4054  ;;  %v4043_v62 = vpop.permute.xlu0 %4042  ;;  %v8222_v14 = vld [vmem:[%s8615_s30 + $0x58] sm:$0xff]  }
 0xed0   : > { %v3632_v11 = vrot.slane %v3630_v29, 4  ;;  %v3628_v16 = vsel %vm8109_vm3, %v3626_v27, %v3627_v1  ;;  %v3629_v21 = vrot.slane %v3627_v1, 4  ;;  %v4063_v15 = vrot.slane %v4055_v63, %v8031_v9  ;;  %6432 = vmatpush3.bf16.msra.mxu1 %v6832_v38 }
 0xed1   : > { %v3270_v59 = vsel %vm3258_vm1, %v3265_v33, %v3269_v49  ;;  %v3273_v31 = vor.u32 %v3271_v35, %v3269_v49  ;;  %v4051_v17 = vrot.slane %v4043_v62, %v8031_v9  ;;  %v3648_v19 = vmul.bf16 %v3628_v16, %v8096_v50  ;;  %6453 = vmatprep.subr.bf16.mxu1 %v6836_v4 }
 0xed2   : > { %6421 = vmatprep.mubr.msk.bf16.mxu0 %vm868_vm2, %v3270_v59  ;;  %v3650_v60 = vmul.bf16 %v3632_v11, %v8090_v3  ;;  %v3631_v36 = vsel %vm8109_vm3, %v3629_v21, %v3630_v29  ;;  %v4145_v61 = vshrl.u32 %v4063_v15, 16  ;;  %v4148_v51 = vshll.u32 %v4063_v15, 16  ;;  %v8230_v11 = vld [vmem:[#allocation3 + $0xc] sm:$0xf]  ;;  %v6835_v21 = vld [vmem:[%s8615_s30 + $0x40] sm:$0xff]  }
 0xed3   : > { %v3278_v13 = vsel %vm3258_vm1, %v3273_v31, %v8133_v57  ;;  %v3649_v8 = vmul.bf16 %v3631_v36, %v8085_v43  ;;  %v4137_v23 = vshrl.u32 %v4051_v17, 16  ;;  %v4079_v22 = vpop.permute.xlu1 %4078  ;;  %v4067_v3 = vpop.permute.xlu0 %4066  ;;  %6434 = vmatmul.mubr.msk.bf16.vlgmr.msra.gmra.mxu1 %vm868_vm2, %v5881_v30  ;;  %v4140_v42 = vshll.u32 %v4051_v17, 16  ;;  %v8235_v59 = vld [vmem:[#allocation3 + $0x10] sm:$0xf] }
 0xed4   : > { %6422 = vmatmul.mubr.msk.bf16.vlgmr.msra.gmra.mxu0 %vm868_vm2, %v3278_v13  ;;  %v5906_v7 = vcombine.low %v3650_v60, %v3650_v60  ;;  %v4147_v37 = vrot.slane %v4145_v61, 7  ;;  %v4087_v0 = vrot.slane %v4079_v22, %v8031_v9  ;;  %v4075_v57 = vrot.slane %v4067_v3, %v8031_v9  ;;  %6454 = vmatpush3.bf16.msra.mxu1 %v6836_v4  ;;  %v8248_v22 = vld [vmem:[#allocation3 + $0x14] sm:$0xf] }
 0xed5   : > { %6442 = vmatpush3.bf16.msra.mxu0 %v7897_v24  ;;  %6445 = vmatprep.mubr.msk.bf16.mxu0 %vm868_vm2, %v3682_v41  ;;  %v4139_v44 = vrot.slane %v4137_v23, 7  ;;  %v8207_v5 = vcombine.low %v3648_v19, %v3649_v8  ;;  %v3684_v6 = vsel %vm3679_vm4, %v3681_v20, %v3683_v53  ;;  %v6834_v24 = vld [vmem:[%s8615_s30 + $0x48] sm:$0xff]   ;;  %v2908_v8 = vld [vmem:[#allocation3 + $0x14] sm:$0xf] }
 0xed6   : > { %v8209_v38 = vrot.slane %v5906_v7, 1  ;;  %6443 = vmatprep.subr.bf16.mxu0 %v6833_v54  ;;  %v4150_v39 = vor.u32 %v4148_v51, %v4147_v37  ;;  %v4163_v18 = vshrl.u32 %v4087_v0, 16  ;;  %v4152_v26 = vrot.slane %v4147_v37, 4  ;;  %6455 = vmatprep.subr.bf16.mxu1 %v6837_v52 }
 0xed7   : > { %v4142_v56 = vor.u32 %v4140_v42, %v4139_v44  ;;  %v4143_v12 = vrot.slane %v4139_v44, 4  ;;  %v4154_v2 = vshrl.u32 %v4075_v57, 16  ;;  %v4103_v32 = vpop.permute.xlu1 %4102  ;;  %v4091_v34 = vpop.permute.xlu0 %4090  ;;  %v4166_v27 = vshll.u32 %v4087_v0, 16  ;;  %v8255_v0 = vld [vmem:[#allocation3 + $0x18] sm:$0xf]  ;;  %v8260_v44 = vld [vmem:[%s8615_s30 + $0x68] sm:$0xff]  }
 0xed8   : > { %v4165_v20 = vrot.slane %v4163_v18, 7  ;;  %v4111_v30 = vrot.slane %v4103_v32, %v8031_v9  ;;  %v4099_v29 = vrot.slane %v4091_v34, %v8031_v9  ;;  %v4157_v33 = vshll.u32 %v4075_v57, 16  ;;  %6456 = vmatpush3.bf16.msra.mxu1 %v6837_v52  ;;  %v2907_v57 = vld [vmem:[#allocation3 + $0x10] sm:$0xf]  ;;  %v2910_v18 = vld [vmem:[#allocation3 + $0x1c] sm:$0xf] }
 0xed9   : > { %6444 = vmatpush3.bf16.msra.mxu0 %v6833_v54  ;;  %v4151_v1 = vsel %vm7852_vm12, %v4143_v12, %v4150_v39  ;;  %v4156_v4 = vrot.slane %v4154_v2, 7  ;;  %v3685_v49 = vrot.slane %v8207_v5, 1  ;;  %v4216_v35 = vmul.bf16 %v4142_v56, %v4022_v47  ;;  %6477 = vmatprep.subr.bf16.mxu1 %v8222_v14 }
 0xeda   : > { %v4217_v63 = vmul.bf16 %v4151_v1, %v8217_v46  ;;  %v4168_v62 = vor.u32 %v4166_v27, %v4165_v20  ;;  %v4181_v16 = vshrl.u32 %v4111_v30, 16  ;;  %6465 = vmatprep.subr.bf16.mxu0 %v6834_v24  ;;  %v4170_v15 = vrot.slane %v4165_v20, 4 }
 0xedb   : > { %v4159_v31 = vor.u32 %v4157_v33, %v4156_v4  ;;  %v4161_v41 = vrot.slane %v4156_v4, 4  ;;  %v4172_v17 = vshrl.u32 %v4099_v29, 16  ;;  %v2982_v60 = vpop.permute.xlu1 %2981  ;;  %v2970_v36 = vpop.permute.xlu0 %2969  ;;  %v4184_v54 = vshll.u32 %v4111_v30, 16 }
 0xedc   : > { %6446 = vmatmul.mubr.msk.bf16.vlgmr.msra.gmra.mxu0 %vm868_vm2, %v3684_v6  ;;  %v8239_v19 = vrot.slane %v4181_v16, 7  ;;  %v4175_v61 = vshll.u32 %v4099_v29, 16  ;;  %v3686_v13 = vsel %vm3679_vm4, %v3683_v53, %v3685_v49  ;;  %v2990_v52 = vrot.slane %v2982_v60, %v8031_v9 }
 0xedd   : > { %v4160_v51 = vsel %vm7852_vm12, %v4152_v26, %v4159_v31  ;;  %v4169_v23 = vsel %vm7852_vm12, %v4161_v41, %v4168_v62  ;;  %v4174_v3 = vrot.slane %v4172_v17, 7  ;;  %6449 = vmatprep.mubr.msk.bf16.mxu0 %vm868_vm2, %v3686_v13  ;;  %6466 = vmatpush3.bf16.msra.mxu0 %v6834_v24  ;;  %v5947_v7 = vcombine.low %v4216_v35, %v4217_v63  ;;  %v2909_v26 = vld [vmem:[#allocation3 + $0x18] sm:$0xf] }
 0xede   : > { %v4218_v58 = vmul.bf16 %v4160_v51, %v8230_v11  ;;  %v4219_v53 = vmul.bf16 %v4169_v23, %v8235_v59  ;;  %v4186_v37 = vor.u32 %v4184_v54, %v8239_v19  ;;  %6467 = vmatprep.subr.bf16.mxu0 %v6835_v21  ;;  %v3020_v39 = vmul.bf16 %v2990_v52, %v2908_v8 }
 0xedf   : > { %v4177_v42 = vor.u32 %v4175_v61, %v4174_v3  ;;  %v4179_v5 = vrot.slane %v4174_v3, 4  ;;  %v2978_v47 = vrot.slane %v2970_v36, %v8031_v9  ;;  %v3006_v6 = vpop.permute.xlu1 %3005  ;;  %v2994_v24 = vpop.permute.xlu0 %2993  ;;  %v3688_v27 = vsel %vm3679_vm4, %v3685_v49, %v8209_v38 }
 0xee0   : > { %v3014_v56 = vrot.slane %v3006_v6, %v8031_v9  ;;  %v3002_v12 = vrot.slane %v2994_v24, %v8031_v9  ;;  %v5948_v2 = vcombine.low %v4218_v58, %v4219_v53  ;;  %v4256_v62 = vshll.u32 %v5947_v7, 16  ;;  %v8290_v24 = vld [vmem:[#allocation3 + $0x20] sm:$0xf] }
 0xee1   : > { %v4178_v32 = vsel %vm7852_vm12, %v4170_v15, %v4177_v42  ;;  %v4187_v34 = vsel %vm7852_vm12, %v4179_v5, %v4186_v37  ;;  %v3019_v20 = vmul.bf16 %v2978_v47, %v2907_v57  ;;  %6468 = vmatpush3.bf16.msra.mxu0 %v6835_v21  ;;  %v4254_v31 = vshrl.u32 %v5947_v7, 16  ;;  %v8285_v57 = vld [vmem:[#allocation3 + $0x24] sm:$0x1]  ;;  %v8287_v42 = vld [vmem:[#allocation3 + $0x1c] sm:$0xf] }
 0xee2   : > { %v4220_v30 = vmul.bf16 %v4178_v32, %v8248_v22  ;;  %v4221_v29 = vmul.bf16 %v4187_v34, %v8255_v0  ;;  %v3022_v1 = vmul.bf16 %v3014_v56, %v2910_v18  ;;  %v3021_v4 = vmul.bf16 %v3002_v12, %v2909_v26  ;;  %6489 = vmatprep.subr.bf16.mxu0 %v8260_v44 }
 0xee3   : > { %v5882_v33 = vcombine.low %v3019_v20, %v3020_v39  ;;  %v4127_v35 = vpop.permute.xlu1 %4126  ;;  %v4115_v63 = vpop.permute.xlu0 %4114  ;;  %v4261_v16 = vshll.u32 %v5948_v2, 16  ;;  %v4258_v41 = vrot.slane %v4256_v62, 1  ;;  %v4265_v54 = vshrl.u32 %v5948_v2, 16  ;;  %v8314_v62 = vld [vmem:[%s8615_s30 + $0x88] sm:$0xff]  }
 0xee4   : > { %v8274_v15 = vcombine.low %v4220_v30, %v4221_v29  ;;  %6450 = vmatmul.mubr.msk.bf16.gmra.mxu0 %vm868_vm2, %v3688_v27  ;;  %v4135_v38 = vrot.slane %v4127_v35, %v8031_v9  ;;  %v4123_v49 = vrot.slane %v4115_v63, %v8031_v9  ;;  %v5883_v21 = vcombine.low %v3021_v4, %v3022_v1 }
 0xee5   : > { %6437 = vmatprep.mubr.msk.bf16.mxu1 %vm868_vm2, %v5882_v33  ;;  %v4263_v17 = vrot.slane %v4261_v16, 1  ;;  %v4259_v8 = vor.u32 %v4258_v41, %v4254_v31  ;;  %v4188_v37 = vrot.slane %v8239_v19, 4  ;;  %v6841_v19 = vld [vmem:[%s8615_s30 + $0x60] sm:$0xff]  }
 0xee6   : > { %v4199_v60 = vshrl.u32 %v4135_v38, 16  ;;  %v4190_v36 = vshrl.u32 %v4123_v49, 16  ;;  %6438 = vmatmul.mubr.msk.bf16.gmra.mxu1 %vm868_vm2, %v5883_v21  ;;  %v4202_v61 = vshll.u32 %v4135_v38, 16  ;;  %v4193_v13 = vshll.u32 %v4123_v49, 16 }
 0xee7   : > { %v3811_v51 = vpop.permute.xlu1 %3810  ;;  %v3799_v23 = vpop.permute.xlu0 %3798  ;;  %v4269_v3 = vshll.u32 %v8274_v15, 16  ;;  %v4264_v5 = vsel %vm3258_vm1, %v4259_v8, %v4263_v17  ;;  %v4267_v39 = vor.u32 %v4265_v54, %v4263_v17 }
 0xee8   : > { %v4201_v52 = vrot.slane %v4199_v60, 7  ;;  %v4192_v58 = vrot.slane %v4190_v36, 7  ;;  %v3819_v53 = vrot.slane %v3811_v51, %v8031_v9  ;;  %v3807_v7 = vrot.slane %v3799_v23, %v8031_v9  ;;  %6469 = vmatprep.mubr.msk.bf16.mxu0 %vm868_vm2, %v4264_v5  ;;  %v6839_v36 = vld [vmem:[%s8615_s30 + $0x50] sm:$0xff]  }
 0xee9   : > { %v4271_v47 = vrot.slane %v4269_v3, 1 }
 0xeea   : > { %v4204_v6 = vor.u32 %v4202_v61, %v4201_v52  ;;  %v4206_v18 = vrot.slane %v4201_v52, 4  ;;  %v4195_v26 = vor.u32 %v4193_v13, %v4192_v58  ;;  %v4197_v56 = vrot.slane %v4192_v58, 4 }
 0xeeb   : > { %v3893_v12 = vmul.bf16 %v3819_v53, %v8129_v25  ;;  %v3892_v2 = vmul.bf16 %v3807_v7, %v8120_v45  ;;  %v4272_v32 = vsel %vm3258_vm1, %v4267_v39, %v4271_v47  ;;  %v3835_v34 = vpop.permute.xlu1 %3834  ;;  %v3823_v20 = vpop.permute.xlu0 %3822  ;;  %v8335_v53 = vld [vmem:[%s8615_s30 + $0x78] sm:$0xff]  }
 0xeec   : > { %v4224_v27 = vmul.bf16 %v4206_v18, %v8285_v57  ;;  %v4196_v30 = vsel %vm7852_vm12, %v4188_v37, %v4195_v26  ;;  %v4205_v29 = vsel %vm7852_vm12, %v4197_v56, %v4204_v6  ;;  %6470 = vmatmul.mubr.msk.bf16.vlgmr.msra.gmra.mxu0 %vm868_vm2, %v4272_v32  ;;  %v3843_v1 = vrot.slane %v3835_v34, %v8031_v9  ;;  %v4386_v34 = vld [vmem:[#allocation3 + $0x4] sm:$0xe] }
 0xeed   : > { %v4222_v25 = vmul.bf16 %v4196_v30, %v8287_v42  ;;  %v4223_v45 = vmul.bf16 %v4205_v29, %v8290_v24  ;;  %v3831_v4 = vrot.slane %v3823_v20, %v8031_v9  ;;  %v5925_v33 = vcombine.low %v3892_v2, %v3893_v12  ;;  %6490 = vmatpush3.bf16.msra.mxu0 %v8260_v44  ;;  %v3786_v2 = vld [vmem:[#allocation3 + $0x20] sm:$0xf] }
 0xeee   : > { %v3895_v35 = vmul.bf16 %v3843_v1, %v8081_v48  ;;  %v5951_v63 = vcombine.low %v4224_v27, %v4224_v27  ;;  %6491 = vmatprep.subr.bf16.mxu0 %v6841_v19  ;;  %v4273_v48 = vshrl.u32 %v8274_v15, 16 }
 0xeef   : > { %v3894_v16 = vmul.bf16 %v3831_v4, %v8138_v40  ;;  %6457 = vmatprep.mubr.msk.bf16.mxu1 %vm868_vm2, %v5925_v33  ;;  %v3859_v38 = vpop.permute.xlu1 %3858  ;;  %v3847_v49 = vpop.permute.xlu0 %3846  ;;  %v5950_v21 = vcombine.low %v4222_v25, %v4223_v45 }
 0xef0   : > { %v3867_v31 = vrot.slane %v3859_v38, %v8031_v9  ;;  %v3855_v44 = vrot.slane %v3847_v49, %v8031_v9  ;;  %v4285_v60 = vshll.u32 %v5951_v63, 16  ;;  %v4275_v8 = vor.u32 %v4273_v48, %v4271_v47 }
 0xef1   : > { %v5926_v41 = vcombine.low %v3894_v16, %v3895_v35  ;;  %v4277_v17 = vshll.u32 %v5950_v21, 16  ;;  %6492 = vmatpush3.bf16.msra.mxu0 %v6841_v19  ;;  %v4281_v15 = vshrl.u32 %v5950_v21, 16 }
 0xef2   : > { %v3897_v40 = vmul.bf16 %v3867_v31, %v8096_v50  ;;  %v3896_v54 = vmul.bf16 %v3855_v44, %v8083_v55  ;;  %6513 = vmatprep.subr.bf16.mxu0 %v8314_v62  ;;  %v4287_v55 = vrot.slane %v4285_v60, 1 }
 0xef3   : > { %6458 = vmatmul.mubr.msk.bf16.vlgmr.msra.gmra.mxu1 %vm868_vm2, %v5926_v41  ;;  %v4411_v61 = vpop.permute.xlu1 %4410  ;;  %v4399_v13 = vpop.permute.xlu0 %4398  ;;  %v4279_v51 = vrot.slane %v4277_v17, 1 }
 0xef4   : > { %v4419_v23 = vrot.slane %v4411_v61, %v8031_v9  ;;  %v4407_v3 = vrot.slane %v4399_v13, %v8031_v9  ;;  %v5927_v52 = vcombine.low %v3896_v54, %v3897_v40  ;;  %6478 = vmatpush3.bf16.msra.mxu1 %v8222_v14 }
 0xef5   : > { %v4280_v50 = vsel %vm3258_vm1, %v4275_v8, %v4279_v51  ;;  %v4283_v58 = vor.u32 %v4281_v15, %v4279_v51  ;;  %6479 = vmatprep.subr.bf16.mxu1 %v6839_v36 }
 0xef6   : > { %v4500_v7 = vrot.slane %v4407_v3, 7  ;;  %6461 = vmatprep.mubr.msk.bf16.mxu1 %vm868_vm2, %v5927_v52  ;;  %6473 = vmatprep.mubr.msk.bf16.mxu0 %vm868_vm2, %v4280_v50  ;;  %v4502_v14 = vrot.slane %v4419_v23, 7 }
 0xef7   : > { %v3871_v37 = vpop.permute.xlu1 %3870  ;;  %v4423_v5 = vpop.permute.xlu0 %4422  ;;  %v4288_v39 = vsel %vm3258_vm1, %v4283_v58, %v4287_v55 }
 0xef8   : > { %v4501_v47 = vrot.slane %v4500_v7, 4  ;;  %6474 = vmatmul.mubr.msk.bf16.gmra.mxu0 %vm868_vm2, %v4288_v39  ;;  %6480 = vmatpush3.bf16.msra.mxu1 %v6839_v36  ;;  %v4431_v6 = vrot.slane %v4423_v5, %v8031_v9  ;;  %v3879_v26 = vrot.slane %v3871_v37, %v8031_v9  ;;  %v4504_v32 = vrot.slane %v4502_v14, 4 }
 0xef9   : > { %6501 = vmatprep.subr.bf16.mxu1 %v8335_v53  ;;  %v4532_v4 = vmul.bf16 %v4500_v7, %v4386_v34 }
 0xefa   : > { %v4503_v18 = vsel %vm8109_vm3, %v4501_v47, %v4502_v14  ;;  %v4505_v56 = vrot.slane %v4431_v6, 7  ;;  %v3898_v33 = vmul.bf16 %v3879_v26, %v8085_v43 }
 0xefb   : > { %v4435_v19 = vpop.permute.xlu1 %4434  ;;  %v3883_v12 = vpop.permute.xlu0 %3882  ;;  %v4533_v30 = vmul.bf16 %v4503_v18, %v8217_v46 }
 0xefc   : > { %v4443_v20 = vrot.slane %v4435_v19, %v8031_v9  ;;  %v3891_v27 = vrot.slane %v3883_v12, %v8031_v9  ;;  %v4506_v29 = vsel %vm8109_vm3, %v4504_v32, %v4505_v56  ;;  %v4507_v1 = vrot.slane %v4505_v56, 4 }
 0xefd   : > { %v5970_v21 = vcombine.low %v4532_v4, %v4533_v30  ;;  %v4534_v31 = vmul.bf16 %v4506_v29, %v8230_v11 }
 0xefe   : > { %v4508_v25 = vrot.slane %v4443_v20, 7  ;;  %v3899_v45 = vmul.bf16 %v3891_v27, %v3786_v2 }
 0xeff   : > { %v4459_v35 = vpop.permute.xlu1 %4458  ;;  %v4447_v63 = vpop.permute.xlu0 %4446  ;;  %v4569_v8 = vrot.slane %v5970_v21, 1 }
 0xf00   : > { %v4509_v16 = vsel %vm8109_vm3, %v4507_v1, %v4508_v25  ;;  %v4467_v38 = vrot.slane %v4459_v35, %v8031_v9  ;;  %v4455_v49 = vrot.slane %v4447_v63, %v8031_v9  ;;  %v5928_v41 = vcombine.low %v3898_v33, %v3899_v45 }
 0xf01   : > { %v4535_v44 = vmul.bf16 %v4509_v16, %v8235_v59  ;;  %v4510_v48 = vrot.slane %v4508_v25, 4 }
 0xf02   : > { %v4511_v17 = vrot.slane %v4455_v49, 7  ;;  %6462 = vmatmul.mubr.msk.bf16.gmra.mxu1 %vm868_vm2, %v5928_v41  ;;  %v4514_v40 = vrot.slane %v4467_v38, 7 }
 0xf03   : > { %v4483_v43 = vpop.permute.xlu1 %4482  ;;  %v4471_v60 = vpop.permute.xlu0 %4470  ;;  %v5971_v36 = vcombine.low %v4534_v31, %v4535_v44 }
 0xf04   : > { %v4512_v54 = vsel %vm8109_vm3, %v4510_v48, %v4511_v17  ;;  %v4513_v61 = vrot.slane %v4511_v17, 4  ;;  %v4491_v13 = vrot.slane %v4483_v43, %v8031_v9  ;;  %v4479_v51 = vrot.slane %v4471_v60, %v8031_v9  ;;  %v4911_v48 = vld [vmem:[#allocation3 + $0x8] sm:$0xf] }
 0xf05   : > { %v4570_v15 = vrot.slane %v5971_v36, 1  ;;  %v4536_v52 = vmul.bf16 %v4512_v54, %v8248_v22  ;;  %v4516_v5 = vrot.slane %v4514_v40, 4 }
 0xf06   : > { %v4515_v23 = vsel %vm8109_vm3, %v4513_v61, %v4514_v40  ;;  %v4520_v3 = vrot.slane %v4491_v13, 7  ;;  %v4517_v58 = vrot.slane %v4479_v51, 7  ;;  %v8391_v40 = vld [vmem:[#allocation3 + $0xc] sm:$0xf] }
 0xf07   : > { %v4537_v50 = vmul.bf16 %v4515_v23, %v8255_v0  ;;  %v4700_v55 = vpop.permute.xlu1 %4699  ;;  %v4688_v7 = vpop.permute.xlu0 %4687  ;;  %v4571_v37 = vsel %vm3679_vm4, %v4569_v8, %v4570_v15 }
 0xf08   : > { %v4522_v39 = vrot.slane %v4520_v3, 4  ;;  %v4708_v14 = vrot.slane %v4700_v55, %v8031_v9  ;;  %v4696_v47 = vrot.slane %v4688_v7, %v8031_v9  ;;  %6481 = vmatprep.mubr.msk.bf16.mxu1 %vm868_vm2, %v4571_v37  ;;  %v4519_v18 = vrot.slane %v4517_v58, 4 }
 0xf09   : > { %v5972_v6 = vcombine.low %v4536_v52, %v4537_v50  ;;  %v4518_v56 = vsel %vm8109_vm3, %v4516_v5, %v4517_v58  ;;  %v6845_v50 = vld [vmem:[%s8615_s30 + $0x80] sm:$0xff]  }
 0xf0a   : > { %v4540_v26 = vmul.bf16 %v4522_v39, %v8285_v57  ;;  %v4782_v19 = vmul.bf16 %v4708_v14, %v8230_v11  ;;  %v4781_v12 = vmul.bf16 %v4696_v47, %v8217_v46  ;;  %v4521_v32 = vsel %vm8109_vm3, %v4519_v18, %v4520_v3  ;;  %v6843_v57 = vld [vmem:[%s8615_s30 + $0x70] sm:$0xff]  }
 0xf0b   : > { %v4572_v2 = vrot.slane %v5972_v6, 1  ;;  %v4944_v34 = vpop.permute.xlu1 %4943  ;;  %v4932_v20 = vpop.permute.xlu0 %4931  ;;  %v4539_v27 = vmul.bf16 %v4521_v32, %v8290_v24  ;;  %v4538_v11 = vmul.bf16 %v4518_v56, %v8287_v42 }
 0xf0c   : > { %v4952_v30 = vrot.slane %v4944_v34, %v8031_v9  ;;  %v4940_v29 = vrot.slane %v4932_v20, %v8031_v9  ;;  %v5974_v1 = vcombine.low %v4540_v26, %v4540_v26  ;;  %v5993_v25 = vcombine.low %v4781_v12, %v4782_v19  ;;  %v8411_v12 = vld [vmem:[#allocation3 + $0x14] sm:$0xf]  ;;  %v8413_v34 = vld [vmem:[#allocation3 + $0x10] sm:$0xf] }
 0xf0d   : > { %v4573_v46 = vsel %vm3679_vm4, %v4570_v15, %v4572_v2  ;;  %v5973_v38 = vcombine.low %v4538_v11, %v4539_v27 }
 0xf0e   : > { %v5034_v45 = vshrl.u32 %v4952_v30, 16  ;;  %v5026_v4 = vshrl.u32 %v4940_v29, 16  ;;  %6482 = vmatmul.mubr.msk.bf16.vlgmr.msra.gmra.mxu1 %vm868_vm2, %v4573_v46  ;;  %v5037_v33 = vshll.u32 %v4952_v30, 16  ;;  %v5029_v35 = vshll.u32 %v4940_v29, 16  ;;  %6493 = vmatprep.mubr.msk.bf16.mxu0 %vm868_vm2, %v5993_v25 }
 0xf0f   : > { %v4724_v63 = vpop.permute.xlu1 %4723  ;;  %v4712_v16 = vpop.permute.xlu0 %4711  ;;  %6502 = vmatpush3.bf16.msra.mxu1 %v8335_v53  ;;  %v4576_v41 = vrot.slane %v5974_v1, 1  ;;  %v4574_v17 = vrot.slane %v5973_v38, 1 }
 0xf10   : > { %v5036_v49 = vrot.slane %v5034_v45, 7  ;;  %v5028_v21 = vrot.slane %v5026_v4, 7  ;;  %v4732_v31 = vrot.slane %v4724_v63, %v8031_v9  ;;  %v4720_v44 = vrot.slane %v4712_v16, %v8031_v9  ;;  %6503 = vmatprep.subr.bf16.mxu1 %v6843_v57 }
 0xf11   : > { %v4575_v53 = vsel %vm3679_vm4, %v4572_v2, %v4574_v17 }
 0xf12   : > { %v5039_v43 = vor.u32 %v5037_v33, %v5036_v49  ;;  %v5031_v60 = vor.u32 %v5029_v35, %v5028_v21  ;;  %v5032_v36 = vrot.slane %v5028_v21, 4  ;;  %v4784_v54 = vmul.bf16 %v4732_v31, %v8248_v22  ;;  %6485 = vmatprep.mubr.msk.bf16.mxu1 %vm868_vm2, %v4575_v53  ;;  %v8428_v31 = vld [vmem:[#allocation3 + $0x18] sm:$0xf] }
 0xf13   : > { %v4783_v61 = vmul.bf16 %v4720_v44, %v8235_v59  ;;  %v4968_v13 = vpop.permute.xlu1 %4967  ;;  %v4956_v8 = vpop.permute.xlu0 %4955  ;;  %6504 = vmatpush3.bf16.msra.mxu1 %v6843_v57  ;;  %v4577_v22 = vsel %vm3679_vm4, %v4574_v17, %v4576_v41  ;;  %v5041_v56 = vrot.slane %v5036_v49, 4  ;;  %v8430_v44 = vld [vmem:[#allocation3 + $0x1c] sm:$0xf] }
 0xf14   : > { %v5040_v51 = vsel %vm7852_vm12, %v5032_v36, %v5039_v43  ;;  %v5105_v15 = vmul.bf16 %v5031_v60, %v4911_v48  ;;  %v4976_v23 = vrot.slane %v4968_v13, %v8031_v9  ;;  %v4964_v3 = vrot.slane %v4956_v8, %v8031_v9 }
 0xf15   : > { %v5994_v52 = vcombine.low %v4783_v61, %v4784_v54  ;;  %v5106_v59 = vmul.bf16 %v5040_v51, %v8391_v40 }
 0xf16   : > { %v5052_v58 = vshrl.u32 %v4976_v23, 16  ;;  %v5043_v55 = vshrl.u32 %v4964_v3, 16  ;;  %6486 = vmatmul.mubr.msk.bf16.gmra.mxu1 %vm868_vm2, %v4577_v22  ;;  %v5055_v7 = vshll.u32 %v4976_v23, 16  ;;  %v5046_v37 = vshll.u32 %v4964_v3, 16 }
 0xf17   : > { %6494 = vmatmul.mubr.msk.bf16.vlgmr.msra.gmra.mxu0 %vm868_vm2, %v5994_v52  ;;  %v4992_v5 = vpop.permute.xlu1 %4991  ;;  %v4980_v39 = vpop.permute.xlu0 %4979  ;;  %v6015_v14 = vcombine.low %v5105_v15, %v5106_v59 }
 0xf18   : > { %v5054_v47 = vrot.slane %v5052_v58, 7  ;;  %v5045_v6 = vrot.slane %v5043_v55, 7  ;;  %v5000_v18 = vrot.slane %v4992_v5, %v8031_v9  ;;  %v4988_v26 = vrot.slane %v4980_v39, %v8031_v9  ;;  %6514 = vmatpush3.bf16.msra.mxu0 %v8314_v62 }
 0xf19   : > { %6515 = vmatprep.subr.bf16.mxu0 %v6845_v50  ;;  %v5145_v20 = vshll.u32 %v6015_v14, 16  ;;  %v5143_v3 = vshrl.u32 %v6015_v14, 16 }
 0xf1a   : > { %v5057_v19 = vor.u32 %v5055_v7, %v5054_v47  ;;  %v5048_v2 = vor.u32 %v5046_v37, %v5045_v6  ;;  %v5050_v32 = vrot.slane %v5045_v6, 4  ;;  %v5070_v27 = vshrl.u32 %v5000_v18, 16 }
 0xf1b   : > { %v5073_v30 = vshll.u32 %v5000_v18, 16  ;;  %v5061_v29 = vshrl.u32 %v4988_v26, 16  ;;  %v5064_v57 = vshll.u32 %v4988_v26, 16  ;;  %v4748_v1 = vpop.permute.xlu1 %4747  ;;  %v4736_v11 = vpop.permute.xlu0 %4735  ;;  %v5059_v49 = vrot.slane %v5054_v47, 4  ;;  %v4675_v26 = vld [vmem:[#allocation3 + $0x24] sm:$0xf] }
 0xf1c   : > { %v5049_v46 = vsel %vm7852_vm12, %v5041_v56, %v5048_v2  ;;  %v5058_v62 = vsel %vm7852_vm12, %v5050_v32, %v5057_v19  ;;  %v4756_v25 = vrot.slane %v4748_v1, %v8031_v9  ;;  %v4744_v45 = vrot.slane %v4736_v11, %v8031_v9  ;;  %6516 = vmatpush3.bf16.msra.mxu0 %v6845_v50 }
 0xf1d   : > { %v5108_v4 = vmul.bf16 %v5058_v62, %v8411_v12  ;;  %v8422_v33 = vrot.slane %v5070_v27, 7  ;;  %v5063_v35 = vrot.slane %v5061_v29, 7  ;;  %v5107_v63 = vmul.bf16 %v5049_v46, %v8413_v34  ;;  %v5275_v27 = vld [vmem:[#allocation3 + $0x8] sm:$0xe] }
 0xf1e   : > { %v4786_v16 = vmul.bf16 %v4756_v25, %v8287_v42  ;;  %v4785_v38 = vmul.bf16 %v4744_v45, %v8255_v0  ;;  %v5147_v61 = vrot.slane %v5145_v20, 1 }
 0xf1f   : > { %v5075_v21 = vor.u32 %v5073_v30, %v8422_v33  ;;  %v5066_v41 = vor.u32 %v5064_v57, %v5063_v35  ;;  %v5068_v48 = vrot.slane %v5063_v35, 4  ;;  %v5300_v17 = vpop.permute.xlu1 %5299  ;;  %v5288_v43 = vpop.permute.xlu0 %5287  ;;  %v6016_v54 = vcombine.low %v5107_v63, %v5108_v4 }
 0xf20   : > { %v5296_v60 = vrot.slane %v5288_v43, %v8031_v9  ;;  %v5995_v36 = vcombine.low %v4785_v38, %v4786_v16  ;;  %v5308_v8 = vrot.slane %v5300_v17, %v8031_v9  ;;  %v5148_v58 = vor.u32 %v5147_v61, %v5143_v3  ;;  %v4917_v3 = vld [vmem:[#allocation3 + $0x20] sm:$0xf] }
 0xf21   : > { %v5067_v42 = vsel %vm7852_vm12, %v5059_v49, %v5066_v41  ;;  %v5076_v0 = vsel %vm7852_vm12, %v5068_v48, %v5075_v21  ;;  %v5150_v52 = vshll.u32 %v6016_v54, 16  ;;  %v5154_v47 = vshrl.u32 %v6016_v54, 16 }
 0xf22   : > { %v5109_v53 = vmul.bf16 %v5067_v42, %v8428_v31  ;;  %v5110_v13 = vmul.bf16 %v5076_v0, %v8430_v44  ;;  %v5389_v51 = vrot.slane %v5296_v60, 7  ;;  %6497 = vmatprep.mubr.msk.bf16.mxu0 %vm868_vm2, %v5995_v36  ;;  %v5391_v7 = vrot.slane %v5308_v8, 7  ;;  %v4919_v8 = vld [vmem:[#allocation3 + $0x28] sm:$0x1] }
 0xf23   : > { %v4760_v15 = vpop.permute.xlu1 %4759  ;;  %v5312_v23 = vpop.permute.xlu0 %5311  ;;  %v5152_v55 = vrot.slane %v5150_v52, 1  ;;  %v5077_v48 = vrot.slane %v8422_v33, 4  ;;  %v4918_v52 = vld [vmem:[#allocation3 + $0x24] sm:$0xf] }
 0xf24   : > { %v8441_v22 = vcombine.low %v5109_v53, %v5110_v13  ;;  %v5390_v59 = vrot.slane %v5389_v51, 4  ;;  %v5320_v50 = vrot.slane %v5312_v23, %v8031_v9  ;;  %v4768_v37 = vrot.slane %v4760_v15, %v8031_v9 }
 0xf25   : > { %v5153_v39 = vsel %vm3258_vm1, %v5148_v58, %v5152_v55  ;;  %v5156_v20 = vor.u32 %v5154_v47, %v5152_v55  ;;  %v5393_v1 = vrot.slane %v5391_v7, 4 }
 0xf26   : > { %v5158_v5 = vshll.u32 %v8441_v22, 16  ;;  %v5392_v14 = vsel %vm8109_vm3, %v5390_v59, %v5391_v7  ;;  %6505 = vmatprep.mubr.msk.bf16.mxu1 %vm868_vm2, %v5153_v39  ;;  %v5394_v32 = vrot.slane %v5320_v50, 7  ;;  %v4787_v30 = vmul.bf16 %v4768_v37, %v8290_v24 }
 0xf27   : > { %v5004_v6 = vpop.permute.xlu1 %5003  ;;  %v4772_v18 = vpop.permute.xlu0 %4771  ;;  %v5422_v11 = vmul.bf16 %v5392_v14, %v8391_v40  ;;  %v5421_v24 = vmul.bf16 %v5389_v51, %v5275_v27 }
 0xf28   : > { %v5012_v56 = vrot.slane %v5004_v6, %v8031_v9  ;;  %v4780_v19 = vrot.slane %v4772_v18, %v8031_v9  ;;  %v8452_v2 = vrot.slane %v5158_v5, 1  ;;  %v5395_v38 = vsel %vm8109_vm3, %v5393_v1, %v5394_v32 }
 0xf29   : > { %v5396_v49 = vrot.slane %v5394_v32, 4  ;;  %v6038_v60 = vcombine.low %v5421_v24, %v5422_v11  ;;  %v5423_v0 = vmul.bf16 %v5395_v38, %v8413_v34 }
 0xf2a   : > { %v5079_v29 = vshrl.u32 %v5012_v56, 16  ;;  %v4788_v57 = vmul.bf16 %v4780_v19, %v4675_v26  ;;  %v5082_v46 = vshll.u32 %v5012_v56, 16  ;;  %v5161_v62 = vsel %vm3258_vm1, %v5156_v20, %v8452_v2 }
 0xf2b   : > { %v5324_v25 = vpop.permute.xlu1 %5323  ;;  %v5016_v45 = vpop.permute.xlu0 %5015  ;;  %6506 = vmatmul.mubr.msk.bf16.vlgmr.msra.gmra.mxu1 %vm868_vm2, %v5161_v62  ;;  %v5458_v7 = vrot.slane %v6038_v60, 1 }
 0xf2c   : > { %v5081_v4 = vrot.slane %v5079_v29, 7  ;;  %v5332_v35 = vrot.slane %v5324_v25, %v8031_v9  ;;  %v5024_v63 = vrot.slane %v5016_v45, %v8031_v9  ;;  %v5996_v16 = vcombine.low %v4787_v30, %v4788_v57 }
 0xf2e   : > { %v5084_v40 = vor.u32 %v5082_v46, %v5081_v4  ;;  %v5397_v21 = vrot.slane %v5332_v35, 7  ;;  %v5088_v41 = vshrl.u32 %v5024_v63, 16  ;;  %6498 = vmatmul.mubr.msk.bf16.gmra.mxu0 %vm868_vm2, %v5996_v16  ;;  %v5091_v42 = vshll.u32 %v5024_v63, 16 }
 0xf2f   : > { %v5348_v17 = vpop.permute.xlu1 %5347  ;;  %v5336_v43 = vpop.permute.xlu0 %5335  ;;  %v5086_v51 = vrot.slane %v5081_v4, 4  ;;  %v5162_v46 = vshrl.u32 %v8441_v22, 16 }
 0xf30   : > { %v5398_v36 = vsel %vm8109_vm3, %v5396_v49, %v5397_v21  ;;  %v5090_v54 = vrot.slane %v5088_v41, 7  ;;  %v5356_v53 = vrot.slane %v5348_v17, %v8031_v9  ;;  %v5344_v13 = vrot.slane %v5336_v43, %v8031_v9 }
 0xf31   : > { %v5424_v61 = vmul.bf16 %v5398_v36, %v8411_v12  ;;  %v5085_v33 = vsel %vm7852_vm12, %v5077_v48, %v5084_v40  ;;  %v5399_v59 = vrot.slane %v5397_v21, 4  ;;  %v5164_v35 = vor.u32 %v5162_v46, %v8452_v2 }
 0xf32   : > { %v5093_v15 = vor.u32 %v5091_v42, %v5090_v54  ;;  %v5095_v23 = vrot.slane %v5090_v54, 4  ;;  %v5403_v50 = vrot.slane %v5356_v53, 7  ;;  %v5400_v58 = vrot.slane %v5344_v13, 7 }
 0xf33   : > { %v5372_v55 = vpop.permute.xlu1 %5371  ;;  %v6039_v34 = vcombine.low %v5423_v0, %v5424_v61  ;;  %v5360_v39 = vpop.permute.xlu0 %5359  ;;  %v5111_v18 = vmul.bf16 %v5085_v33, %v4917_v3 }
 0xf34   : > { %v5094_v12 = vsel %vm7852_vm12, %v5086_v51, %v5093_v15  ;;  %v5113_v37 = vmul.bf16 %v5095_v23, %v4919_v8  ;;  %v5380_v5 = vrot.slane %v5372_v55, %v8031_v9  ;;  %v5401_v47 = vsel %vm8109_vm3, %v5399_v59, %v5400_v58 }
 0xf35   : > { %v5402_v6 = vrot.slane %v5400_v58, 4  ;;  %v5112_v26 = vmul.bf16 %v5094_v12, %v4918_v52  ;;  %v5405_v14 = vrot.slane %v5403_v50, 4  ;;  %v5368_v19 = vrot.slane %v5360_v39, %v8031_v9 }
 0xf36   : > { %v5409_v56 = vrot.slane %v5380_v5, 7  ;;  %v5459_v32 = vrot.slane %v6039_v34, 1  ;;  %v5425_v10 = vmul.bf16 %v5401_v47, %v8428_v31  ;;  %v6019_v30 = vcombine.low %v5113_v37, %v5113_v37 }
 0xf37   : > { %v5404_v20 = vsel %vm8109_vm3, %v5402_v6, %v5403_v50  ;;  %v6018_v27 = vcombine.low %v5111_v18, %v5112_v26  ;;  %v5406_v1 = vrot.slane %v5368_v19, 7 }
 0xf38   : > { %v5426_v29 = vmul.bf16 %v5404_v20, %v8430_v44  ;;  %v5411_v57 = vrot.slane %v5409_v56, 4  ;;  %v5460_v11 = vsel %vm3679_vm4, %v5458_v7, %v5459_v32  ;;  %v5174_v9 = vshll.u32 %v6019_v30, 16 }
 0xf39   : > { %6517 = vmatprep.mubr.msk.bf16.mxu0 %vm868_vm2, %v5460_v11  ;;  %v5166_v62 = vshll.u32 %v6018_v27, 16  ;;  %v5407_v4 = vsel %vm8109_vm3, %v5405_v14, %v5406_v1  ;;  %v5408_v31 = vrot.slane %v5406_v1, 4  ;;  %v5170_v44 = vshrl.u32 %v6018_v27, 16 }
 0xf3a   : > { %v6040_v25 = vcombine.low %v5425_v10, %v5426_v29  ;;  %v5429_v45 = vmul.bf16 %v5411_v57, %v4919_v8  ;;  %v5427_v38 = vmul.bf16 %v5407_v4, %v4917_v3  ;;  %v5176_v21 = vrot.slane %v5174_v9, 1 }
 0xf3b   : > { %v5168_v63 = vrot.slane %v5166_v62, 1  ;;  %v5410_v24 = vsel %vm8109_vm3, %v5408_v31, %v5409_v56 }
 0xf3c   : > { %v5461_v16 = vrot.slane %v6040_v25, 1  ;;  %v5428_v49 = vmul.bf16 %v5410_v24, %v4918_v52  ;;  %v6042_v41 = vcombine.low %v5429_v45, %v5429_v45 }
 0xf3d   : > { %v5169_v22 = vsel %vm3258_vm1, %v5164_v35, %v5168_v63  ;;  %v5172_v40 = vor.u32 %v5170_v44, %v5168_v63 }
 0xf3e   : > { %6509 = vmatprep.mubr.msk.bf16.mxu1 %vm868_vm2, %v5169_v22  ;;  %v5462_v48 = vsel %vm3679_vm4, %v5459_v32, %v5461_v16  ;;  %v6041_v17 = vcombine.low %v5427_v38, %v5428_v49  ;;  %v5465_v43 = vrot.slane %v6042_v41, 1 }
 0xf3f   : > { %6518 = vmatmul.mubr.msk.bf16.vlgmr.msra.gmra.mxu0 %vm868_vm2, %v5462_v48  ;;  %v5177_v2 = vsel %vm3258_vm1, %v5172_v40, %v5176_v21 }
 0xf40   : > { %6510 = vmatmul.mubr.msk.bf16.gmra.mxu1 %vm868_vm2, %v5177_v2  ;;  %v5463_v28 = vrot.slane %v6041_v17, 1 }
 0xf42   : > { %v5464_v60 = vsel %vm3679_vm4, %v5461_v16, %v5463_v28  ;;  %v5466_v36 = vsel %vm3679_vm4, %v5463_v28, %v5465_v43 }
 0xf43   : > { %6521 = vmatprep.mubr.msk.bf16.mxu0 %vm868_vm2, %v5464_v60 }
 0xf47   : > { %6522 = vmatmul.mubr.msk.bf16.gmra.mxu0 %vm868_vm2, %v5466_v36  ;;  %vm5579_vm2 = vcmask 97280  }
 0xf8b   : > { %v6427_v54 = vpop.f32.mrf.mxu1 }
 0xf8d   : > { %v8501_v42 = vpop.f32.mrf.mxu1 }
 0xf8f   : > { %v8503_v0 = vpop.f32.mrf.mxu1 }
 0xf91   : > { %v8505_v61 = vpop.f32.mrf.mxu1 }
 0xf93   : > { %v6435_v13 = vpop.f32.mrf.mxu1 }
 0xf94   : > { %v6423_v53 = vpop.f32.mrf.mxu0 }
 0xf95   : > { %v3462_v33 = vpop.f32.mrf.mxu1  ;;  %v3471_v24 = vadd.f32 %v6435_v13, %v6423_v53 }
 0xf96   : > { %v3353_v8 = vpop.f32.mrf.mxu0 }
 0xf97   : > { %v6436_v15 = vpop.f32.mrf.mxu1  ;;  %v3463_v49 = vadd.f32 %v3462_v33, %v3353_v8 }
 0xf98   : > { %v6424_v51 = vpop.f32.mrf.mxu0 }
 0xf99   : > { %v3465_v3 = vpop.f32.mrf.mxu1  ;;  %v3474_v41 = vadd.f32 %v6436_v15, %v6424_v51 }
 0xf9a   : > { %v3356_v23 = vpop.f32.mrf.mxu0 }
 0xf9b   : > { %v3466_v17 = vadd.f32 %v3465_v3, %v3356_v23 }
 0xf9c   : > { %v6447_v59 = vpop.f32.mrf.mxu0 }
 0xf9d   : > { %v3780_v21 = vadd.f32 %v6447_v59, %v3471_v24 }
 0xf9e   : > { %v3747_v58 = vpop.f32.mrf.mxu0 }
 0xf9f   : > { %v3778_v2 = vadd.f32 %v3747_v58, %v3463_v49 }
 0xfa0   : > { %v6448_v34 = vpop.f32.mrf.mxu0 }
 0xfa1   : > { %v3781_v36 = vadd.f32 %v6448_v34, %v3474_v41 }
 0xfa2   : > { %v3750_v12 = vpop.f32.mrf.mxu0 }
 0xfa4   : > { %v6451_v5 = vpop.f32.mrf.mxu0 }
 0xfa6   : > { %v6439_v52 = vpop.f32.mrf.mxu1  ;;  %v3763_v47 = vpop.f32.mrf.mxu0 }
 0xfa7   : > { %v3487_v43 = vadd.f32 %v6439_v52, %v6427_v54 }
 0xfa8   : > { %v3478_v50 = vpop.f32.mrf.mxu1  ;;  %v6452_v18 = vpop.f32.mrf.mxu0 }
 0xfa9   : > { %v3784_v33 = vadd.f32 %v6451_v5, %v3487_v43 }
 0xfaa   : > { %v6440_v55 = vpop.f32.mrf.mxu1  ;;  %v8507_v14 = vpop.f32.mrf.mxu0 }
 0xfab   : > { %v3490_v8 = vadd.f32 %v6440_v55, %v8503_v0 }
 0xfac   : > { %v3481_v7 = vpop.f32.mrf.mxu1  ;;  %v6471_v19 = vpop.f32.mrf.mxu0 }
 0xfad   : > { %v3482_v23 = vadd.f32 %v3481_v7, %v8505_v61  ;;  %v6049_v61 = vld [vmem:[%s8627_s17] ss:$0 sm:$0xff] }
 0xfae   : > { %v4347_v20 = vpop.f32.mrf.mxu0 }
 0xfb0   : > { %v6472_v27 = vpop.f32.mrf.mxu0 }
 0xfb2   : > { %v4350_v29 = vpop.f32.mrf.mxu0 }
 0xfb3   : > { %v6459_v37 = vpop.f32.mrf.mxu1 }
 0xfb4   : > { %v4016_v28 = vadd.f32 %v6459_v37, %v3780_v21 }
 0xfb5   : > { %v3983_v39 = vpop.f32.mrf.mxu1 }
 0xfb6   : > { %v4380_v13 = vadd.f32 %v6471_v19, %v4016_v28 }
 0xfb7   : > { %v6460_v6 = vpop.f32.mrf.mxu1 }
 0xfb8   : > { %v6475_v1 = vpop.f32.mrf.mxu0  ;;  %v4017_v53 = vadd.f32 %v6460_v6, %v3781_v36 }
 0xfb9   : > { %v3986_v26 = vpop.f32.mrf.mxu1 }
 0xfba   : > { %v8511_v46 = vpop.f32.mrf.mxu0  ;;  %v4381_v34 = vadd.f32 %v6472_v27, %v4017_v53 }
 0xfbc   : > { %v8513_v9 = vpop.f32.mrf.mxu0 }
 0xfbd   : > { %8622 = vst [vmem:[#allocation10_spill] sm:$0xff] %v8513_v9 }
 0xfbe   : > { %v8515_v45 = vpop.f32.mrf.mxu0 }
 0xfbf   : > { %8623 = vst [vmem:[#allocation11_spill] sm:$0xff] %v8515_v45  ;;  %v4014_v45 = vadd.f32 %v3983_v39, %v3778_v2 }
 0xfc1   : > { %v4378_v15 = vadd.f32 %v4347_v20, %v4014_v45 }
 0xfc2   : > { %v6463_v56 = vpop.f32.mrf.mxu1 }
 0xfc3   : > { %v4020_v54 = vadd.f32 %v6463_v56, %v3784_v33 }
 0xfc4   : > { %v3999_v32 = vpop.f32.mrf.mxu1 }
 0xfc5   : > { %v4384_v20 = vadd.f32 %v6475_v1, %v4020_v54 }
 0xfc6   : > { %v6464_v10 = vpop.f32.mrf.mxu1 }
 0xfc8   : > { %v8509_v30 = vpop.f32.mrf.mxu1 }
 0xfce   : > { %v6483_v57 = vpop.f32.mrf.mxu1 }
 0xfcf   : > { %v4669_v51 = vadd.f32 %v6483_v57, %v4380_v13 }
 0xfd0   : > { %v4636_v11 = vpop.f32.mrf.mxu1 }
 0xfd1   : > { %v4667_v52 = vadd.f32 %v4636_v11, %v4378_v15 }
 0xfd2   : > { %v6484_v62 = vpop.f32.mrf.mxu1 }
 0xfd4   : > { %v4639_v25 = vpop.f32.mrf.mxu1 }
 0xfd6   : > { %v6487_v31 = vpop.f32.mrf.mxu1 }
 0xfd7   : > { %v6495_v4 = vpop.f32.mrf.mxu0 }
 0xfd8   : > { %v8517_v63 = vpop.f32.mrf.mxu1  ;;  %v4905_v37 = vadd.f32 %v6495_v4, %v4669_v51 }
 0xfd9   : > { %v4872_v35 = vpop.f32.mrf.mxu0  ;;  %8624 = vst [vmem:[#allocation12_spill] sm:$0xff] %v8517_v63  ;;  %v3479_v63 = vadd.f32 %v3478_v50, %v8501_v42  ;;  %v3785_v42 = vadd.f32 %v6452_v18, %v3490_v8 }
 0xfda   : > { %v8519_v16 = vpop.f32.mrf.mxu1  ;;  %v4903_v19 = vadd.f32 %v4872_v35, %v4667_v52 }
 0xfdb   : > { %v6496_v44 = vpop.f32.mrf.mxu0  ;;  %8625 = vst [vmem:[#allocation13_spill] sm:$0xff] %v8519_v16  ;;  %v3779_v16 = vadd.f32 %v3750_v12, %v3466_v17  ;;  %v3782_v3 = vadd.f32 %v3763_v47, %v3479_v63  ;;  %v4670_v12 = vadd.f32 %v6484_v62, %v4381_v34  ;;  %v4021_v5 = vadd.f32 %v6464_v10, %v3785_v42  ;;  %v8629_v63 = vld [vmem:[#allocation10_spill] sm:$0xff] }
 0xfdc   : > { %v8521_v22 = vpop.f32.mrf.mxu1 }
 0xfdd   : > { %v4875_v38 = vpop.f32.mrf.mxu0  ;;  %8626 = vst [vmem:[#allocation14_spill] sm:$0xff] %v8521_v22  ;;  %v4015_v59 = vadd.f32 %v3986_v26, %v3779_v16  ;;  %v4018_v39 = vadd.f32 %v3999_v32, %v3782_v3  ;;  %v3783_v26 = vadd.f32 %v8507_v14, %v3482_v23  ;;  %v4906_v47 = vadd.f32 %v6496_v44, %v4670_v12 }
 0xfdf   : > { %v4379_v6 = vadd.f32 %v4350_v29, %v4015_v59  ;;  %v4019_v27 = vadd.f32 %v8509_v30, %v3783_v26  ;;  %v4673_v29 = vadd.f32 %v6487_v31, %v4384_v20  ;;  %v4382_v11 = vadd.f32 %v8511_v46, %v4018_v39 }
 0xfe0   : > { %v8628_v35 = vld [vmem:[#allocation12_spill] sm:$0xff] }
 0xfe1   : > { %v4668_v7 = vadd.f32 %v4639_v25, %v4379_v6  ;;  %v4671_v25 = vadd.f32 %v8628_v35, %v4382_v11 }
 0xfe2   : > { %v8630_v31 = vld [vmem:[#allocation13_spill] sm:$0xff] }
 0xfe3   : > { %v4904_v14 = vadd.f32 %v4875_v38, %v4668_v7  ;;  %v8631_v38 = vld [vmem:[#allocation11_spill] sm:$0xff] }
 0xfe4   : > { %v4383_v21 = vadd.f32 %v8631_v38, %v4019_v27 }
 0xfeb   : > { %v6507_v48 = vpop.f32.mrf.mxu1 }
 0xfec   : > { %v5269_v0 = vadd.f32 %v6507_v48, %v4905_v37 }
 0xfed   : > { %v5236_v9 = vpop.f32.mrf.mxu1 }
 0xfee   : > { %v6499_v40 = vpop.f32.mrf.mxu0  ;;  %v5267_v56 = vadd.f32 %v5236_v9, %v4903_v19  ;;  %v4385_v9 = vadd.f32 %v8629_v63, %v4021_v5 }
 0xfef   : > { %v6508_v58 = vpop.f32.mrf.mxu1  ;;  %v4909_v16 = vadd.f32 %v6499_v40, %v4673_v29  ;;  %v8632_v40 = vld [vmem:[#allocation14_spill] sm:$0xff] }
 0xff0   : > { %v4888_v60 = vpop.f32.mrf.mxu0  ;;  %v5270_v1 = vadd.f32 %v6508_v58, %v4906_v47  ;;  %v4674_v49 = vadd.f32 %v8630_v31, %v4385_v9  ;;  %v4672_v36 = vadd.f32 %v8632_v40, %v4383_v21 }
 0xff1   : > { %v5239_v55 = vpop.f32.mrf.mxu1  ;;  %v4907_v2 = vadd.f32 %v4888_v60, %v4671_v25 }
 0xff2   : > { %v6500_v22 = vpop.f32.mrf.mxu0  ;;  %v5268_v24 = vadd.f32 %v5239_v55, %v4904_v14 }
 0xff3   : > { %v4910_v13 = vadd.f32 %v6500_v22, %v4674_v49 }
 0xff4   : > { %v4891_v50 = vpop.f32.mrf.mxu0 }
 0xff5   : > { %v4908_v15 = vadd.f32 %v4891_v50, %v4672_v36 }
 0xfff   : > { %v6519_v57 = vpop.f32.mrf.mxu0 }
0x1000   : > { %v5558_v32 = vadd.f32 %v6519_v57, %v5269_v0  ;;  %v6511_v18 = vpop.f32.mrf.mxu1 }
0x1001   : > { %v5525_v10 = vpop.f32.mrf.mxu0  ;;  %v5273_v17 = vadd.f32 %v6511_v18, %v4909_v16 }
0x1002   : > { %v5573_v62 = vadd.f32 %v6049_v61, %v5558_v32  ;;  %v5556_v45 = vadd.f32 %v5525_v10, %v5267_v56  ;;  %v5252_v4 = vpop.f32.mrf.mxu1 }
0x1003   : > { %v6520_v44 = vpop.f32.mrf.mxu0  ;;  %v5271_v8 = vadd.f32 %v5252_v4, %v4907_v2 }
0x1004   : > { %5582 = vst.msk [vmem:[%s7075_s3 + $0x10] sm:$0xff] %vm5579_vm2, %v5573_v62  ;;  %v5571_v30 = vadd.f32 %v6049_v61, %v5556_v45  ;;  %v5559_v46 = vadd.f32 %v6520_v44, %v5270_v1  ;;  %v6512_v41 = vpop.f32.mrf.mxu1 }
0x1005   : > { %v5528_v48 = vpop.f32.mrf.mxu0  ;;  %v5274_v58 = vadd.f32 %v6512_v41, %v4910_v13 }
0x1006   : > { %5580 = vst.msk [vmem:[%s7075_s3] sm:$0xff] %vm5579_vm2, %v5571_v30  ;;  %v5574_v28 = vadd.f32 %v6049_v61, %v5559_v46  ;;  %v5557_v43 = vadd.f32 %v5528_v48, %v5268_v24  ;;  %v5255_v51 = vpop.f32.mrf.mxu1 }
0x1007   : > { %v6523_v53 = vpop.f32.mrf.mxu0  ;;  %v5272_v52 = vadd.f32 %v5255_v51, %v4908_v15 }
0x1008   : > { %5583 = vst.msk [vmem:[%s7075_s3 + $0x18] sm:$0xff] %vm5579_vm2, %v5574_v28  ;;  %v5572_v33 = vadd.f32 %v6049_v61, %v5557_v43  ;;  %v5562_v59 = vadd.f32 %v6523_v53, %v5273_v17 }
0x1009   : > { %v5541_v60 = vpop.f32.mrf.mxu0 }
0x100a   : > { %5581 = vst.msk [vmem:[%s7075_s3 + $0x8] sm:$0xff] %vm5579_vm2, %v5572_v33  ;;  %v5577_v23 = vadd.f32 %v6049_v61, %v5562_v59  ;;  %v5560_v54 = vadd.f32 %v5541_v60, %v5271_v8 }
0x100b   : > { %v6524_v3 = vpop.f32.mrf.mxu0 }
0x100c   : > { %5586 = vst.msk [vmem:[%s7075_s3 + $0x30] sm:$0xff] %vm5579_vm2, %v5577_v23  ;;  %v5575_v22 = vadd.f32 %v6049_v61, %v5560_v54  ;;  %v5563_v34 = vadd.f32 %v6524_v3, %v5274_v58 }
0x100d   : > { %v5544_v37 = vpop.f32.mrf.mxu0 }
0x100e   : > { %5584 = vst.msk [vmem:[%s7075_s3 + $0x20] sm:$0xff] %vm5579_vm2, %v5575_v22  ;;  %v5578_v39 = vadd.f32 %v6049_v61, %v5563_v34  ;;  %v5561_v42 = vadd.f32 %v5544_v37, %v5272_v52 }
0x1010   : > { %5587 = vst.msk [vmem:[%s7075_s3 + $0x38] sm:$0xff] %vm5579_vm2, %v5578_v39  ;;  %v5576_v50 = vadd.f32 %v6049_v61, %v5561_v42 }
0x1012   : > { %5585 = vst.msk [vmem:[%s7075_s3 + $0x28] sm:$0xff] %vm5579_vm2, %v5576_v50 }
0x1013 PF: > { %s8633_s26 = sld [smem:[#allocation6_spill]] }
0x1014   : > { %s8634_s21 = sld [smem:[#allocation4_spill]] }
0x1015   : > { %s8635_s22 = sld [smem:[#allocation5_spill]] }
0x1016   : > { %s8636_s23 = sld [smem:[#allocation7_spill]] }
0x1017   : > { %s8637_s24 = sld [smem:[#allocation8_spill]] }
0x1019   : > { %s26_s25 = sadd.s32 1, %s8633_s26  }
0x101a   : > { %p23_p9 = scmp.ge.s32.totalorder %s26_s25, 6  }
0x101c   :  { %25 = sbr.rel (!%p23_p9) target bundleno = 9 (0x9), region = 168 }

</bundles_post_ra>
